<compile_context>
chip_gen: v7x
topology: tpu7x:2x2x1
jax: 0.10.0
libtpu: 0.0.40
codegen_flags: <defaults>
</compile_context>

<pallas_src>
import math
from functools import partial

import numpy as np
import jax
import jax.numpy as jnp
from jax.experimental import pallas as pl
from jax.experimental.pallas import tpu as pltpu


# ------------------- static, pre-broadcast tap-boundary masks --------------- #
def _tap_masks(H, W, K, N, C):
    """(K*K*C, N*H*W) f32 validity mask: taps in (kh, kw) order, each tap's
    spatial mask tiled over the N images and broadcast over the C channels."""
    pad = K // 2
    hh, ww = np.meshgrid(np.arange(H), np.arange(W), indexing="ij")
    L = N * H * W
    rows = []
    for kh in range(K):
        for kw in range(K):
            dh, dw = kh - pad, kw - pad
            valid = ((hh + dh >= 0) & (hh + dh < H) &
                     (ww + dw >= 0) & (ww + dw < W)).reshape(-1)   # (HW,)
            tiled = np.tile(valid, N)                              # (N*HW,)
            rows.append(np.broadcast_to(tiled, (C, L)))
    return np.concatenate(rows, axis=0).astype(np.float32)        # (K*K*C, L)


# --------------------------------- kernel ----------------------------------- #
def _imdb_kernel(x_ref, mask_ref,
                 w1_ref, b1_ref, w2_ref, b2_ref, w3_ref, b3_ref,
                 w4_ref, b4_ref, w5_ref, b5_ref,
                 cw1_ref, cb1_ref, cw2_ref, cb2_ref,
                 o_ref, patches_ref, *, H, W, K, d, N):
    # x_ref/o_ref: (C, N*HW) f32, lane-dense.  wX_ref: bf16 im2col weights
    # (Cout, K*K*C).  bX_ref: (Cout, 1) f32.  patches_ref: (K*K*C, N*HW) bf16.
    C, L = x_ref.shape
    HW = H * W
    pad = K // 2
    inv_hw = 1.0 / float(HW)

    def conv_kxk(xv, w_ref, b_ref, relu):
        # xv: (C, L) f32.  Each tap = lane roll of the flattened spatial axis,
        # zero-masked at image boundaries (mask also kills cross-image /
        # wrap-around leakage), cast to bf16 and written directly into its
        # final slot of the patches scratch -> one K=K*K*C MXU matmul per conv.
        for kh in range(K):
            for kw in range(K):
                t = kh * K + kw
                dh, dw = kh - pad, kw - pad
                shift = (-(dh * W + dw)) % L
                rolled = xv if shift == 0 else pltpu.roll(xv, shift, axis=1)
                if dh == 0 and dw == 0:
                    masked = rolled                       # center tap: all ones
                else:
                    masked = rolled * mask_ref[t * C:(t + 1) * C, :]
                patches_ref[t * C:(t + 1) * C, :] = masked.astype(jnp.bfloat16)
        # bf16 x bf16 on the MXU, f32 accumulation; bias + ReLU in f32.
        o = jnp.dot(w_ref[...], patches_ref[...],
                    preferred_element_type=jnp.float32) + b_ref[...]
        return jnp.maximum(o, 0.0) if relu else o

    # Distillation chain over the whole batch at once (lane axis = N*HW).
    # Convs 2..4 consume the FULL previous activation; their weights carry zero
    # columns for the distilled channels (== the PyTorch channel split).
    c1 = conv_kxk(x_ref[...], w1_ref, b1_ref, True)
    c2 = conv_kxk(c1, w2_ref, b2_ref, True)
    c3 = conv_kxk(c2, w3_ref, b3_ref, True)
    c4 = conv_kxk(c3, w4_ref, b4_ref, True)                       # (d, L)
    cat = jnp.concatenate([c1[:d], c2[:d], c3[:d], c4], axis=0)   # (4d, L)

    # CCA (per image: contrast = population std + spatial mean, squeeze-excite)
    # + final 1x1 conv, with the residual add fused under the store.
    for n in range(N):                                            # N tiny, static
        lo, hi = n * HW, (n + 1) * HW
        cn = cat[:, lo:hi]                                        # (4d, HW)
        mean = jnp.sum(cn, axis=-1, keepdims=True) * inv_hw       # (4d, 1)
        diff = cn - mean
        var = jnp.sum(diff * diff, axis=-1, keepdims=True) * inv_hw
        y = jnp.sqrt(var) + mean                                  # std + avg pool
        h = jnp.maximum(
            jnp.dot(cw1_ref[...], y, preferred_element_type=jnp.float32)
            + cb1_ref[...], 0.0)
        s = jax.nn.sigmoid(
            jnp.dot(cw2_ref[...], h, preferred_element_type=jnp.float32)
            + cb2_ref[...])                                       # (4d, 1)
        scaled = (cn * s).astype(jnp.bfloat16)                    # (4d, HW)
        out = (jnp.dot(w5_ref[...], scaled, preferred_element_type=jnp.float32)
               + b5_ref[...] + x_ref[:, lo:hi])
        o_ref[:, lo:hi] = out.astype(o_ref.dtype)


# ---------------------------- parameters & glue ------------------------------ #
def init_params(key, n_feats=16, kernel_size=3, distillation_rate=0.25,
                reduction=16):
    d = int(n_feats * distillation_rate)
    r = n_feats - d
    K = kernel_size
    ks = jax.random.split(key, 14)

    def conv_kxk_init(kw_key, kb_key, cin, cout, cin_full, front_pad):
        fan_in = K * K * cin
        bound = 1.0 / math.sqrt(fan_in)
        w = jax.random.uniform(kw_key, (K, K, cin, cout), jnp.float32,
                               -bound, bound)
        b = jax.random.uniform(kb_key, (cout, 1), jnp.float32, -bound, bound)
        if cin_full != cin:
            # Zero columns where the PyTorch module slices away the distilled
            # channels -> every channel block stays full-width and aligned.
            w = jnp.pad(w, ((0, 0), (0, 0),
                            (front_pad, cin_full - cin - front_pad), (0, 0)))
        w_flat = w.reshape(K * K * cin_full, cout).T          # (cout, K*K*cin_full)
        return w_flat, b

    def conv1x1_init(kw_key, kb_key, cin, cout):
        bound = 1.0 / math.sqrt(cin)
        w = jax.random.uniform(kw_key, (cout, cin), jnp.float32, -bound, bound)
        b = jax.random.uniform(kb_key, (cout, 1), jnp.float32, -bound, bound)
        return w, b

    p = {"d": d, "r": r, "kernel_size": K, "n_feats": n_feats}
    p["w1"], p["b1"] = conv_kxk_init(ks[0], ks[1], n_feats, n_feats, n_feats, 0)
    p["w2"], p["b2"] = conv_kxk_init(ks[2], ks[3], r, n_feats, n_feats, d)
    p["w3"], p["b3"] = conv_kxk_init(ks[4], ks[5], r, n_feats, n_feats, d)
    p["w4"], p["b4"] = conv_kxk_init(ks[6], ks[7], r, d, n_feats, d)
    p["w5"], p["b5"] = conv1x1_init(ks[8], ks[9], n_feats, n_feats)

    c = d * 4                       # CCA channel count (== n_feats at rate 0.25)
    ch = max(c // reduction, 1)
    p["cca_w1"], p["cca_b1"] = conv1x1_init(ks[10], ks[11], c, ch)  # (ch,c),(ch,1)
    p["cca_w2"], p["cca_b2"] = conv1x1_init(ks[12], ks[13], ch, c)  # (c,ch),(c,1)
    return p


def imdb_forward(x_nchw, p):
    N, C, H, W = x_nchw.shape
    HW = H * W
    L = N * HW
    K = p["kernel_size"]

    # NCHW -> lane-dense (C, N*HW): the whole batch shares one flattened lane
    # axis so the conv chain runs once; boundary transposes are tiny (64 KiB).
    x2d = x_nchw.reshape(N, C, HW).transpose(1, 0, 2).reshape(C, L)
    masks = jnp.asarray(_tap_masks(H, W, K, N, C))            # (K*K*C, L) f32

    bf16 = lambda a: a.astype(jnp.bfloat16)                   # MXU operands only
    vmem = pl.BlockSpec(memory_space=pltpu.MemorySpace.VMEM)
    out2d = pl.pallas_call(
        partial(_imdb_kernel, H=H, W=W, K=K, d=p["d"], N=N),
        out_shape=jax.ShapeDtypeStruct((C, L), x_nchw.dtype),
        in_specs=[vmem] * 16,
        out_specs=vmem,
        scratch_shapes=[pltpu.VMEM((K * K * C, L), jnp.bfloat16)],  # patches
        input_output_aliases={0: 0},                          # x2d fully read first
    )(x2d, masks,
      bf16(p["w1"]), p["b1"], bf16(p["w2"]), p["b2"],
      bf16(p["w3"]), p["b3"], bf16(p["w4"]), p["b4"],
      bf16(p["w5"]), p["b5"],
      p["cca_w1"], p["cca_b1"], p["cca_w2"], p["cca_b2"])
    return out2d.reshape(C, N, HW).transpose(1, 0, 2).reshape(N, C, H, W)


if __name__ == "__main__":
    key = jax.random.PRNGKey(0)
    kx, kp = jax.random.split(key)

    # IMDB(n_feats=16, kernel_size=3, distillation_rate=0.25, act=ReLU)
    N, n_feats, H, W = 2, 16, 16, 16
    x = jax.random.normal(kx, (N, n_feats, H, W), jnp.float32)   # NCHW, like PyTorch
    params = init_params(kp, n_feats=n_feats, kernel_size=3,
                         distillation_rate=0.25, reduction=16)

    fwd = jax.jit(lambda xx: imdb_forward(xx, params))
    out = fwd(x)
    jax.block_until_ready(out)
    assert out.shape == (N, n_feats, H, W) and out.dtype == jnp.float32
    assert bool(jnp.all(jnp.isfinite(out)))
    print("KERNEL_OK")
</pallas_src>

<mosaic_0001>
module attributes {stable_mosaic.version = 11 : i64} {
  func.func @_imdb_kernel(%arg0: memref<16x512xf32, #tpu.memory_space<vmem>>, %arg1: memref<144x512xf32, #tpu.memory_space<vmem>>, %arg2: memref<16x144xbf16, #tpu.memory_space<vmem>>, %arg3: memref<16x1xf32, #tpu.memory_space<vmem>>, %arg4: memref<16x144xbf16, #tpu.memory_space<vmem>>, %arg5: memref<16x1xf32, #tpu.memory_space<vmem>>, %arg6: memref<16x144xbf16, #tpu.memory_space<vmem>>, %arg7: memref<16x1xf32, #tpu.memory_space<vmem>>, %arg8: memref<4x144xbf16, #tpu.memory_space<vmem>>, %arg9: memref<4x1xf32, #tpu.memory_space<vmem>>, %arg10: memref<16x16xbf16, #tpu.memory_space<vmem>>, %arg11: memref<16x1xf32, #tpu.memory_space<vmem>>, %arg12: memref<1x16xf32, #tpu.memory_space<vmem>>, %arg13: memref<1x1xf32, #tpu.memory_space<vmem>>, %arg14: memref<16x1xf32, #tpu.memory_space<vmem>>, %arg15: memref<16x1xf32, #tpu.memory_space<vmem>>, %arg16: memref<16x512xf32, #tpu.memory_space<vmem>>, %arg17: memref<144x512xbf16, #tpu.memory_space<vmem>>) attributes {dimension_semantics = [], scalar_prefetch = 0 : i64, scratch_operands = 1 : i64, tpu.core_type = #tpu.core_type<tc>} {
    %c0 = arith.constant 0 : index
    %c0_0 = arith.constant 0 : index
    %0 = vector.load %arg0[%c0, %c0_0] : memref<16x512xf32, #tpu.memory_space<vmem>>, vector<16x512xf32>
    %c17_i32 = arith.constant 17 : i32
    %1 = tpu.dynamic_rotate %0 by %c17_i32 dim 1 : vector<16x512xf32>, i32 -> vector<16x512xf32>
    %c0_1 = arith.constant 0 : index
    %c0_2 = arith.constant 0 : index
    %2 = vector.load %arg1[%c0_1, %c0_2] : memref<144x512xf32, #tpu.memory_space<vmem>>, vector<16x512xf32>
    %3 = arith.mulf %1, %2 : vector<16x512xf32>
    %4 = arith.truncf %3 : vector<16x512xf32> to vector<16x512xbf16>
    %c0_3 = arith.constant 0 : index
    %c0_4 = arith.constant 0 : index
    %5 = vector.load %arg17[%c0_3, %c0_4] : memref<144x512xbf16, #tpu.memory_space<vmem>>, vector<16x512xbf16>
    tpu.vector_store %arg17[%c0_3, %c0_4], %4 {strides = array<i32>} : memref<144x512xbf16, #tpu.memory_space<vmem>>, vector<16x512xbf16>,
    %c16_i32 = arith.constant 16 : i32
    %6 = tpu.dynamic_rotate %0 by %c16_i32 dim 1 : vector<16x512xf32>, i32 -> vector<16x512xf32>
    %c16 = arith.constant 16 : index
    %c0_5 = arith.constant 0 : index
    %7 = vector.load %arg1[%c16, %c0_5] : memref<144x512xf32, #tpu.memory_space<vmem>>, vector<16x512xf32>
    %8 = arith.mulf %6, %7 : vector<16x512xf32>
    %9 = arith.truncf %8 : vector<16x512xf32> to vector<16x512xbf16>
    %c16_6 = arith.constant 16 : index
    %c0_7 = arith.constant 0 : index
    %10 = vector.load %arg17[%c16_6, %c0_7] : memref<144x512xbf16, #tpu.memory_space<vmem>>, vector<16x512xbf16>
    tpu.vector_store %arg17[%c16_6, %c0_7], %9 {strides = array<i32>} : memref<144x512xbf16, #tpu.memory_space<vmem>>, vector<16x512xbf16>,
    %c15_i32 = arith.constant 15 : i32
    %11 = tpu.dynamic_rotate %0 by %c15_i32 dim 1 : vector<16x512xf32>, i32 -> vector<16x512xf32>
    %c32 = arith.constant 32 : index
    %c0_8 = arith.constant 0 : index
    %12 = vector.load %arg1[%c32, %c0_8] : memref<144x512xf32, #tpu.memory_space<vmem>>, vector<16x512xf32>
    %13 = arith.mulf %11, %12 : vector<16x512xf32>
    %14 = arith.truncf %13 : vector<16x512xf32> to vector<16x512xbf16>
    %c32_9 = arith.constant 32 : index
    %c0_10 = arith.constant 0 : index
    %15 = vector.load %arg17[%c32_9, %c0_10] : memref<144x512xbf16, #tpu.memory_space<vmem>>, vector<16x512xbf16>
    tpu.vector_store %arg17[%c32_9, %c0_10], %14 {strides = array<i32>} : memref<144x512xbf16, #tpu.memory_space<vmem>>, vector<16x512xbf16>,
    %c1_i32 = arith.constant 1 : i32
    %16 = tpu.dynamic_rotate %0 by %c1_i32 dim 1 : vector<16x512xf32>, i32 -> vector<16x512xf32>
    %c48 = arith.constant 48 : index
    %c0_11 = arith.constant 0 : index
    %17 = vector.load %arg1[%c48, %c0_11] : memref<144x512xf32, #tpu.memory_space<vmem>>, vector<16x512xf32>
    %18 = arith.mulf %16, %17 : vector<16x512xf32>
    %19 = arith.truncf %18 : vector<16x512xf32> to vector<16x512xbf16>
    %c48_12 = arith.constant 48 : index
    %c0_13 = arith.constant 0 : index
    %20 = vector.load %arg17[%c48_12, %c0_13] : memref<144x512xbf16, #tpu.memory_space<vmem>>, vector<16x512xbf16>
    tpu.vector_store %arg17[%c48_12, %c0_13], %19 {strides = array<i32>} : memref<144x512xbf16, #tpu.memory_space<vmem>>, vector<16x512xbf16>,
    %21 = arith.truncf %0 : vector<16x512xf32> to vector<16x512xbf16>
    %c64 = arith.constant 64 : index
    %c0_14 = arith.constant 0 : index
    %22 = vector.load %arg17[%c64, %c0_14] : memref<144x512xbf16, #tpu.memory_space<vmem>>, vector<16x512xbf16>
    tpu.vector_store %arg17[%c64, %c0_14], %21 {strides = array<i32>} : memref<144x512xbf16, #tpu.memory_space<vmem>>, vector<16x512xbf16>,
    %c511_i32 = arith.constant 511 : i32
    %23 = tpu.dynamic_rotate %0 by %c511_i32 dim 1 : vector<16x512xf32>, i32 -> vector<16x512xf32>
    %c80 = arith.constant 80 : index
    %c0_15 = arith.constant 0 : index
    %24 = vector.load %arg1[%c80, %c0_15] : memref<144x512xf32, #tpu.memory_space<vmem>>, vector<16x512xf32>
    %25 = arith.mulf %23, %24 : vector<16x512xf32>
    %26 = arith.truncf %25 : vector<16x512xf32> to vector<16x512xbf16>
    %c80_16 = arith.constant 80 : index
    %c0_17 = arith.constant 0 : index
    %27 = vector.load %arg17[%c80_16, %c0_17] : memref<144x512xbf16, #tpu.memory_space<vmem>>, vector<16x512xbf16>
    tpu.vector_store %arg17[%c80_16, %c0_17], %26 {strides = array<i32>} : memref<144x512xbf16, #tpu.memory_space<vmem>>, vector<16x512xbf16>,
    %c497_i32 = arith.constant 497 : i32
    %28 = tpu.dynamic_rotate %0 by %c497_i32 dim 1 : vector<16x512xf32>, i32 -> vector<16x512xf32>
    %c96 = arith.constant 96 : index
    %c0_18 = arith.constant 0 : index
    %29 = vector.load %arg1[%c96, %c0_18] : memref<144x512xf32, #tpu.memory_space<vmem>>, vector<16x512xf32>
    %30 = arith.mulf %28, %29 : vector<16x512xf32>
    %31 = arith.truncf %30 : vector<16x512xf32> to vector<16x512xbf16>
    %c96_19 = arith.constant 96 : index
    %c0_20 = arith.constant 0 : index
    %32 = vector.load %arg17[%c96_19, %c0_20] : memref<144x512xbf16, #tpu.memory_space<vmem>>, vector<16x512xbf16>
    tpu.vector_store %arg17[%c96_19, %c0_20], %31 {strides = array<i32>} : memref<144x512xbf16, #tpu.memory_space<vmem>>, vector<16x512xbf16>,
    %c496_i32 = arith.constant 496 : i32
    %33 = tpu.dynamic_rotate %0 by %c496_i32 dim 1 : vector<16x512xf32>, i32 -> vector<16x512xf32>
    %c112 = arith.constant 112 : index
    %c0_21 = arith.constant 0 : index
    %34 = vector.load %arg1[%c112, %c0_21] : memref<144x512xf32, #tpu.memory_space<vmem>>, vector<16x512xf32>
    %35 = arith.mulf %33, %34 : vector<16x512xf32>
    %36 = arith.truncf %35 : vector<16x512xf32> to vector<16x512xbf16>
    %c112_22 = arith.constant 112 : index
    %c0_23 = arith.constant 0 : index
    %37 = vector.load %arg17[%c112_22, %c0_23] : memref<144x512xbf16, #tpu.memory_space<vmem>>, vector<16x512xbf16>
    tpu.vector_store %arg17[%c112_22, %c0_23], %36 {strides = array<i32>} : memref<144x512xbf16, #tpu.memory_space<vmem>>, vector<16x512xbf16>,
    %c495_i32 = arith.constant 495 : i32
    %38 = tpu.dynamic_rotate %0 by %c495_i32 dim 1 : vector<16x512xf32>, i32 -> vector<16x512xf32>
    %c128 = arith.constant 128 : index
    %c0_24 = arith.constant 0 : index
    %39 = vector.load %arg1[%c128, %c0_24] : memref<144x512xf32, #tpu.memory_space<vmem>>, vector<16x512xf32>
    %40 = arith.mulf %38, %39 : vector<16x512xf32>
    %41 = arith.truncf %40 : vector<16x512xf32> to vector<16x512xbf16>
    %c128_25 = arith.constant 128 : index
    %c0_26 = arith.constant 0 : index
    %42 = vector.load %arg17[%c128_25, %c0_26] : memref<144x512xbf16, #tpu.memory_space<vmem>>, vector<16x512xbf16>
    tpu.vector_store %arg17[%c128_25, %c0_26], %41 {strides = array<i32>} : memref<144x512xbf16, #tpu.memory_space<vmem>>, vector<16x512xbf16>,
    %c0_27 = arith.constant 0 : index
    %c0_28 = arith.constant 0 : index
    %43 = vector.load %arg2[%c0_27, %c0_28] : memref<16x144xbf16, #tpu.memory_space<vmem>>, vector<16x144xbf16>
    %c0_29 = arith.constant 0 : index
    %c0_30 = arith.constant 0 : index
    %44 = vector.load %arg17[%c0_29, %c0_30] : memref<144x512xbf16, #tpu.memory_space<vmem>>, vector<144x512xbf16>
    %cst = arith.constant dense<0.000000e+00> : vector<16x512xf32>
    %45 = tpu.matmul %43, %44, %cst {dimension_numbers = #tpu.dot_dimension_numbers<[1], [0], [0], [1], [0, 0, 1, 1], [], []>} : vector<16x144xbf16>, vector<144x512xbf16>, vector<16x512xf32> -> vector<16x512xf32>
    %c0_31 = arith.constant 0 : index
    %c0_32 = arith.constant 0 : index
    %46 = vector.load %arg3[%c0_31, %c0_32] : memref<16x1xf32, #tpu.memory_space<vmem>>, vector<16x1xf32>
    %47 = vector.broadcast %46 : vector<16x1xf32> to vector<16x512xf32>
    %48 = arith.addf %45, %47 : vector<16x512xf32>
    %cst_33 = arith.constant 0.000000e+00 : f32
    %49 = vector.broadcast %cst_33 : f32 to vector<16x512xf32>
    %50 = arith.maximumf %48, %49 : vector<16x512xf32>
    %c17_i32_34 = arith.constant 17 : i32
    %51 = tpu.dynamic_rotate %50 by %c17_i32_34 dim 1 : vector<16x512xf32>, i32 -> vector<16x512xf32>
    %c0_35 = arith.constant 0 : index
    %c0_36 = arith.constant 0 : index
    %52 = vector.load %arg1[%c0_35, %c0_36] : memref<144x512xf32, #tpu.memory_space<vmem>>, vector<16x512xf32>
    %53 = arith.mulf %51, %52 : vector<16x512xf32>
    %54 = arith.truncf %53 : vector<16x512xf32> to vector<16x512xbf16>
    %c0_37 = arith.constant 0 : index
    %c0_38 = arith.constant 0 : index
    %55 = vector.load %arg17[%c0_37, %c0_38] : memref<144x512xbf16, #tpu.memory_space<vmem>>, vector<16x512xbf16>
    tpu.vector_store %arg17[%c0_37, %c0_38], %54 {strides = array<i32>} : memref<144x512xbf16, #tpu.memory_space<vmem>>, vector<16x512xbf16>,
    %c16_i32_39 = arith.constant 16 : i32
    %56 = tpu.dynamic_rotate %50 by %c16_i32_39 dim 1 : vector<16x512xf32>, i32 -> vector<16x512xf32>
    %c16_40 = arith.constant 16 : index
    %c0_41 = arith.constant 0 : index
    %57 = vector.load %arg1[%c16_40, %c0_41] : memref<144x512xf32, #tpu.memory_space<vmem>>, vector<16x512xf32>
    %58 = arith.mulf %56, %57 : vector<16x512xf32>
    %59 = arith.truncf %58 : vector<16x512xf32> to vector<16x512xbf16>
    %c16_42 = arith.constant 16 : index
    %c0_43 = arith.constant 0 : index
    %60 = vector.load %arg17[%c16_42, %c0_43] : memref<144x512xbf16, #tpu.memory_space<vmem>>, vector<16x512xbf16>
    tpu.vector_store %arg17[%c16_42, %c0_43], %59 {strides = array<i32>} : memref<144x512xbf16, #tpu.memory_space<vmem>>, vector<16x512xbf16>,
    %c15_i32_44 = arith.constant 15 : i32
    %61 = tpu.dynamic_rotate %50 by %c15_i32_44 dim 1 : vector<16x512xf32>, i32 -> vector<16x512xf32>
    %c32_45 = arith.constant 32 : index
    %c0_46 = arith.constant 0 : index
    %62 = vector.load %arg1[%c32_45, %c0_46] : memref<144x512xf32, #tpu.memory_space<vmem>>, vector<16x512xf32>
    %63 = arith.mulf %61, %62 : vector<16x512xf32>
    %64 = arith.truncf %63 : vector<16x512xf32> to vector<16x512xbf16>
    %c32_47 = arith.constant 32 : index
    %c0_48 = arith.constant 0 : index
    %65 = vector.load %arg17[%c32_47, %c0_48] : memref<144x512xbf16, #tpu.memory_space<vmem>>, vector<16x512xbf16>
    tpu.vector_store %arg17[%c32_47, %c0_48], %64 {strides = array<i32>} : memref<144x512xbf16, #tpu.memory_space<vmem>>, vector<16x512xbf16>,
    %c1_i32_49 = arith.constant 1 : i32
    %66 = tpu.dynamic_rotate %50 by %c1_i32_49 dim 1 : vector<16x512xf32>, i32 -> vector<16x512xf32>
    %c48_50 = arith.constant 48 : index
    %c0_51 = arith.constant 0 : index
    %67 = vector.load %arg1[%c48_50, %c0_51] : memref<144x512xf32, #tpu.memory_space<vmem>>, vector<16x512xf32>
    %68 = arith.mulf %66, %67 : vector<16x512xf32>
    %69 = arith.truncf %68 : vector<16x512xf32> to vector<16x512xbf16>
    %c48_52 = arith.constant 48 : index
    %c0_53 = arith.constant 0 : index
    %70 = vector.load %arg17[%c48_52, %c0_53] : memref<144x512xbf16, #tpu.memory_space<vmem>>, vector<16x512xbf16>
    tpu.vector_store %arg17[%c48_52, %c0_53], %69 {strides = array<i32>} : memref<144x512xbf16, #tpu.memory_space<vmem>>, vector<16x512xbf16>,
    %71 = arith.truncf %50 : vector<16x512xf32> to vector<16x512xbf16>
    %c64_54 = arith.constant 64 : index
    %c0_55 = arith.constant 0 : index
    %72 = vector.load %arg17[%c64_54, %c0_55] : memref<144x512xbf16, #tpu.memory_space<vmem>>, vector<16x512xbf16>
    tpu.vector_store %arg17[%c64_54, %c0_55], %71 {strides = array<i32>} : memref<144x512xbf16, #tpu.memory_space<vmem>>, vector<16x512xbf16>,
    %c511_i32_56 = arith.constant 511 : i32
    %73 = tpu.dynamic_rotate %50 by %c511_i32_56 dim 1 : vector<16x512xf32>, i32 -> vector<16x512xf32>
    %c80_57 = arith.constant 80 : index
    %c0_58 = arith.constant 0 : index
    %74 = vector.load %arg1[%c80_57, %c0_58] : memref<144x512xf32, #tpu.memory_space<vmem>>, vector<16x512xf32>
    %75 = arith.mulf %73, %74 : vector<16x512xf32>
    %76 = arith.truncf %75 : vector<16x512xf32> to vector<16x512xbf16>
    %c80_59 = arith.constant 80 : index
    %c0_60 = arith.constant 0 : index
    %77 = vector.load %arg17[%c80_59, %c0_60] : memref<144x512xbf16, #tpu.memory_space<vmem>>, vector<16x512xbf16>
    tpu.vector_store %arg17[%c80_59, %c0_60], %76 {strides = array<i32>} : memref<144x512xbf16, #tpu.memory_space<vmem>>, vector<16x512xbf16>,
    %c497_i32_61 = arith.constant 497 : i32
    %78 = tpu.dynamic_rotate %50 by %c497_i32_61 dim 1 : vector<16x512xf32>, i32 -> vector<16x512xf32>
    %c96_62 = arith.constant 96 : index
    %c0_63 = arith.constant 0 : index
    %79 = vector.load %arg1[%c96_62, %c0_63] : memref<144x512xf32, #tpu.memory_space<vmem>>, vector<16x512xf32>
    %80 = arith.mulf %78, %79 : vector<16x512xf32>
    %81 = arith.truncf %80 : vector<16x512xf32> to vector<16x512xbf16>
    %c96_64 = arith.constant 96 : index
    %c0_65 = arith.constant 0 : index
    %82 = vector.load %arg17[%c96_64, %c0_65] : memref<144x512xbf16, #tpu.memory_space<vmem>>, vector<16x512xbf16>
    tpu.vector_store %arg17[%c96_64, %c0_65], %81 {strides = array<i32>} : memref<144x512xbf16, #tpu.memory_space<vmem>>, vector<16x512xbf16>,
    %c496_i32_66 = arith.constant 496 : i32
    %83 = tpu.dynamic_rotate %50 by %c496_i32_66 dim 1 : vector<16x512xf32>, i32 -> vector<16x512xf32>
    %c112_67 = arith.constant 112 : index
    %c0_68 = arith.constant 0 : index
    %84 = vector.load %arg1[%c112_67, %c0_68] : memref<144x512xf32, #tpu.memory_space<vmem>>, vector<16x512xf32>
    %85 = arith.mulf %83, %84 : vector<16x512xf32>
    %86 = arith.truncf %85 : vector<16x512xf32> to vector<16x512xbf16>
    %c112_69 = arith.constant 112 : index
    %c0_70 = arith.constant 0 : index
    %87 = vector.load %arg17[%c112_69, %c0_70] : memref<144x512xbf16, #tpu.memory_space<vmem>>, vector<16x512xbf16>
    tpu.vector_store %arg17[%c112_69, %c0_70], %86 {strides = array<i32>} : memref<144x512xbf16, #tpu.memory_space<vmem>>, vector<16x512xbf16>,
    %c495_i32_71 = arith.constant 495 : i32
    %88 = tpu.dynamic_rotate %50 by %c495_i32_71 dim 1 : vector<16x512xf32>, i32 -> vector<16x512xf32>
    %c128_72 = arith.constant 128 : index
    %c0_73 = arith.constant 0 : index
    %89 = vector.load %arg1[%c128_72, %c0_73] : memref<144x512xf32, #tpu.memory_space<vmem>>, vector<16x512xf32>
    %90 = arith.mulf %88, %89 : vector<16x512xf32>
    %91 = arith.truncf %90 : vector<16x512xf32> to vector<16x512xbf16>
    %c128_74 = arith.constant 128 : index
    %c0_75 = arith.constant 0 : index
    %92 = vector.load %arg17[%c128_74, %c0_75] : memref<144x512xbf16, #tpu.memory_space<vmem>>, vector<16x512xbf16>
    tpu.vector_store %arg17[%c128_74, %c0_75], %91 {strides = array<i32>} : memref<144x512xbf16, #tpu.memory_space<vmem>>, vector<16x512xbf16>,
    %c0_76 = arith.constant 0 : index
    %c0_77 = arith.constant 0 : index
    %93 = vector.load %arg4[%c0_76, %c0_77] : memref<16x144xbf16, #tpu.memory_space<vmem>>, vector<16x144xbf16>
    %c0_78 = arith.constant 0 : index
    %c0_79 = arith.constant 0 : index
    %94 = vector.load %arg17[%c0_78, %c0_79] : memref<144x512xbf16, #tpu.memory_space<vmem>>, vector<144x512xbf16>
    %cst_80 = arith.constant dense<0.000000e+00> : vector<16x512xf32>
    %95 = tpu.matmul %93, %94, %cst_80 {dimension_numbers = #tpu.dot_dimension_numbers<[1], [0], [0], [1], [0, 0, 1, 1], [], []>} : vector<16x144xbf16>, vector<144x512xbf16>, vector<16x512xf32> -> vector<16x512xf32>
    %c0_81 = arith.constant 0 : index
    %c0_82 = arith.constant 0 : index
    %96 = vector.load %arg5[%c0_81, %c0_82] : memref<16x1xf32, #tpu.memory_space<vmem>>, vector<16x1xf32>
    %97 = vector.broadcast %96 : vector<16x1xf32> to vector<16x512xf32>
    %98 = arith.addf %95, %97 : vector<16x512xf32>
    %cst_83 = arith.constant 0.000000e+00 : f32
    %99 = vector.broadcast %cst_83 : f32 to vector<16x512xf32>
    %100 = arith.maximumf %98, %99 : vector<16x512xf32>
    %c17_i32_84 = arith.constant 17 : i32
    %101 = tpu.dynamic_rotate %100 by %c17_i32_84 dim 1 : vector<16x512xf32>, i32 -> vector<16x512xf32>
    %c0_85 = arith.constant 0 : index
    %c0_86 = arith.constant 0 : index
    %102 = vector.load %arg1[%c0_85, %c0_86] : memref<144x512xf32, #tpu.memory_space<vmem>>, vector<16x512xf32>
    %103 = arith.mulf %101, %102 : vector<16x512xf32>
    %104 = arith.truncf %103 : vector<16x512xf32> to vector<16x512xbf16>
    %c0_87 = arith.constant 0 : index
    %c0_88 = arith.constant 0 : index
    %105 = vector.load %arg17[%c0_87, %c0_88] : memref<144x512xbf16, #tpu.memory_space<vmem>>, vector<16x512xbf16>
    tpu.vector_store %arg17[%c0_87, %c0_88], %104 {strides = array<i32>} : memref<144x512xbf16, #tpu.memory_space<vmem>>, vector<16x512xbf16>,
    %c16_i32_89 = arith.constant 16 : i32
    %106 = tpu.dynamic_rotate %100 by %c16_i32_89 dim 1 : vector<16x512xf32>, i32 -> vector<16x512xf32>
    %c16_90 = arith.constant 16 : index
    %c0_91 = arith.constant 0 : index
    %107 = vector.load %arg1[%c16_90, %c0_91] : memref<144x512xf32, #tpu.memory_space<vmem>>, vector<16x512xf32>
    %108 = arith.mulf %106, %107 : vector<16x512xf32>
    %109 = arith.truncf %108 : vector<16x512xf32> to vector<16x512xbf16>
    %c16_92 = arith.constant 16 : index
    %c0_93 = arith.constant 0 : index
    %110 = vector.load %arg17[%c16_92, %c0_93] : memref<144x512xbf16, #tpu.memory_space<vmem>>, vector<16x512xbf16>
    tpu.vector_store %arg17[%c16_92, %c0_93], %109 {strides = array<i32>} : memref<144x512xbf16, #tpu.memory_space<vmem>>, vector<16x512xbf16>,
    %c15_i32_94 = arith.constant 15 : i32
    %111 = tpu.dynamic_rotate %100 by %c15_i32_94 dim 1 : vector<16x512xf32>, i32 -> vector<16x512xf32>
    %c32_95 = arith.constant 32 : index
    %c0_96 = arith.constant 0 : index
    %112 = vector.load %arg1[%c32_95, %c0_96] : memref<144x512xf32, #tpu.memory_space<vmem>>, vector<16x512xf32>
    %113 = arith.mulf %111, %112 : vector<16x512xf32>
    %114 = arith.truncf %113 : vector<16x512xf32> to vector<16x512xbf16>
    %c32_97 = arith.constant 32 : index
    %c0_98 = arith.constant 0 : index
    %115 = vector.load %arg17[%c32_97, %c0_98] : memref<144x512xbf16, #tpu.memory_space<vmem>>, vector<16x512xbf16>
    tpu.vector_store %arg17[%c32_97, %c0_98], %114 {strides = array<i32>} : memref<144x512xbf16, #tpu.memory_space<vmem>>, vector<16x512xbf16>,
    %c1_i32_99 = arith.constant 1 : i32
    %116 = tpu.dynamic_rotate %100 by %c1_i32_99 dim 1 : vector<16x512xf32>, i32 -> vector<16x512xf32>
    %c48_100 = arith.constant 48 : index
    %c0_101 = arith.constant 0 : index
    %117 = vector.load %arg1[%c48_100, %c0_101] : memref<144x512xf32, #tpu.memory_space<vmem>>, vector<16x512xf32>
    %118 = arith.mulf %116, %117 : vector<16x512xf32>
    %119 = arith.truncf %118 : vector<16x512xf32> to vector<16x512xbf16>
    %c48_102 = arith.constant 48 : index
    %c0_103 = arith.constant 0 : index
    %120 = vector.load %arg17[%c48_102, %c0_103] : memref<144x512xbf16, #tpu.memory_space<vmem>>, vector<16x512xbf16>
    tpu.vector_store %arg17[%c48_102, %c0_103], %119 {strides = array<i32>} : memref<144x512xbf16, #tpu.memory_space<vmem>>, vector<16x512xbf16>,
    %121 = arith.truncf %100 : vector<16x512xf32> to vector<16x512xbf16>
    %c64_104 = arith.constant 64 : index
    %c0_105 = arith.constant 0 : index
    %122 = vector.load %arg17[%c64_104, %c0_105] : memref<144x512xbf16, #tpu.memory_space<vmem>>, vector<16x512xbf16>
    tpu.vector_store %arg17[%c64_104, %c0_105], %121 {strides = array<i32>} : memref<144x512xbf16, #tpu.memory_space<vmem>>, vector<16x512xbf16>,
    %c511_i32_106 = arith.constant 511 : i32
    %123 = tpu.dynamic_rotate %100 by %c511_i32_106 dim 1 : vector<16x512xf32>, i32 -> vector<16x512xf32>
    %c80_107 = arith.constant 80 : index
    %c0_108 = arith.constant 0 : index
    %124 = vector.load %arg1[%c80_107, %c0_108] : memref<144x512xf32, #tpu.memory_space<vmem>>, vector<16x512xf32>
    %125 = arith.mulf %123, %124 : vector<16x512xf32>
    %126 = arith.truncf %125 : vector<16x512xf32> to vector<16x512xbf16>
    %c80_109 = arith.constant 80 : index
    %c0_110 = arith.constant 0 : index
    %127 = vector.load %arg17[%c80_109, %c0_110] : memref<144x512xbf16, #tpu.memory_space<vmem>>, vector<16x512xbf16>
    tpu.vector_store %arg17[%c80_109, %c0_110], %126 {strides = array<i32>} : memref<144x512xbf16, #tpu.memory_space<vmem>>, vector<16x512xbf16>,
    %c497_i32_111 = arith.constant 497 : i32
    %128 = tpu.dynamic_rotate %100 by %c497_i32_111 dim 1 : vector<16x512xf32>, i32 -> vector<16x512xf32>
    %c96_112 = arith.constant 96 : index
    %c0_113 = arith.constant 0 : index
    %129 = vector.load %arg1[%c96_112, %c0_113] : memref<144x512xf32, #tpu.memory_space<vmem>>, vector<16x512xf32>
    %130 = arith.mulf %128, %129 : vector<16x512xf32>
    %131 = arith.truncf %130 : vector<16x512xf32> to vector<16x512xbf16>
    %c96_114 = arith.constant 96 : index
    %c0_115 = arith.constant 0 : index
    %132 = vector.load %arg17[%c96_114, %c0_115] : memref<144x512xbf16, #tpu.memory_space<vmem>>, vector<16x512xbf16>
    tpu.vector_store %arg17[%c96_114, %c0_115], %131 {strides = array<i32>} : memref<144x512xbf16, #tpu.memory_space<vmem>>, vector<16x512xbf16>,
    %c496_i32_116 = arith.constant 496 : i32
    %133 = tpu.dynamic_rotate %100 by %c496_i32_116 dim 1 : vector<16x512xf32>, i32 -> vector<16x512xf32>
    %c112_117 = arith.constant 112 : index
    %c0_118 = arith.constant 0 : index
    %134 = vector.load %arg1[%c112_117, %c0_118] : memref<144x512xf32, #tpu.memory_space<vmem>>, vector<16x512xf32>
    %135 = arith.mulf %133, %134 : vector<16x512xf32>
    %136 = arith.truncf %135 : vector<16x512xf32> to vector<16x512xbf16>
    %c112_119 = arith.constant 112 : index
    %c0_120 = arith.constant 0 : index
    %137 = vector.load %arg17[%c112_119, %c0_120] : memref<144x512xbf16, #tpu.memory_space<vmem>>, vector<16x512xbf16>
    tpu.vector_store %arg17[%c112_119, %c0_120], %136 {strides = array<i32>} : memref<144x512xbf16, #tpu.memory_space<vmem>>, vector<16x512xbf16>,
    %c495_i32_121 = arith.constant 495 : i32
    %138 = tpu.dynamic_rotate %100 by %c495_i32_121 dim 1 : vector<16x512xf32>, i32 -> vector<16x512xf32>
    %c128_122 = arith.constant 128 : index
    %c0_123 = arith.constant 0 : index
    %139 = vector.load %arg1[%c128_122, %c0_123] : memref<144x512xf32, #tpu.memory_space<vmem>>, vector<16x512xf32>
    %140 = arith.mulf %138, %139 : vector<16x512xf32>
    %141 = arith.truncf %140 : vector<16x512xf32> to vector<16x512xbf16>
    %c128_124 = arith.constant 128 : index
    %c0_125 = arith.constant 0 : index
    %142 = vector.load %arg17[%c128_124, %c0_125] : memref<144x512xbf16, #tpu.memory_space<vmem>>, vector<16x512xbf16>
    tpu.vector_store %arg17[%c128_124, %c0_125], %141 {strides = array<i32>} : memref<144x512xbf16, #tpu.memory_space<vmem>>, vector<16x512xbf16>,
    %c0_126 = arith.constant 0 : index
    %c0_127 = arith.constant 0 : index
    %143 = vector.load %arg6[%c0_126, %c0_127] : memref<16x144xbf16, #tpu.memory_space<vmem>>, vector<16x144xbf16>
    %c0_128 = arith.constant 0 : index
    %c0_129 = arith.constant 0 : index
    %144 = vector.load %arg17[%c0_128, %c0_129] : memref<144x512xbf16, #tpu.memory_space<vmem>>, vector<144x512xbf16>
    %cst_130 = arith.constant dense<0.000000e+00> : vector<16x512xf32>
    %145 = tpu.matmul %143, %144, %cst_130 {dimension_numbers = #tpu.dot_dimension_numbers<[1], [0], [0], [1], [0, 0, 1, 1], [], []>} : vector<16x144xbf16>, vector<144x512xbf16>, vector<16x512xf32> -> vector<16x512xf32>
    %c0_131 = arith.constant 0 : index
    %c0_132 = arith.constant 0 : index
    %146 = vector.load %arg7[%c0_131, %c0_132] : memref<16x1xf32, #tpu.memory_space<vmem>>, vector<16x1xf32>
    %147 = vector.broadcast %146 : vector<16x1xf32> to vector<16x512xf32>
    %148 = arith.addf %145, %147 : vector<16x512xf32>
    %cst_133 = arith.constant 0.000000e+00 : f32
    %149 = vector.broadcast %cst_133 : f32 to vector<16x512xf32>
    %150 = arith.maximumf %148, %149 : vector<16x512xf32>
    %c17_i32_134 = arith.constant 17 : i32
    %151 = tpu.dynamic_rotate %150 by %c17_i32_134 dim 1 : vector<16x512xf32>, i32 -> vector<16x512xf32>
    %c0_135 = arith.constant 0 : index
    %c0_136 = arith.constant 0 : index
    %152 = vector.load %arg1[%c0_135, %c0_136] : memref<144x512xf32, #tpu.memory_space<vmem>>, vector<16x512xf32>
    %153 = arith.mulf %151, %152 : vector<16x512xf32>
    %154 = arith.truncf %153 : vector<16x512xf32> to vector<16x512xbf16>
    %c0_137 = arith.constant 0 : index
    %c0_138 = arith.constant 0 : index
    %155 = vector.load %arg17[%c0_137, %c0_138] : memref<144x512xbf16, #tpu.memory_space<vmem>>, vector<16x512xbf16>
    tpu.vector_store %arg17[%c0_137, %c0_138], %154 {strides = array<i32>} : memref<144x512xbf16, #tpu.memory_space<vmem>>, vector<16x512xbf16>,
    %c16_i32_139 = arith.constant 16 : i32
    %156 = tpu.dynamic_rotate %150 by %c16_i32_139 dim 1 : vector<16x512xf32>, i32 -> vector<16x512xf32>
    %c16_140 = arith.constant 16 : index
    %c0_141 = arith.constant 0 : index
    %157 = vector.load %arg1[%c16_140, %c0_141] : memref<144x512xf32, #tpu.memory_space<vmem>>, vector<16x512xf32>
    %158 = arith.mulf %156, %157 : vector<16x512xf32>
    %159 = arith.truncf %158 : vector<16x512xf32> to vector<16x512xbf16>
    %c16_142 = arith.constant 16 : index
    %c0_143 = arith.constant 0 : index
    %160 = vector.load %arg17[%c16_142, %c0_143] : memref<144x512xbf16, #tpu.memory_space<vmem>>, vector<16x512xbf16>
    tpu.vector_store %arg17[%c16_142, %c0_143], %159 {strides = array<i32>} : memref<144x512xbf16, #tpu.memory_space<vmem>>, vector<16x512xbf16>,
    %c15_i32_144 = arith.constant 15 : i32
    %161 = tpu.dynamic_rotate %150 by %c15_i32_144 dim 1 : vector<16x512xf32>, i32 -> vector<16x512xf32>
    %c32_145 = arith.constant 32 : index
    %c0_146 = arith.constant 0 : index
    %162 = vector.load %arg1[%c32_145, %c0_146] : memref<144x512xf32, #tpu.memory_space<vmem>>, vector<16x512xf32>
    %163 = arith.mulf %161, %162 : vector<16x512xf32>
    %164 = arith.truncf %163 : vector<16x512xf32> to vector<16x512xbf16>
    %c32_147 = arith.constant 32 : index
    %c0_148 = arith.constant 0 : index
    %165 = vector.load %arg17[%c32_147, %c0_148] : memref<144x512xbf16, #tpu.memory_space<vmem>>, vector<16x512xbf16>
    tpu.vector_store %arg17[%c32_147, %c0_148], %164 {strides = array<i32>} : memref<144x512xbf16, #tpu.memory_space<vmem>>, vector<16x512xbf16>,
    %c1_i32_149 = arith.constant 1 : i32
    %166 = tpu.dynamic_rotate %150 by %c1_i32_149 dim 1 : vector<16x512xf32>, i32 -> vector<16x512xf32>
    %c48_150 = arith.constant 48 : index
    %c0_151 = arith.constant 0 : index
    %167 = vector.load %arg1[%c48_150, %c0_151] : memref<144x512xf32, #tpu.memory_space<vmem>>, vector<16x512xf32>
    %168 = arith.mulf %166, %167 : vector<16x512xf32>
    %169 = arith.truncf %168 : vector<16x512xf32> to vector<16x512xbf16>
    %c48_152 = arith.constant 48 : index
    %c0_153 = arith.constant 0 : index
    %170 = vector.load %arg17[%c48_152, %c0_153] : memref<144x512xbf16, #tpu.memory_space<vmem>>, vector<16x512xbf16>
    tpu.vector_store %arg17[%c48_152, %c0_153], %169 {strides = array<i32>} : memref<144x512xbf16, #tpu.memory_space<vmem>>, vector<16x512xbf16>,
    %171 = arith.truncf %150 : vector<16x512xf32> to vector<16x512xbf16>
    %c64_154 = arith.constant 64 : index
    %c0_155 = arith.constant 0 : index
    %172 = vector.load %arg17[%c64_154, %c0_155] : memref<144x512xbf16, #tpu.memory_space<vmem>>, vector<16x512xbf16>
    tpu.vector_store %arg17[%c64_154, %c0_155], %171 {strides = array<i32>} : memref<144x512xbf16, #tpu.memory_space<vmem>>, vector<16x512xbf16>,
    %c511_i32_156 = arith.constant 511 : i32
    %173 = tpu.dynamic_rotate %150 by %c511_i32_156 dim 1 : vector<16x512xf32>, i32 -> vector<16x512xf32>
    %c80_157 = arith.constant 80 : index
    %c0_158 = arith.constant 0 : index
    %174 = vector.load %arg1[%c80_157, %c0_158] : memref<144x512xf32, #tpu.memory_space<vmem>>, vector<16x512xf32>
    %175 = arith.mulf %173, %174 : vector<16x512xf32>
    %176 = arith.truncf %175 : vector<16x512xf32> to vector<16x512xbf16>
    %c80_159 = arith.constant 80 : index
    %c0_160 = arith.constant 0 : index
    %177 = vector.load %arg17[%c80_159, %c0_160] : memref<144x512xbf16, #tpu.memory_space<vmem>>, vector<16x512xbf16>
    tpu.vector_store %arg17[%c80_159, %c0_160], %176 {strides = array<i32>} : memref<144x512xbf16, #tpu.memory_space<vmem>>, vector<16x512xbf16>,
    %c497_i32_161 = arith.constant 497 : i32
    %178 = tpu.dynamic_rotate %150 by %c497_i32_161 dim 1 : vector<16x512xf32>, i32 -> vector<16x512xf32>
    %c96_162 = arith.constant 96 : index
    %c0_163 = arith.constant 0 : index
    %179 = vector.load %arg1[%c96_162, %c0_163] : memref<144x512xf32, #tpu.memory_space<vmem>>, vector<16x512xf32>
    %180 = arith.mulf %178, %179 : vector<16x512xf32>
    %181 = arith.truncf %180 : vector<16x512xf32> to vector<16x512xbf16>
    %c96_164 = arith.constant 96 : index
    %c0_165 = arith.constant 0 : index
    %182 = vector.load %arg17[%c96_164, %c0_165] : memref<144x512xbf16, #tpu.memory_space<vmem>>, vector<16x512xbf16>
    tpu.vector_store %arg17[%c96_164, %c0_165], %181 {strides = array<i32>} : memref<144x512xbf16, #tpu.memory_space<vmem>>, vector<16x512xbf16>,
    %c496_i32_166 = arith.constant 496 : i32
    %183 = tpu.dynamic_rotate %150 by %c496_i32_166 dim 1 : vector<16x512xf32>, i32 -> vector<16x512xf32>
    %c112_167 = arith.constant 112 : index
    %c0_168 = arith.constant 0 : index
    %184 = vector.load %arg1[%c112_167, %c0_168] : memref<144x512xf32, #tpu.memory_space<vmem>>, vector<16x512xf32>
    %185 = arith.mulf %183, %184 : vector<16x512xf32>
    %186 = arith.truncf %185 : vector<16x512xf32> to vector<16x512xbf16>
    %c112_169 = arith.constant 112 : index
    %c0_170 = arith.constant 0 : index
    %187 = vector.load %arg17[%c112_169, %c0_170] : memref<144x512xbf16, #tpu.memory_space<vmem>>, vector<16x512xbf16>
    tpu.vector_store %arg17[%c112_169, %c0_170], %186 {strides = array<i32>} : memref<144x512xbf16, #tpu.memory_space<vmem>>, vector<16x512xbf16>,
    %c495_i32_171 = arith.constant 495 : i32
    %188 = tpu.dynamic_rotate %150 by %c495_i32_171 dim 1 : vector<16x512xf32>, i32 -> vector<16x512xf32>
    %c128_172 = arith.constant 128 : index
    %c0_173 = arith.constant 0 : index
    %189 = vector.load %arg1[%c128_172, %c0_173] : memref<144x512xf32, #tpu.memory_space<vmem>>, vector<16x512xf32>
    %190 = arith.mulf %188, %189 : vector<16x512xf32>
    %191 = arith.truncf %190 : vector<16x512xf32> to vector<16x512xbf16>
    %c128_174 = arith.constant 128 : index
    %c0_175 = arith.constant 0 : index
    %192 = vector.load %arg17[%c128_174, %c0_175] : memref<144x512xbf16, #tpu.memory_space<vmem>>, vector<16x512xbf16>
    tpu.vector_store %arg17[%c128_174, %c0_175], %191 {strides = array<i32>} : memref<144x512xbf16, #tpu.memory_space<vmem>>, vector<16x512xbf16>,
    %c0_176 = arith.constant 0 : index
    %c0_177 = arith.constant 0 : index
    %193 = vector.load %arg8[%c0_176, %c0_177] : memref<4x144xbf16, #tpu.memory_space<vmem>>, vector<4x144xbf16>
    %c0_178 = arith.constant 0 : index
    %c0_179 = arith.constant 0 : index
    %194 = vector.load %arg17[%c0_178, %c0_179] : memref<144x512xbf16, #tpu.memory_space<vmem>>, vector<144x512xbf16>
    %cst_180 = arith.constant dense<0.000000e+00> : vector<4x512xf32>
    %195 = tpu.matmul %193, %194, %cst_180 {dimension_numbers = #tpu.dot_dimension_numbers<[1], [0], [0], [1], [0, 0, 1, 1], [], []>} : vector<4x144xbf16>, vector<144x512xbf16>, vector<4x512xf32> -> vector<4x512xf32>
    %c0_181 = arith.constant 0 : index
    %c0_182 = arith.constant 0 : index
    %196 = vector.load %arg9[%c0_181, %c0_182] : memref<4x1xf32, #tpu.memory_space<vmem>>, vector<4x1xf32>
    %197 = vector.broadcast %196 : vector<4x1xf32> to vector<4x512xf32>
    %198 = arith.addf %195, %197 : vector<4x512xf32>
    %cst_183 = arith.constant 0.000000e+00 : f32
    %199 = vector.broadcast %cst_183 : f32 to vector<4x512xf32>
    %200 = arith.maximumf %198, %199 : vector<4x512xf32>
    %201 = vector.extract_strided_slice %50 {offsets = [0, 0], sizes = [4, 512], strides = [1, 1]} : vector<16x512xf32> to vector<4x512xf32>
    %202 = vector.extract_strided_slice %100 {offsets = [0, 0], sizes = [4, 512], strides = [1, 1]} : vector<16x512xf32> to vector<4x512xf32>
    %203 = vector.extract_strided_slice %150 {offsets = [0, 0], sizes = [4, 512], strides = [1, 1]} : vector<16x512xf32> to vector<4x512xf32>
    %204 = tpu.concatenate %201, %202, %203, %200 in 0 : vector<4x512xf32>, vector<4x512xf32>, vector<4x512xf32>, vector<4x512xf32> -> vector<16x512xf32>
    %205 = vector.extract_strided_slice %204 {offsets = [0, 0], sizes = [16, 256], strides = [1, 1]} : vector<16x512xf32> to vector<16x256xf32>
    %cst_184 = arith.constant dense<0.000000e+00> : vector<16xf32>
    %206 = vector.multi_reduction <add>, %205, %cst_184 [1] : vector<16x256xf32> to vector<16xf32>
    %207 = vector.shape_cast %206 : vector<16xf32> to vector<16x1xf32>
    %cst_185 = arith.constant 3.906250e-03 : f32
    %208 = vector.broadcast %cst_185 : f32 to vector<16x1xf32>
    %209 = arith.mulf %207, %208 : vector<16x1xf32>
    %210 = vector.broadcast %209 : vector<16x1xf32> to vector<16x256xf32>
    %211 = arith.subf %205, %210 : vector<16x256xf32>
    %212 = arith.mulf %211, %211 : vector<16x256xf32>
    %cst_186 = arith.constant dense<0.000000e+00> : vector<16xf32>
    %213 = vector.multi_reduction <add>, %212, %cst_186 [1] : vector<16x256xf32> to vector<16xf32>
    %214 = vector.shape_cast %213 : vector<16xf32> to vector<16x1xf32>
    %cst_187 = arith.constant 3.906250e-03 : f32
    %215 = vector.broadcast %cst_187 : f32 to vector<16x1xf32>
    %216 = arith.mulf %214, %215 : vector<16x1xf32>
    %217 = math.sqrt %216 : vector<16x1xf32>
    %218 = arith.addf %217, %209 : vector<16x1xf32>
    %c0_188 = arith.constant 0 : index
    %c0_189 = arith.constant 0 : index
    %219 = vector.load %arg12[%c0_188, %c0_189] : memref<1x16xf32, #tpu.memory_space<vmem>>, vector<1x16xf32>
    %cst_190 = arith.constant dense<0.000000e+00> : vector<1x1xf32>
    %220 = tpu.matmul %219, %218, %cst_190 {dimension_numbers = #tpu.dot_dimension_numbers<[1], [0], [0], [1], [0, 0, 1, 1], [], []>} : vector<1x16xf32>, vector<16x1xf32>, vector<1x1xf32> -> vector<1x1xf32>
    %c0_191 = arith.constant 0 : index
    %c0_192 = arith.constant 0 : index
    %221 = vector.load %arg13[%c0_191, %c0_192] : memref<1x1xf32, #tpu.memory_space<vmem>>, vector<1x1xf32>
    %222 = arith.addf %220, %221 : vector<1x1xf32>
    %cst_193 = arith.constant 0.000000e+00 : f32
    %223 = vector.broadcast %cst_193 : f32 to vector<1x1xf32>
    %224 = arith.maximumf %222, %223 : vector<1x1xf32>
    %c0_194 = arith.constant 0 : index
    %c0_195 = arith.constant 0 : index
    %225 = vector.load %arg14[%c0_194, %c0_195] : memref<16x1xf32, #tpu.memory_space<vmem>>, vector<16x1xf32>
    %cst_196 = arith.constant dense<0.000000e+00> : vector<16x1xf32>
    %226 = tpu.matmul %225, %224, %cst_196 {dimension_numbers = #tpu.dot_dimension_numbers<[1], [0], [0], [1], [0, 0, 1, 1], [], []>} : vector<16x1xf32>, vector<1x1xf32>, vector<16x1xf32> -> vector<16x1xf32>
    %c0_197 = arith.constant 0 : index
    %c0_198 = arith.constant 0 : index
    %227 = vector.load %arg15[%c0_197, %c0_198] : memref<16x1xf32, #tpu.memory_space<vmem>>, vector<16x1xf32>
    %228 = arith.addf %226, %227 : vector<16x1xf32>
    %229 = arith.negf %228 : vector<16x1xf32>
    %230 = math.exp %229 : vector<16x1xf32>
    %cst_199 = arith.constant 1.000000e+00 : f32
    %231 = vector.broadcast %cst_199 : f32 to vector<16x1xf32>
    %232 = arith.addf %231, %230 : vector<16x1xf32>
    %233 = arith.divf %231, %232 : vector<16x1xf32>
    %234 = vector.broadcast %233 : vector<16x1xf32> to vector<16x256xf32>
    %235 = arith.mulf %205, %234 : vector<16x256xf32>
    %236 = arith.truncf %235 : vector<16x256xf32> to vector<16x256xbf16>
    %c0_200 = arith.constant 0 : index
    %c0_201 = arith.constant 0 : index
    %237 = vector.load %arg10[%c0_200, %c0_201] : memref<16x16xbf16, #tpu.memory_space<vmem>>, vector<16x16xbf16>
    %cst_202 = arith.constant dense<0.000000e+00> : vector<16x256xf32>
    %238 = tpu.matmul %237, %236, %cst_202 {dimension_numbers = #tpu.dot_dimension_numbers<[1], [0], [0], [1], [0, 0, 1, 1], [], []>} : vector<16x16xbf16>, vector<16x256xbf16>, vector<16x256xf32> -> vector<16x256xf32>
    %c0_203 = arith.constant 0 : index
    %c0_204 = arith.constant 0 : index
    %239 = vector.load %arg11[%c0_203, %c0_204] : memref<16x1xf32, #tpu.memory_space<vmem>>, vector<16x1xf32>
    %240 = vector.broadcast %239 : vector<16x1xf32> to vector<16x256xf32>
    %241 = arith.addf %238, %240 : vector<16x256xf32>
    %c0_205 = arith.constant 0 : index
    %c0_206 = arith.constant 0 : index
    %242 = vector.load %arg0[%c0_205, %c0_206] : memref<16x512xf32, #tpu.memory_space<vmem>>, vector<16x256xf32>
    %243 = arith.addf %241, %242 : vector<16x256xf32>
    %c0_207 = arith.constant 0 : index
    %c0_208 = arith.constant 0 : index
    %244 = vector.load %arg16[%c0_207, %c0_208] : memref<16x512xf32, #tpu.memory_space<vmem>>, vector<16x256xf32>
    tpu.vector_store %arg16[%c0_207, %c0_208], %243 {strides = array<i32>} : memref<16x512xf32, #tpu.memory_space<vmem>>, vector<16x256xf32>,
    %245 = vector.extract_strided_slice %204 {offsets = [0, 256], sizes = [16, 256], strides = [1, 1]} : vector<16x512xf32> to vector<16x256xf32>
    %cst_209 = arith.constant dense<0.000000e+00> : vector<16xf32>
    %246 = vector.multi_reduction <add>, %245, %cst_209 [1] : vector<16x256xf32> to vector<16xf32>
    %247 = vector.shape_cast %246 : vector<16xf32> to vector<16x1xf32>
    %cst_210 = arith.constant 3.906250e-03 : f32
    %248 = vector.broadcast %cst_210 : f32 to vector<16x1xf32>
    %249 = arith.mulf %247, %248 : vector<16x1xf32>
    %250 = vector.broadcast %249 : vector<16x1xf32> to vector<16x256xf32>
    %251 = arith.subf %245, %250 : vector<16x256xf32>
    %252 = arith.mulf %251, %251 : vector<16x256xf32>
    %cst_211 = arith.constant dense<0.000000e+00> : vector<16xf32>
    %253 = vector.multi_reduction <add>, %252, %cst_211 [1] : vector<16x256xf32> to vector<16xf32>
    %254 = vector.shape_cast %253 : vector<16xf32> to vector<16x1xf32>
    %cst_212 = arith.constant 3.906250e-03 : f32
    %255 = vector.broadcast %cst_212 : f32 to vector<16x1xf32>
    %256 = arith.mulf %254, %255 : vector<16x1xf32>
    %257 = math.sqrt %256 : vector<16x1xf32>
    %258 = arith.addf %257, %249 : vector<16x1xf32>
    %c0_213 = arith.constant 0 : index
    %c0_214 = arith.constant 0 : index
    %259 = vector.load %arg12[%c0_213, %c0_214] : memref<1x16xf32, #tpu.memory_space<vmem>>, vector<1x16xf32>
    %cst_215 = arith.constant dense<0.000000e+00> : vector<1x1xf32>
    %260 = tpu.matmul %259, %258, %cst_215 {dimension_numbers = #tpu.dot_dimension_numbers<[1], [0], [0], [1], [0, 0, 1, 1], [], []>} : vector<1x16xf32>, vector<16x1xf32>, vector<1x1xf32> -> vector<1x1xf32>
    %c0_216 = arith.constant 0 : index
    %c0_217 = arith.constant 0 : index
    %261 = vector.load %arg13[%c0_216, %c0_217] : memref<1x1xf32, #tpu.memory_space<vmem>>, vector<1x1xf32>
    %262 = arith.addf %260, %261 : vector<1x1xf32>
    %cst_218 = arith.constant 0.000000e+00 : f32
    %263 = vector.broadcast %cst_218 : f32 to vector<1x1xf32>
    %264 = arith.maximumf %262, %263 : vector<1x1xf32>
    %c0_219 = arith.constant 0 : index
    %c0_220 = arith.constant 0 : index
    %265 = vector.load %arg14[%c0_219, %c0_220] : memref<16x1xf32, #tpu.memory_space<vmem>>, vector<16x1xf32>
    %cst_221 = arith.constant dense<0.000000e+00> : vector<16x1xf32>
    %266 = tpu.matmul %265, %264, %cst_221 {dimension_numbers = #tpu.dot_dimension_numbers<[1], [0], [0], [1], [0, 0, 1, 1], [], []>} : vector<16x1xf32>, vector<1x1xf32>, vector<16x1xf32> -> vector<16x1xf32>
    %c0_222 = arith.constant 0 : index
    %c0_223 = arith.constant 0 : index
    %267 = vector.load %arg15[%c0_222, %c0_223] : memref<16x1xf32, #tpu.memory_space<vmem>>, vector<16x1xf32>
    %268 = arith.addf %266, %267 : vector<16x1xf32>
    %269 = arith.negf %268 : vector<16x1xf32>
    %270 = math.exp %269 : vector<16x1xf32>
    %cst_224 = arith.constant 1.000000e+00 : f32
    %271 = vector.broadcast %cst_224 : f32 to vector<16x1xf32>
    %272 = arith.addf %271, %270 : vector<16x1xf32>
    %273 = arith.divf %271, %272 : vector<16x1xf32>
    %274 = vector.broadcast %273 : vector<16x1xf32> to vector<16x256xf32>
    %275 = arith.mulf %245, %274 : vector<16x256xf32>
    %276 = arith.truncf %275 : vector<16x256xf32> to vector<16x256xbf16>
    %c0_225 = arith.constant 0 : index
    %c0_226 = arith.constant 0 : index
    %277 = vector.load %arg10[%c0_225, %c0_226] : memref<16x16xbf16, #tpu.memory_space<vmem>>, vector<16x16xbf16>
    %cst_227 = arith.constant dense<0.000000e+00> : vector<16x256xf32>
    %278 = tpu.matmul %277, %276, %cst_227 {dimension_numbers = #tpu.dot_dimension_numbers<[1], [0], [0], [1], [0, 0, 1, 1], [], []>} : vector<16x16xbf16>, vector<16x256xbf16>, vector<16x256xf32> -> vector<16x256xf32>
    %c0_228 = arith.constant 0 : index
    %c0_229 = arith.constant 0 : index
    %279 = vector.load %arg11[%c0_228, %c0_229] : memref<16x1xf32, #tpu.memory_space<vmem>>, vector<16x1xf32>
    %280 = vector.broadcast %279 : vector<16x1xf32> to vector<16x256xf32>
    %281 = arith.addf %278, %280 : vector<16x256xf32>
    %c0_230 = arith.constant 0 : index
    %c256 = arith.constant 256 : index
    %282 = vector.load %arg0[%c0_230, %c256] : memref<16x512xf32, #tpu.memory_space<vmem>>, vector<16x256xf32>
    %283 = arith.addf %281, %282 : vector<16x256xf32>
    %c0_231 = arith.constant 0 : index
    %c256_232 = arith.constant 256 : index
    %284 = vector.load %arg16[%c0_231, %c256_232] : memref<16x512xf32, #tpu.memory_space<vmem>>, vector<16x256xf32>
    tpu.vector_store %arg16[%c0_231, %c256_232], %283 {strides = array<i32>} : memref<16x512xf32, #tpu.memory_space<vmem>>, vector<16x256xf32>,
    return
  }
}

</mosaic_0001>

<bundles_post_ra>
// kernel: _lambda_.1
= control target key start
LH: loop header
LB: loop body
LE: loop exit
PB: predicated region body
PF: predicated region fallthrough
CT: control target
= control target key end

     0   :  { %s3032_s26 = smov 17   ;;  %s3033_s25 = smov 16   ;;  %v80_v8 = vlaneseq  ;;  %vm525_vm1 = vcmask 130048   ;;  %v5794_v21 = vmov 0   ;;  %vm2277_vm9 = vcmask 1043456   ;;  %s5770_s0 = inlined_call_operand.vmem [shape: f32[16,512], index: 0, kind: input, shape index: {}, may-alias: {0,16}]   ;;  %s5771_s2 = inlined_call_operand.vmem [shape: bf16[16,144], index: 2, kind: input, shape index: {}]   ;;  %s5772_s1 = inlined_call_operand.vmem [shape: f32[144,512], index: 1, kind: input, shape index: {}]   ;;  %s5773_s3 = inlined_call_operand.vmem [shape: f32[16,1], index: 3, kind: input, shape index: {}]   ;;  %s5774_s4 = inlined_call_operand.vmem [shape: bf16[16,144], index: 4, kind: input, shape index: {}]   ;;  %s5775_s5 = inlined_call_operand.vmem [shape: f32[16,1], index: 5, kind: input, shape index: {}]   ;;  %s5776_s6 = inlined_call_operand.vmem [shape: bf16[16,144], index: 6, kind: input, shape index: {}]   ;;  %s5777_s7 = inlined_call_operand.vmem [shape: f32[16,1], index: 7, kind: input, shape index: {}]   ;;  %s5778_s8 = inlined_call_operand.vmem [shape: bf16[4,144], index: 8, kind: input, shape index: {}]   ;;  %s5779_s9 = inlined_call_operand.vmem [shape: f32[4,1], index: 9, kind: input, shape index: {}]   ;;  %s5780_s12 = inlined_call_operand.vmem [shape: f32[1,16], index: 12, kind: input, shape index: {}]   ;;  %s5781_s13 = inlined_call_operand.<no memory space> [shape: f32[1,1], index: 13, kind: input, shape index: {}]   ;;  %s5782_s14 = inlined_call_operand.vmem [shape: f32[16,1], index: 14, kind: input, shape index: {}]   ;;  %s5783_s15 = inlined_call_operand.vmem [shape: f32[16,1], index: 15, kind: input, shape index: {}]   ;;  %s5784_s11 = inlined_call_operand.vmem [shape: f32[16,1], index: 11, kind: input, shape index: {}]   ;;  %s5785_s10 = inlined_call_operand.vmem [shape: bf16[16,16], index: 10, kind: input, shape index: {}]   ;;  %s5786_s16 = inlined_call_operand.vmem [shape: f32[16,512], index: 16, kind: output, shape index: {}, may-alias: {0,16}]  }
   0x1   :  { %5895 = sst [smem:[#allocation59_spill]] %s5770_s0  ;;  %s3034_s27 = smov 15   ;;  %v2999_v12 = vld [vmem:[%s5771_s2 + $0x4] ss:$8 sps:$4 sm:$0xff]   ;;  %2995 = vset.pattern.permute.xlu0 %v5794_v21  ;;  %2996 = vset.pattern.permute.xlu1 %v5794_v21  ;;  %v3326_v27 = vld [vmem:[%s5772_s1 + $0x10] sm:$0xff]  ;;  %v3350_v31 = vld [vmem:[%s5772_s1 + $0x18] sm:$0xff] }
   0x2   :  { %s5896_s23 = sld [smem:[#allocation59_spill]]  ;;  %s3035_s28 = smov 1   ;;  %v3281_v9 = vand.u32 127, %v80_v8  ;;  %v3300_v14 = vld [vmem:[%s5772_s1 + $0x8] sm:$0xff]  ;;  %2912 = vmatprep.mubr.msk.bf16.mxu0 %vm525_vm1, %v2999_v12  ;;  %2913 = vmatprep.mubr.msk.bf16.mxu1 %vm525_vm1, %v2999_v12  ;;  %v3331_v28 = vld [vmem:[%s5772_s1 + $0x30] sm:$0xff]  ;;  %v3340_v29 = vld [vmem:[%s5772_s1] sm:$0xff] }
   0x3   :  { %s3036_s29 = smov 127   ;;  %s5790_s30 = smov 113   ;;  %v3305_v15 = vld [vmem:[%s5772_s1 + $0x28] sm:$0xff]  ;;  %v3345_v30 = vld [vmem:[%s5772_s1 + $0x20] sm:$0xff]  ;;  %v3355_v32 = vld [vmem:[%s5772_s1 + $0x38] sm:$0xff]  ;;  %vm3042_vm10 = vmmov 0  }
   0x4   :  { %s5788_s0 = smov 112   ;;  %s5792_s17 = smov 111   ;;  %vm82_vm0 = vcmp.lt.s32.totalorder %v3281_v9, 17  ;;  %v504_v33 = vld [vmem:[%s5773_s3] sm:$0xff]  ;;  %v505_v38 = vld [vmem:[%s5773_s3 + $0x8] sm:$0xff]  ;;  %vm131_vm2 = vcmp.lt.s32.totalorder %v3281_v9, 16 }
   0x5   :  { %v3381_v52 = vld [vmem:[%s5772_s1 + $0x68] sm:$0xff]  ;;  %v3397_v63 = vld [vmem:[%s5772_s1 + $0x70] sm:$0xff]  ;;  %v3411_v12 = vld [vmem:[%s5772_s1 + $0x60] sm:$0xff]  ;;  %vm180_vm3 = vcmp.lt.s32.totalorder %v3281_v9, 15  ;;  %vm229_vm4 = vcmp.lt.s32.totalorder %v3281_v9, 1  ;;  %vm286_vm5 = vcmp.lt.s32.totalorder %v3281_v9, 127 }
   0x6   :  { %v3386_v53 = vld [vmem:[%s5772_s1 + $0x48] sm:$0xff]  ;;  %vm335_vm6 = vcmp.lt.s32.totalorder %v3281_v9, 113  ;;  %vm384_vm7 = vcmp.lt.s32.totalorder %v3281_v9, 112  ;;  %vm433_vm8 = vcmp.lt.s32.totalorder %v3281_v9, 111  ;;  %s5934_s19 = smov 112   ;;  %s5935_s20 = smov 111  }
   0x7   :  { %vm2406_vm15 = vcmask 7168  }
   0x8   :  { %v3132_v0 = vld [vmem:[%s5896_s23 + $0x8] sm:$0xff]  ;;  %v3137_v1 = vld [vmem:[%s5896_s23] sm:$0xff]  ;;  %v3160_v4 = vld [vmem:[%s5896_s23 + $0x30] sm:$0xff] }
   0x9   :  { %68 = vrot.lane.b32.xlu1 %v3132_v0, %s3032_s26  ;;  %64 = vrot.lane.b32.xlu0 %v3137_v1, %s3032_s26  ;;  %v3146_v2 = vld [vmem:[%s5896_s23 + $0x28] sm:$0xff]  ;;  %v3151_v3 = vld [vmem:[%s5896_s23 + $0x20] sm:$0xff] }
   0xa   :  { %v3165_v5 = vld [vmem:[%s5896_s23 + $0x10] sm:$0xff]  ;;  %v3174_v6 = vld [vmem:[%s5896_s23 + $0x38] sm:$0xff] }
   0xb   :  { %v3179_v7 = vld [vmem:[%s5896_s23 + $0x18] sm:$0xff] }
   0xd   :  { %70 = vrot.lane.b32.xlu1 %v3146_v2, %s3032_s26  ;;  %66 = vrot.lane.b32.xlu0 %v3151_v3, %s3032_s26 }
  0x11   :  { %74 = vrot.lane.b32.xlu1 %v3160_v4, %s3032_s26  ;;  %72 = vrot.lane.b32.xlu0 %v3165_v5, %s3032_s26 }
  0x15   :  { %78 = vrot.lane.b32.xlu1 %v3174_v6, %s3032_s26  ;;  %76 = vrot.lane.b32.xlu0 %v3179_v7, %s3032_s26 }
  0x19   :  { %117 = vrot.lane.b32.xlu1 %v3151_v3, %s3033_s25  ;;  %115 = vrot.lane.b32.xlu0 %v3137_v1, %s3033_s25 }
  0x1d   :  { %121 = vrot.lane.b32.xlu1 %v3146_v2, %s3033_s25  ;;  %119 = vrot.lane.b32.xlu0 %v3132_v0, %s3033_s25 }
  0x21   :  { %125 = vrot.lane.b32.xlu1 %v3160_v4, %s3033_s25  ;;  %123 = vrot.lane.b32.xlu0 %v3165_v5, %s3033_s25 }
  0x25   :  { %129 = vrot.lane.b32.xlu1 %v3174_v6, %s3033_s25  ;;  %127 = vrot.lane.b32.xlu0 %v3179_v7, %s3033_s25 }
  0x29   :  { %166 = vrot.lane.b32.xlu1 %v3151_v3, %s3034_s27  ;;  %164 = vrot.lane.b32.xlu0 %v3137_v1, %s3034_s27 }
  0x2d   :  { %170 = vrot.lane.b32.xlu1 %v3146_v2, %s3034_s27  ;;  %168 = vrot.lane.b32.xlu0 %v3132_v0, %s3034_s27 }
  0x31   :  { %174 = vrot.lane.b32.xlu1 %v3160_v4, %s3034_s27  ;;  %172 = vrot.lane.b32.xlu0 %v3165_v5, %s3034_s27 }
  0x35   :  { %178 = vrot.lane.b32.xlu1 %v3174_v6, %s3034_s27  ;;  %176 = vrot.lane.b32.xlu0 %v3179_v7, %s3034_s27 }
  0x39   :  { %215 = vrot.lane.b32.xlu1 %v3151_v3, %s3035_s28  ;;  %213 = vrot.lane.b32.xlu0 %v3137_v1, %s3035_s28 }
  0x3d   :  { %219 = vrot.lane.b32.xlu1 %v3146_v2, %s3035_s28  ;;  %217 = vrot.lane.b32.xlu0 %v3132_v0, %s3035_s28 }
  0x41   :  { %223 = vrot.lane.b32.xlu1 %v3160_v4, %s3035_s28  ;;  %221 = vrot.lane.b32.xlu0 %v3165_v5, %s3035_s28 }
  0x45   :  { %227 = vrot.lane.b32.xlu1 %v3174_v6, %s3035_s28  ;;  %225 = vrot.lane.b32.xlu0 %v3179_v7, %s3035_s28 }
  0x49   :  { %276 = vrot.lane.b32.xlu1 %v3146_v2, %s3036_s29  ;;  %274 = vrot.lane.b32.xlu0 %v3132_v0, %s3036_s29 }
  0x4d   :  { %280 = vrot.lane.b32.xlu1 %v3160_v4, %s3036_s29  ;;  %278 = vrot.lane.b32.xlu0 %v3165_v5, %s3036_s29 }
  0x51   :  { %272 = vrot.lane.b32.xlu1 %v3151_v3, %s3036_s29  ;;  %270 = vrot.lane.b32.xlu0 %v3137_v1, %s3036_s29 }
  0x55   :  { %284 = vrot.lane.b32.xlu1 %v3174_v6, %s3036_s29  ;;  %282 = vrot.lane.b32.xlu0 %v3179_v7, %s3036_s29 }
  0x59   :  { %325 = vrot.lane.b32.xlu1 %v3146_v2, %s5790_s30  ;;  %323 = vrot.lane.b32.xlu0 %v3132_v0, %s5790_s30 }
  0x5d   :  { %329 = vrot.lane.b32.xlu1 %v3160_v4, %s5790_s30  ;;  %327 = vrot.lane.b32.xlu0 %v3165_v5, %s5790_s30 }
  0x61   :  { %321 = vrot.lane.b32.xlu1 %v3151_v3, %s5790_s30  ;;  %319 = vrot.lane.b32.xlu0 %v3137_v1, %s5790_s30 }
  0x65   :  { %333 = vrot.lane.b32.xlu1 %v3174_v6, %s5790_s30  ;;  %331 = vrot.lane.b32.xlu0 %v3179_v7, %s5790_s30 }
  0x69   :  { %374 = vrot.lane.b32.xlu1 %v3146_v2, %s5788_s0  ;;  %372 = vrot.lane.b32.xlu0 %v3132_v0, %s5788_s0 }
  0x6d   :  { %378 = vrot.lane.b32.xlu1 %v3160_v4, %s5788_s0  ;;  %376 = vrot.lane.b32.xlu0 %v3165_v5, %s5788_s0 }
  0x71   :  { %370 = vrot.lane.b32.xlu1 %v3151_v3, %s5788_s0  ;;  %368 = vrot.lane.b32.xlu0 %v3137_v1, %s5788_s0 }
  0x75   :  { %382 = vrot.lane.b32.xlu1 %v3174_v6, %s5788_s0  ;;  %380 = vrot.lane.b32.xlu0 %v3179_v7, %s5788_s0 }
  0x79   :  { %423 = vrot.lane.b32.xlu1 %v3146_v2, %s5792_s17  ;;  %421 = vrot.lane.b32.xlu0 %v3132_v0, %s5792_s17 }
  0x7b   :  { %v69_v10 = vpop.permute.xlu1 %68  ;;  %v65_v11 = vpop.permute.xlu0 %64 }
  0x7c   :  { %v87_v13 = vsel %vm82_vm0, %v65_v11, %v69_v10 }
  0x7d   :  { %427 = vrot.lane.b32.xlu1 %v3160_v4, %s5792_s17  ;;  %425 = vrot.lane.b32.xlu0 %v3165_v5, %s5792_s17  ;;  %v100_v19 = vmul.f32 %v3300_v14, %v87_v13  ;;  %v3416_v13 = vld [vmem:[%s5772_s1 + $0x78] sm:$0xff] }
  0x7f   :  { %v71_v16 = vpop.permute.xlu1 %70  ;;  %v67_v17 = vpop.permute.xlu0 %66 }
  0x80   :  { %v88_v18 = vsel %vm82_vm0, %v67_v17, %v71_v16 }
  0x81   :  { %419 = vrot.lane.b32.xlu1 %v3151_v3, %s5792_s17  ;;  %417 = vrot.lane.b32.xlu0 %v3137_v1, %s5792_s17  ;;  %v104_v20 = vmul.f32 %v3305_v15, %v88_v18 }
  0x83   :  { %v75_v22 = vpop.permute.xlu1 %74  ;;  %v73_v23 = vpop.permute.xlu0 %72  ;;  %v108_v24 = vpack.c.bf16 %v104_v20, %v100_v19 }
  0x84   :  { %v86_v25 = vsel %vm82_vm0, %v71_v16, %v75_v22  ;;  %v85_v26 = vsel %vm82_vm0, %v69_v10, %v73_v23  ;;  %v3404_v10 = vld [vmem:[%s5772_s1 + $0x50] sm:$0xff]  ;;  %v3421_v16 = vld [vmem:[%s5772_s1 + $0x40] sm:$0xff] }
  0x85   :  { %431 = vrot.lane.b32.xlu1 %v3174_v6, %s5792_s17  ;;  %429 = vrot.lane.b32.xlu0 %v3179_v7, %s5792_s17  ;;  %v101_v36 = vmul.f32 %v3326_v27, %v85_v26  ;;  %v105_v37 = vmul.f32 %v3331_v28, %v86_v25 }
  0x86   :  { %529 = vmatprep.subr.bf16.mxu0 %v108_v24 }
  0x87   :  { %v79_v34 = vpop.permute.xlu1 %78  ;;  %v77_v35 = vpop.permute.xlu0 %76  ;;  %v109_v51 = vpack.c.bf16 %v105_v37, %v101_v36 }
  0x88   :  { %v90_v39 = vsel %vm82_vm0, %v79_v34, %v67_v17  ;;  %v89_v40 = vsel %vm82_vm0, %v77_v35, %v65_v11  ;;  %v83_v41 = vsel %vm82_vm0, %v73_v23, %v77_v35  ;;  %v84_v42 = vsel %vm82_vm0, %v75_v22, %v79_v34  ;;  %v3426_v17 = vld [vmem:[%s5772_s1 + $0x58] sm:$0xff] }
  0x89   :  { %v99_v43 = vmul.f32 %v3340_v29, %v89_v40  ;;  %v103_v44 = vmul.f32 %v3345_v30, %v90_v39  ;;  %v102_v45 = vmul.f32 %v3350_v31, %v83_v41  ;;  %v106_v46 = vmul.f32 %v3355_v32, %v84_v42  ;;  %508 = vperm.xlu0 %2995, %v504_v33   ;;  %v3446_v42 = vld [vmem:[%s5772_s1 + $0xa8] sm:$0xff] }
  0x8a   :  { %513 = vperm.xlu1 %2996, %v505_v38  }
  0x8b   :  { %v118_v47 = vpop.permute.xlu1 %117  ;;  %v116_v48 = vpop.permute.xlu0 %115  ;;  %v107_v49 = vpack.c.bf16 %v103_v44, %v99_v43  ;;  %v110_v50 = vpack.c.bf16 %v106_v46, %v102_v45  ;;  %v3451_v43 = vld [vmem:[%s5772_s1 + $0x88] sm:$0xff] }
  0x8d   :  { %530 = vmatpush1.bf16.msra.mxu0 %v107_v49  ;;  %572 = vmatprep.subr.bf16.mxu1 %v110_v50 }
  0x8e   :  { %573 = vmatpush1.bf16.msra.mxu1 %v109_v51 }
  0x8f   :  { %v122_v54 = vpop.permute.xlu1 %121  ;;  %v120_v55 = vpop.permute.xlu0 %119 }
  0x90   :  { %v137_v56 = vsel %vm131_vm2, %v118_v47, %v122_v54  ;;  %v136_v57 = vsel %vm131_vm2, %v116_v48, %v120_v55 }
  0x91   :  { %v153_v58 = vmul.f32 %v3381_v52, %v137_v56  ;;  %v149_v59 = vmul.f32 %v3386_v53, %v136_v57  ;;  %v3469_v57 = vld [vmem:[%s5772_s1 + $0x90] sm:$0xff] }
  0x93   :  { %v126_v60 = vpop.permute.xlu1 %125  ;;  %v124_v61 = vpop.permute.xlu0 %123  ;;  %v157_v62 = vpack.c.bf16 %v153_v58, %v149_v59  ;;  %v3476_v59 = vld [vmem:[%s5772_s1 + $0xa0] sm:$0xff] }
  0x94   :  { %v135_v8 = vsel %vm131_vm2, %v122_v54, %v126_v60  ;;  %v134_v11 = vsel %vm131_vm2, %v120_v55, %v124_v61  ;;  %v3462_v55 = vld [vmem:[%s5772_s1 + $0xb0] sm:$0xff] }
  0x95   :  { %531 = vmatprep.subr.bf16.mxu0 %v157_v62  ;;  %v154_v18 = vmul.f32 %v3397_v63, %v135_v8  ;;  %v150_v19 = vmul.f32 %v3404_v10, %v134_v11  ;;  %v3491_v62 = vld [vmem:[%s5772_s1 + $0x98] sm:$0xff] }
  0x97   :  { %v130_v20 = vpop.permute.xlu1 %129  ;;  %v128_v22 = vpop.permute.xlu0 %127  ;;  %v158_v41 = vpack.c.bf16 %v154_v18, %v150_v19 }
  0x98   :  { %v133_v23 = vsel %vm131_vm2, %v126_v60, %v130_v20  ;;  %v139_v24 = vsel %vm131_vm2, %v130_v20, %v118_v47  ;;  %v132_v25 = vsel %vm131_vm2, %v124_v61, %v128_v22  ;;  %v138_v26 = vsel %vm131_vm2, %v128_v22, %v116_v48  ;;  %v3481_v60 = vld [vmem:[%s5772_s1 + $0xb8] sm:$0xff]  ;;  %v3486_v61 = vld [vmem:[%s5772_s1 + $0x80] sm:$0xff] }
  0x99   :  { %v152_v33 = vmul.f32 %v3411_v12, %v139_v24  ;;  %v155_v34 = vmul.f32 %v3416_v13, %v133_v23  ;;  %v148_v35 = vmul.f32 %v3421_v16, %v138_v26  ;;  %v151_v36 = vmul.f32 %v3426_v17, %v132_v25 }
  0x9b   :  { %v167_v37 = vpop.permute.xlu1 %166  ;;  %v165_v38 = vpop.permute.xlu0 %164  ;;  %v156_v39 = vpack.c.bf16 %v152_v33, %v148_v35  ;;  %v159_v40 = vpack.c.bf16 %v155_v34, %v151_v36 }
  0x9d   :  { %532 = vmatpush1.bf16.msra.mxu0 %v156_v39  ;;  %574 = vmatprep.subr.bf16.mxu1 %v159_v40 }
  0x9e   :  { %575 = vmatpush1.bf16.msra.mxu1 %v158_v41 }
  0x9f   :  { %v171_v44 = vpop.permute.xlu1 %170  ;;  %v169_v45 = vpop.permute.xlu0 %168 }
  0xa0   :  { %v186_v46 = vsel %vm180_vm3, %v167_v37, %v171_v44  ;;  %v185_v47 = vsel %vm180_vm3, %v165_v38, %v169_v45 }
  0xa1   :  { %v202_v48 = vmul.f32 %v3446_v42, %v186_v46  ;;  %v198_v49 = vmul.f32 %v3451_v43, %v185_v47 }
  0xa3   :  { %v175_v50 = vpop.permute.xlu1 %174  ;;  %v173_v51 = vpop.permute.xlu0 %172  ;;  %v206_v54 = vpack.c.bf16 %v202_v48, %v198_v49 }
  0xa4   :  { %v184_v56 = vsel %vm180_vm3, %v171_v44, %v175_v50  ;;  %v183_v58 = vsel %vm180_vm3, %v169_v45, %v173_v51 }
  0xa5   :  { %533 = vmatprep.subr.bf16.mxu0 %v206_v54  ;;  %v203_v8 = vmul.f32 %v3462_v55, %v184_v56  ;;  %v199_v11 = vmul.f32 %v3469_v57, %v183_v58  ;;  %v3527_v56 = vld [vmem:[%s5772_s1 + $0xf0] sm:$0xff] }
  0xa7   :  { %v179_v18 = vpop.permute.xlu1 %178  ;;  %v177_v19 = vpop.permute.xlu0 %176  ;;  %v207_v41 = vpack.c.bf16 %v203_v8, %v199_v11  ;;  %v3534_v8 = vld [vmem:[%s5772_s1 + $0xd0] sm:$0xff] }
  0xa8   :  { %v182_v20 = vsel %vm180_vm3, %v175_v50, %v179_v18  ;;  %v188_v22 = vsel %vm180_vm3, %v179_v18, %v167_v37  ;;  %v181_v23 = vsel %vm180_vm3, %v173_v51, %v177_v19  ;;  %v187_v24 = vsel %vm180_vm3, %v177_v19, %v165_v38  ;;  %v3511_v37 = vld [vmem:[%s5772_s1 + $0xe8] sm:$0xff]  ;;  %v3541_v18 = vld [vmem:[%s5772_s1 + $0xe0] sm:$0xff]  ;;  %v3546_v19 = vld [vmem:[%s5772_s1 + $0xf8] sm:$0xff] }
  0xa9   :  { %v201_v25 = vmul.f32 %v3476_v59, %v188_v22  ;;  %v204_v26 = vmul.f32 %v3481_v60, %v182_v20  ;;  %v197_v33 = vmul.f32 %v3486_v61, %v187_v24  ;;  %v200_v34 = vmul.f32 %v3491_v62, %v181_v23  ;;  %v3516_v38 = vld [vmem:[%s5772_s1 + $0xc8] sm:$0xff]  ;;  %v3551_v20 = vld [vmem:[%s5772_s1 + $0xc0] sm:$0xff]  ;;  %v3556_v22 = vld [vmem:[%s5772_s1 + $0xd8] sm:$0xff] }
  0xab   :  { %v216_v35 = vpop.permute.xlu1 %215  ;;  %v214_v36 = vpop.permute.xlu0 %213  ;;  %v205_v39 = vpack.c.bf16 %v201_v25, %v197_v33  ;;  %v208_v40 = vpack.c.bf16 %v204_v26, %v200_v34 }
  0xad   :  { %534 = vmatpush1.bf16.msra.mxu0 %v205_v39  ;;  %576 = vmatprep.subr.bf16.mxu1 %v208_v40 }
  0xae   :  { %577 = vmatpush1.bf16.msra.mxu1 %v207_v41 }
  0xaf   :  { %v220_v44 = vpop.permute.xlu1 %219  ;;  %v218_v45 = vpop.permute.xlu0 %217 }
  0xb0   :  { %v235_v46 = vsel %vm229_vm4, %v216_v35, %v220_v44  ;;  %v234_v47 = vsel %vm229_vm4, %v214_v36, %v218_v45 }
  0xb1   :  { %v251_v48 = vmul.f32 %v3511_v37, %v235_v46  ;;  %v247_v49 = vmul.f32 %v3516_v38, %v234_v47  ;;  %v263_v47 = vpack.c.bf16 %v3146_v2, %v3132_v0  ;;  %v3582_v0 = vld [vmem:[%s5772_s1 + $0x168] sm:$0xff] }
  0xb2   :  { %5897 = vst [vmem:[#allocation4_spill] sm:$0xff] %v3582_v0  ;;  %v3587_v2 = vld [vmem:[%s5772_s1 + $0x148] sm:$0xff] }
  0xb3   :  { %v224_v50 = vpop.permute.xlu1 %223  ;;  %v222_v51 = vpop.permute.xlu0 %221  ;;  %v255_v54 = vpack.c.bf16 %v251_v48, %v247_v49  ;;  %5898 = vst [vmem:[#allocation5_spill] sm:$0xff] %v3587_v2 }
  0xb4   :  { %v233_v58 = vsel %vm229_vm4, %v220_v44, %v224_v50  ;;  %v232_v11 = vsel %vm229_vm4, %v218_v45, %v222_v51 }
  0xb5   :  { %535 = vmatprep.subr.bf16.mxu0 %v255_v54  ;;  %v252_v23 = vmul.f32 %v3527_v56, %v233_v58  ;;  %v248_v24 = vmul.f32 %v3534_v8, %v232_v11 }
  0xb7   :  { %v228_v25 = vpop.permute.xlu1 %227  ;;  %v226_v26 = vpop.permute.xlu0 %225  ;;  %v256_v54 = vpack.c.bf16 %v252_v23, %v248_v24  ;;  %v3600_v24 = vld [vmem:[%s5772_s1 + $0x160] sm:$0xff] }
  0xb8   :  { %v231_v33 = vsel %vm229_vm4, %v224_v50, %v228_v25  ;;  %v237_v34 = vsel %vm229_vm4, %v228_v25, %v216_v35  ;;  %v230_v39 = vsel %vm229_vm4, %v222_v51, %v226_v26  ;;  %v236_v40 = vsel %vm229_vm4, %v226_v26, %v214_v36  ;;  %5899 = vst [vmem:[#allocation6_spill] sm:$0xff] %v3600_v24 }
  0xb9   :  { %v250_v41 = vmul.f32 %v3541_v18, %v237_v34  ;;  %v253_v44 = vmul.f32 %v3546_v19, %v231_v33  ;;  %v246_v45 = vmul.f32 %v3551_v20, %v236_v40  ;;  %v249_v46 = vmul.f32 %v3556_v22, %v230_v39 }
  0xba   :  { %v265_v51 = vpack.c.bf16 %v3174_v6, %v3179_v7  ;;  %v262_v36 = vpack.c.bf16 %v3151_v3, %v3137_v1  ;;  %v264_v6 = vpack.c.bf16 %v3160_v4, %v3165_v5  ;;  %v3605_v4 = vld [vmem:[%s5772_s1 + $0x140] sm:$0xff] }
  0xbb   :  { %v277_v48 = vpop.permute.xlu1 %276  ;;  %v275_v49 = vpop.permute.xlu0 %274  ;;  %v254_v35 = vpack.c.bf16 %v250_v41, %v246_v45  ;;  %v257_v50 = vpack.c.bf16 %v253_v44, %v249_v46  ;;  %5900 = vst [vmem:[#allocation7_spill] sm:$0xff] %v3605_v4  ;;  %v3616_v41 = vld [vmem:[%s5772_s1 + $0x170] sm:$0xff]  ;;  %v3621_v44 = vld [vmem:[%s5772_s1 + $0x178] sm:$0xff] }
  0xbc   :  { %5901 = vst [vmem:[#allocation8_spill] sm:$0xff] %v3616_v41  ;;  %5902 = vst [vmem:[#allocation9_spill] sm:$0xff] %v3621_v44  ;;  %v3626_v45 = vld [vmem:[%s5772_s1 + $0x150] sm:$0xff]  ;;  %v3631_v46 = vld [vmem:[%s5772_s1 + $0x158] sm:$0xff] }
  0xbd   :  { %536 = vmatpush1.bf16.msra.mxu0 %v254_v35  ;;  %578 = vmatprep.subr.bf16.mxu1 %v257_v50  ;;  %5903 = vst [vmem:[#allocation10_spill] sm:$0xff] %v3626_v45  ;;  %5904 = vst [vmem:[#allocation11_spill] sm:$0xff] %v3631_v46 }
  0xbe   :  { %579 = vmatpush1.bf16.msra.mxu1 %v256_v54  ;;  %537 = vmatprep.subr.bf16.mxu0 %v263_v47 }
  0xbf   :  { %v281_v7 = vpop.permute.xlu1 %280  ;;  %v279_v58 = vpop.permute.xlu0 %278  ;;  %580 = vmatprep.subr.bf16.mxu1 %v265_v51 }
  0xc0   :  { %v290_v1 = vsel %vm286_vm5, %v277_v48, %v281_v7  ;;  %v289_v3 = vsel %vm286_vm5, %v275_v49, %v279_v58 }
  0xc1   :  { %v308_v11 = vmul.f32 %v3582_v0, %v290_v1  ;;  %v304_v23 = vmul.f32 %v3587_v2, %v289_v3  ;;  %538 = vmatpush1.bf16.msra.mxu0 %v262_v36 }
  0xc2   :  { %581 = vmatpush1.bf16.msra.mxu1 %v264_v6 }
  0xc3   :  { %v273_v5 = vpop.permute.xlu1 %272  ;;  %v271_v25 = vpop.permute.xlu0 %270  ;;  %v312_v26 = vpack.c.bf16 %v308_v11, %v304_v23 }
  0xc4   :  { %v292_v33 = vsel %vm286_vm5, %v273_v5, %v277_v48  ;;  %v291_v34 = vsel %vm286_vm5, %v271_v25, %v275_v49 }
  0xc5   :  { %v307_v39 = vmul.f32 %v3600_v24, %v292_v33  ;;  %v303_v40 = vmul.f32 %v3605_v4, %v291_v34  ;;  %539 = vmatprep.subr.bf16.mxu0 %v312_v26 }
  0xc7   :  { %v285_v47 = vpop.permute.xlu1 %284  ;;  %v283_v48 = vpop.permute.xlu0 %282  ;;  %v311_v49 = vpack.c.bf16 %v307_v39, %v303_v40 }
  0xc8   :  { %v288_v35 = vsel %vm286_vm5, %v281_v7, %v285_v47  ;;  %v294_v50 = vsel %vm286_vm5, %v285_v47, %v273_v5  ;;  %v287_v51 = vsel %vm286_vm5, %v279_v58, %v283_v48  ;;  %v293_v54 = vsel %vm286_vm5, %v283_v48, %v271_v25  ;;  %v3649_v58 = vld [vmem:[%s5772_s1 + $0x1a8] sm:$0xff]  ;;  %v3665_v48 = vld [vmem:[%s5772_s1 + $0x1a0] sm:$0xff] }
  0xc9   :  { %v309_v36 = vmul.f32 %v3616_v41, %v288_v35  ;;  %v310_v6 = vmul.f32 %v3621_v44, %v294_v50  ;;  %v305_v1 = vmul.f32 %v3626_v45, %v287_v51  ;;  %v306_v3 = vmul.f32 %v3631_v46, %v293_v54  ;;  %540 = vmatpush1.bf16.msra.mxu0 %v311_v49  ;;  %v3654_v5 = vld [vmem:[%s5772_s1 + $0x188] sm:$0xff]  ;;  %v3670_v49 = vld [vmem:[%s5772_s1 + $0x180] sm:$0xff] }
  0xca   :  { %5905 = vst [vmem:[#allocation12_spill] sm:$0xff] %v3649_v58  ;;  %5906 = vst [vmem:[#allocation13_spill] sm:$0xff] %v3654_v5 }
  0xcb   :  { %v326_v11 = vpop.permute.xlu1 %325  ;;  %v324_v7 = vpop.permute.xlu0 %323  ;;  %v314_v23 = vpack.c.bf16 %v310_v6, %v306_v3  ;;  %v313_v26 = vpack.c.bf16 %v309_v36, %v305_v1  ;;  %5907 = vst [vmem:[#allocation14_spill] sm:$0xff] %v3665_v48  ;;  %5908 = vst [vmem:[#allocation15_spill] sm:$0xff] %v3670_v49  ;;  %v3681_v3 = vld [vmem:[%s5772_s1 + $0x1b0] sm:$0xff] }
  0xcc   :  { %5909 = vst [vmem:[#allocation16_spill] sm:$0xff] %v3681_v3 }
  0xcd   :  { %582 = vmatprep.subr.bf16.mxu1 %v314_v23  ;;  %v3686_v23 = vld [vmem:[%s5772_s1 + $0x1b8] sm:$0xff] }
  0xce   :  { %583 = vmatpush1.bf16.msra.mxu1 %v313_v26  ;;  %5910 = vst [vmem:[#allocation17_spill] sm:$0xff] %v3686_v23 }
  0xcf   :  { %v330_v25 = vpop.permute.xlu1 %329  ;;  %v328_v33 = vpop.permute.xlu0 %327 }
  0xd0   :  { %v339_v34 = vsel %vm335_vm6, %v326_v11, %v330_v25  ;;  %v338_v39 = vsel %vm335_vm6, %v324_v7, %v328_v33 }
  0xd1   :  { %v357_v40 = vmul.f32 %v3649_v58, %v339_v34  ;;  %v353_v47 = vmul.f32 %v3654_v5, %v338_v39 }
  0xd3   :  { %v322_v35 = vpop.permute.xlu1 %321  ;;  %v320_v50 = vpop.permute.xlu0 %319  ;;  %v361_v51 = vpack.c.bf16 %v357_v40, %v353_v47 }
  0xd4   :  { %v341_v54 = vsel %vm335_vm6, %v322_v35, %v326_v11  ;;  %v340_v36 = vsel %vm335_vm6, %v320_v50, %v324_v7  ;;  %v3691_v11 = vld [vmem:[%s5772_s1 + $0x190] sm:$0xff]  ;;  %v3696_v7 = vld [vmem:[%s5772_s1 + $0x198] sm:$0xff] }
  0xd5   :  { %v356_v6 = vmul.f32 %v3665_v48, %v341_v54  ;;  %v352_v1 = vmul.f32 %v3670_v49, %v340_v36  ;;  %541 = vmatprep.subr.bf16.mxu0 %v361_v51  ;;  %5911 = vst [vmem:[#allocation18_spill] sm:$0xff] %v3691_v11  ;;  %5912 = vst [vmem:[#allocation19_spill] sm:$0xff] %v3696_v7 }
  0xd7   :  { %v334_v26 = vpop.permute.xlu1 %333  ;;  %v332_v34 = vpop.permute.xlu0 %331  ;;  %v360_v39 = vpack.c.bf16 %v356_v6, %v352_v1 }
  0xd8   :  { %v337_v40 = vsel %vm335_vm6, %v330_v25, %v334_v26  ;;  %v343_v47 = vsel %vm335_vm6, %v334_v26, %v322_v35  ;;  %v336_v51 = vsel %vm335_vm6, %v328_v33, %v332_v34  ;;  %v342_v54 = vsel %vm335_vm6, %v332_v34, %v320_v50  ;;  %v3714_v33 = vld [vmem:[%s5772_s1 + $0x1e8] sm:$0xff]  ;;  %v3730_v34 = vld [vmem:[%s5772_s1 + $0x1e0] sm:$0xff] }
  0xd9   :  { %v358_v36 = vmul.f32 %v3681_v3, %v337_v40  ;;  %v359_v21 = vmul.f32 %v3686_v23, %v343_v47  ;;  %v354_v58 = vmul.f32 %v3691_v11, %v336_v51  ;;  %v355_v6 = vmul.f32 %v3696_v7, %v342_v54  ;;  %542 = vmatpush1.bf16.msra.mxu0 %v360_v39  ;;  %v3719_v35 = vld [vmem:[%s5772_s1 + $0x1c8] sm:$0xff]  ;;  %v3735_v39 = vld [vmem:[%s5772_s1 + $0x1c0] sm:$0xff] }
  0xda   :  { %5913 = vst [vmem:[#allocation20_spill] sm:$0xff] %v3714_v33  ;;  %5914 = vst [vmem:[#allocation21_spill] sm:$0xff] %v3719_v35 }
  0xdb   :  { %v375_v1 = vpop.permute.xlu1 %374  ;;  %v373_v25 = vpop.permute.xlu0 %372  ;;  %v363_v48 = vpack.c.bf16 %v359_v21, %v355_v6  ;;  %v362_v5 = vpack.c.bf16 %v358_v36, %v354_v58  ;;  %5915 = vst [vmem:[#allocation22_spill] sm:$0xff] %v3730_v34  ;;  %5916 = vst [vmem:[#allocation23_spill] sm:$0xff] %v3735_v39 }
  0xdd   :  { %584 = vmatprep.subr.bf16.mxu1 %v363_v48 }
  0xde   :  { %585 = vmatpush1.bf16.msra.mxu1 %v362_v5 }
  0xdf   :  { %v379_v50 = vpop.permute.xlu1 %378  ;;  %v377_v26 = vpop.permute.xlu0 %376 }
  0xe0   :  { %v388_v21 = vsel %vm384_vm7, %v375_v1, %v379_v50  ;;  %v387_v58 = vsel %vm384_vm7, %v373_v25, %v377_v26 }
  0xe1   :  { %v406_v5 = vmul.f32 %v3714_v33, %v388_v21  ;;  %v402_v48 = vmul.f32 %v3719_v35, %v387_v58  ;;  %v3746_v58 = vld [vmem:[%s5772_s1 + $0x1f0] sm:$0xff] }
  0xe2   :  { %5917 = vst [vmem:[#allocation24_spill] sm:$0xff] %v3746_v58 }
  0xe3   :  { %v371_v40 = vpop.permute.xlu1 %370  ;;  %v369_v47 = vpop.permute.xlu0 %368  ;;  %v410_v51 = vpack.c.bf16 %v406_v5, %v402_v48  ;;  %v3751_v5 = vld [vmem:[%s5772_s1 + $0x1f8] sm:$0xff] }
  0xe4   :  { %v390_v54 = vsel %vm384_vm7, %v371_v40, %v375_v1  ;;  %v389_v36 = vsel %vm384_vm7, %v369_v47, %v373_v25  ;;  %5918 = vst [vmem:[#allocation25_spill] sm:$0xff] %v3751_v5  ;;  %v3756_v1 = vld [vmem:[%s5772_s1 + $0x1d0] sm:$0xff]  ;;  %v3761_v25 = vld [vmem:[%s5772_s1 + $0x1d8] sm:$0xff] }
  0xe5   :  { %v405_v6 = vmul.f32 %v3730_v34, %v390_v54  ;;  %v401_v21 = vmul.f32 %v3735_v39, %v389_v36  ;;  %543 = vmatprep.subr.bf16.mxu0 %v410_v51  ;;  %5919 = vst [vmem:[#allocation26_spill] sm:$0xff] %v3756_v1  ;;  %5920 = vst [vmem:[#allocation27_spill] sm:$0xff] %v3761_v25 }
  0xe7   :  { %v383_v48 = vpop.permute.xlu1 %382  ;;  %v381_v51 = vpop.permute.xlu0 %380  ;;  %v409_v54 = vpack.c.bf16 %v405_v6, %v401_v21 }
  0xe8   :  { %v386_v36 = vsel %vm384_vm7, %v379_v50, %v383_v48  ;;  %v392_v33 = vsel %vm384_vm7, %v383_v48, %v371_v40  ;;  %v385_v34 = vsel %vm384_vm7, %v377_v26, %v381_v51  ;;  %v391_v35 = vsel %vm384_vm7, %v381_v51, %v369_v47  ;;  %v3779_v26 = vld [vmem:[%s5772_s1 + $0x228] sm:$0xff]  ;;  %v3800_v40 = vld [vmem:[%s5772_s1 + $0x200] sm:$0xff] }
  0xe9   :  { %v407_v39 = vmul.f32 %v3746_v58, %v386_v36  ;;  %v408_v23 = vmul.f32 %v3751_v5, %v392_v33  ;;  %v403_v3 = vmul.f32 %v3756_v1, %v385_v34  ;;  %v404_v6 = vmul.f32 %v3761_v25, %v391_v35  ;;  %544 = vmatpush1.bf16.msra.mxu0 %v409_v54  ;;  %v3784_v33 = vld [vmem:[%s5772_s1 + $0x208] sm:$0xff] }
  0xea   :  { %5921 = vst [vmem:[#allocation28_spill] sm:$0xff] %v3779_v26  ;;  %5922 = vst [vmem:[#allocation29_spill] sm:$0xff] %v3784_v33 }
  0xeb   :  { %v424_v21 = vpop.permute.xlu1 %423  ;;  %v422_v50 = vpop.permute.xlu0 %421  ;;  %v412_v7 = vpack.c.bf16 %v408_v23, %v404_v6  ;;  %v411_v11 = vpack.c.bf16 %v407_v39, %v403_v3  ;;  %v3795_v39 = vld [vmem:[%s5772_s1 + $0x220] sm:$0xff]  ;;  %5924 = vst [vmem:[#allocation31_spill] sm:$0xff] %v3800_v40 }
  0xec   :  { %5923 = vst [vmem:[#allocation30_spill] sm:$0xff] %v3795_v39 }
  0xed   :  { %586 = vmatprep.subr.bf16.mxu1 %v412_v7 }
  0xee   :  { %587 = vmatpush1.bf16.msra.mxu1 %v411_v11 }
  0xef   :  { %v428_v35 = vpop.permute.xlu1 %427  ;;  %v426_v34 = vpop.permute.xlu0 %425 }
  0xf0   :  { %v437_v23 = vsel %vm433_vm8, %v424_v21, %v428_v35  ;;  %v436_v3 = vsel %vm433_vm8, %v422_v50, %v426_v34 }
  0xf1   :  { %v455_v11 = vmul.f32 %v3779_v26, %v437_v23  ;;  %v451_v7 = vmul.f32 %v3784_v33, %v436_v3  ;;  %v3811_v3 = vld [vmem:[%s5772_s1 + $0x230] sm:$0xff] }
  0xf2   :  { %5925 = vst [vmem:[#allocation32_spill] sm:$0xff] %v3811_v3 }
  0xf3   :  { %v420_v47 = vpop.permute.xlu1 %419  ;;  %v418_v48 = vpop.permute.xlu0 %417  ;;  %v459_v51 = vpack.c.bf16 %v455_v11, %v451_v7  ;;  %v3816_v11 = vld [vmem:[%s5772_s1 + $0x238] sm:$0xff] }
  0xf4   :  { %v439_v54 = vsel %vm433_vm8, %v420_v47, %v424_v21  ;;  %v438_v36 = vsel %vm433_vm8, %v418_v48, %v422_v50  ;;  %5926 = vst [vmem:[#allocation33_spill] sm:$0xff] %v3816_v11  ;;  %v3821_v21 = vld [vmem:[%s5772_s1 + $0x210] sm:$0xff]  ;;  %v3826_v50 = vld [vmem:[%s5772_s1 + $0x218] sm:$0xff] }
  0xf5   :  { %v454_v6 = vmul.f32 %v3795_v39, %v439_v54  ;;  %v450_v23 = vmul.f32 %v3800_v40, %v438_v36  ;;  %545 = vmatprep.subr.bf16.mxu0 %v459_v51  ;;  %5927 = vst [vmem:[#allocation34_spill] sm:$0xff] %v3821_v21  ;;  %5928 = vst [vmem:[#allocation35_spill] sm:$0xff] %v3826_v50  ;;  %v2997_v40 = vld [vmem:[%s5771_s2] ss:$8 sps:$4 sm:$0xff]   ;;  %s5933_s2 = smov 113  }
  0xf7   :  { %v432_v7 = vpop.permute.xlu1 %431  ;;  %v430_v51 = vpop.permute.xlu0 %429  ;;  %v458_v54 = vpack.c.bf16 %v454_v6, %v450_v23 }
  0xf8   :  { %v435_v36 = vsel %vm433_vm8, %v428_v35, %v432_v7  ;;  %v441_v26 = vsel %vm433_vm8, %v432_v7, %v420_v47  ;;  %v434_v39 = vsel %vm433_vm8, %v426_v34, %v430_v51  ;;  %v440_v33 = vsel %vm433_vm8, %v430_v51, %v418_v48 }
  0xf9   :  { %v456_v5 = vmul.f32 %v3811_v3, %v435_v36  ;;  %v457_v6 = vmul.f32 %v3816_v11, %v441_v26  ;;  %v452_v23 = vmul.f32 %v3821_v21, %v434_v39  ;;  %v453_v35 = vmul.f32 %v3826_v50, %v440_v33  ;;  %546 = vmatpush1.bf16.msra.mxu0 %v458_v54 }
  0xfb   :  { %v461_v47 = vpack.c.bf16 %v457_v6, %v453_v35  ;;  %v460_v7 = vpack.c.bf16 %v456_v5, %v452_v23 }
  0xfc   :  { %562 = vmatmul.mubr.bf16.vlgmr.msra.gmra.mrb[0].mxu0 %v2997_v40 }
  0xfd   :  { %588 = vmatprep.subr.bf16.mxu1 %v461_v47 }
  0xfe   :  { %589 = vmatpush1.bf16.msra.mxu1 %v460_v7 }
 0x101   :  { %605 = vmatmul.mubr.bf16.vlgmr.msra.gmra.mrb[0].mxu1 %v2997_v40 }
 0x108   :  { %v509_v34 = vpop.permute.xlu0 %508 }
 0x109   :  { %v514_v51 = vpop.permute.xlu1 %513 }
 0x1cf   :  { %v563_v48 = vpop.f32.mrb[0].mxu0 }
 0x1d0   :  { %v564_v58 = vadd.f32 %v563_v48, %v509_v34  ;;  %v565_v25 = vpop.f32.mrb[1].mxu0 }
 0x1d1   :  { %v567_v1 = vpop.f32.mrb[2].mxu0 }
 0x1d2   :  { %v3843_v36 = vmax.f32 %v564_v58, 0.0  ;;  %v568_v26 = vadd.f32 %v567_v1, %v514_v51  ;;  %v569_v11 = vpop.f32.mrb[3].mxu0  ;;  %v566_v1 = vadd.f32 %v565_v25, %v509_v34 }
 0x1d3   :  { %v570_v47 = vadd.f32 %v569_v11, %v514_v51 }
 0x1d4   :  { %5929 = vst [vmem:[#allocation36_spill] sm:$0xff] %v3843_v36  ;;  %v3845_v39 = vmax.f32 %v568_v26, 0.0  ;;  %v606_v33 = vpop.f32.mrb[0].mxu1  ;;  %623 = vrot.lane.b32.xlu1 %v3843_v36, %s3032_s26  ;;  %v3913_v7 = vmax.f32 %v566_v1, 0.0  ;;  %v1053_v1 = vld [vmem:[%s5775_s5] sm:$0xff] }
 0x1d5   :  { %v607_v5 = vadd.f32 %v606_v33, %v509_v34  ;;  %v608_v54 = vpop.f32.mrb[1].mxu1  ;;  %v3917_v26 = vmax.f32 %v570_v47, 0.0 }
 0x1d6   :  { %5930 = vst [vmem:[#allocation37_spill] sm:$0xff] %v3845_v39  ;;  %v610_v6 = vpop.f32.mrb[2].mxu1  ;;  %625 = vrot.lane.b32.xlu0 %v3845_v39, %s3032_s26  ;;  %5936 = vst [vmem:[#allocation40_spill] sm:$0xff] %v3913_v7  ;;  %v609_v48 = vadd.f32 %v608_v54, %v509_v34 }
 0x1d7   :  { %v3851_v40 = vmax.f32 %v607_v5, 0.0  ;;  %v611_v23 = vadd.f32 %v610_v6, %v514_v51  ;;  %v612_v35 = vpop.f32.mrb[3].mxu1  ;;  %5937 = vst [vmem:[#allocation41_spill] sm:$0xff] %v3917_v26  ;;  %v3000_v5 = vld [vmem:[%s5774_s4 + $0x4] ss:$8 sps:$4 sm:$0xff]  }
 0x1d8   :  { %v613_v33 = vadd.f32 %v612_v35, %v514_v51  ;;  %v3921_v25 = vmax.f32 %v609_v48, 0.0  ;;  %2916 = vmatprep.mubr.msk.bf16.mxu0 %vm525_vm1, %v3000_v5  ;;  %2917 = vmatprep.mubr.msk.bf16.mxu1 %vm525_vm1, %v3000_v5  ;;  %v1054_v48 = vld [vmem:[%s5775_s5 + $0x8] sm:$0xff] }
 0x1d9   :  { %5931 = vst [vmem:[#allocation38_spill] sm:$0xff] %v3851_v40  ;;  %v3853_v58 = vmax.f32 %v611_v23, 0.0  ;;  %631 = vrot.lane.b32.xlu1 %v3851_v40, %s3032_s26 }
 0x1da   :  { %5938 = vst [vmem:[#allocation42_spill] sm:$0xff] %v3921_v25  ;;  %v3925_v11 = vmax.f32 %v613_v33, 0.0 }
 0x1db   :  { %5932 = vst [vmem:[#allocation39_spill] sm:$0xff] %v3853_v58  ;;  %633 = vrot.lane.b32.xlu0 %v3853_v58, %s3032_s26 }
 0x1dc   :  { %5939 = vst [vmem:[#allocation43_spill] sm:$0xff] %v3925_v11 }
 0x1dd   :  { %671 = vrot.lane.b32.xlu1 %v3843_v36, %s3033_s25 }
 0x1df   :  { %673 = vrot.lane.b32.xlu0 %v3845_v39, %s3033_s25 }
 0x1e1   :  { %679 = vrot.lane.b32.xlu1 %v3851_v40, %s3033_s25 }
 0x1e3   :  { %681 = vrot.lane.b32.xlu0 %v3853_v58, %s3033_s25 }
 0x1e5   :  { %719 = vrot.lane.b32.xlu1 %v3843_v36, %s3034_s27 }
 0x1e7   :  { %721 = vrot.lane.b32.xlu0 %v3845_v39, %s3034_s27 }
 0x1e9   :  { %727 = vrot.lane.b32.xlu1 %v3851_v40, %s3034_s27 }
 0x1eb   :  { %729 = vrot.lane.b32.xlu0 %v3853_v58, %s3034_s27 }
 0x1ed   :  { %767 = vrot.lane.b32.xlu1 %v3843_v36, %s3035_s28 }
 0x1ef   :  { %769 = vrot.lane.b32.xlu0 %v3845_v39, %s3035_s28 }
 0x1f1   :  { %775 = vrot.lane.b32.xlu1 %v3851_v40, %s3035_s28 }
 0x1f3   :  { %777 = vrot.lane.b32.xlu0 %v3853_v58, %s3035_s28 }
 0x1f5   :  { %831 = vrot.lane.b32.xlu1 %v3851_v40, %s3036_s29 }
 0x1f7   :  { %833 = vrot.lane.b32.xlu0 %v3853_v58, %s3036_s29 }
 0x1f9   :  { %823 = vrot.lane.b32.xlu1 %v3843_v36, %s3036_s29 }
 0x1fb   :  { %825 = vrot.lane.b32.xlu0 %v3845_v39, %s3036_s29 }
 0x1fd   :  { %879 = vrot.lane.b32.xlu1 %v3851_v40, %s5933_s2 }
 0x1ff   :  { %881 = vrot.lane.b32.xlu0 %v3853_v58, %s5933_s2 }
 0x201   :  { %871 = vrot.lane.b32.xlu1 %v3843_v36, %s5933_s2 }
 0x203   :  { %873 = vrot.lane.b32.xlu0 %v3845_v39, %s5933_s2 }
 0x205   :  { %927 = vrot.lane.b32.xlu1 %v3851_v40, %s5934_s19 }
 0x207   :  { %929 = vrot.lane.b32.xlu0 %v3853_v58, %s5934_s19 }
 0x209   :  { %919 = vrot.lane.b32.xlu1 %v3843_v36, %s5934_s19 }
 0x20b   :  { %921 = vrot.lane.b32.xlu0 %v3845_v39, %s5934_s19 }
 0x20d   :  { %975 = vrot.lane.b32.xlu1 %v3851_v40, %s5935_s20 }
 0x20f   :  { %977 = vrot.lane.b32.xlu0 %v3853_v58, %s5935_s20 }
 0x211   :  { %967 = vrot.lane.b32.xlu1 %v3843_v36, %s5935_s20 }
 0x213   :  { %969 = vrot.lane.b32.xlu0 %v3845_v39, %s5935_s20 }
 0x215   :  { %627 = vrot.lane.b32.xlu1 %v3913_v7, %s3032_s26 }
 0x217   :  { %629 = vrot.lane.b32.xlu0 %v3917_v26, %s3032_s26 }
 0x219   :  { %635 = vrot.lane.b32.xlu1 %v3921_v25, %s3032_s26 }
 0x21b   :  { %637 = vrot.lane.b32.xlu0 %v3925_v11, %s3032_s26 }
 0x21d   :  { %675 = vrot.lane.b32.xlu1 %v3913_v7, %s3033_s25 }
 0x21f   :  { %677 = vrot.lane.b32.xlu0 %v3917_v26, %s3033_s25 }
 0x221   :  { %683 = vrot.lane.b32.xlu1 %v3921_v25, %s3033_s25 }
 0x223   :  { %685 = vrot.lane.b32.xlu0 %v3925_v11, %s3033_s25 }
 0x225   :  { %723 = vrot.lane.b32.xlu1 %v3913_v7, %s3034_s27 }
 0x227   :  { %725 = vrot.lane.b32.xlu0 %v3917_v26, %s3034_s27 }
 0x229   :  { %731 = vrot.lane.b32.xlu1 %v3921_v25, %s3034_s27 }
 0x22b   :  { %733 = vrot.lane.b32.xlu0 %v3925_v11, %s3034_s27 }
 0x22d   :  { %771 = vrot.lane.b32.xlu1 %v3913_v7, %s3035_s28 }
 0x22f   :  { %773 = vrot.lane.b32.xlu0 %v3917_v26, %s3035_s28 }
 0x231   :  { %779 = vrot.lane.b32.xlu1 %v3921_v25, %s3035_s28 }
 0x233   :  { %781 = vrot.lane.b32.xlu0 %v3925_v11, %s3035_s28 }
 0x235   :  { %827 = vrot.lane.b32.xlu1 %v3913_v7, %s3036_s29 }
 0x237   :  { %829 = vrot.lane.b32.xlu0 %v3917_v26, %s3036_s29 }
 0x239   :  { %835 = vrot.lane.b32.xlu1 %v3921_v25, %s3036_s29 }
 0x23b   :  { %837 = vrot.lane.b32.xlu0 %v3925_v11, %s3036_s29 }
 0x23d   :  { %875 = vrot.lane.b32.xlu1 %v3913_v7, %s5933_s2 }
 0x23f   :  { %877 = vrot.lane.b32.xlu0 %v3917_v26, %s5933_s2 }
 0x241   :  { %883 = vrot.lane.b32.xlu1 %v3921_v25, %s5933_s2 }
 0x243   :  { %885 = vrot.lane.b32.xlu0 %v3925_v11, %s5933_s2 }
 0x245   :  { %923 = vrot.lane.b32.xlu1 %v3913_v7, %s5934_s19 }
 0x246   :  { %v624_v34 = vpop.permute.xlu1 %623 }
 0x247   :  { %925 = vrot.lane.b32.xlu0 %v3917_v26, %s5934_s19 }
 0x248   :  { %v626_v51 = vpop.permute.xlu0 %625 }
 0x249   :  { %931 = vrot.lane.b32.xlu1 %v3921_v25, %s5934_s19 }
 0x24b   :  { %933 = vrot.lane.b32.xlu0 %v3925_v11, %s5934_s19  ;;  %v632_v54 = vpop.permute.xlu1 %631 }
 0x24d   :  { %v634_v6 = vpop.permute.xlu0 %633  ;;  %971 = vrot.lane.b32.xlu1 %v3913_v7, %s5935_s20 }
 0x24f   :  { %973 = vrot.lane.b32.xlu0 %v3917_v26, %s5935_s20  ;;  %v3988_v23 = vpop.permute.xlu1 %671 }
 0x251   :  { %v3990_v35 = vpop.permute.xlu0 %673  ;;  %979 = vrot.lane.b32.xlu1 %v3921_v25, %s5935_s20 }
 0x253   :  { %981 = vrot.lane.b32.xlu0 %v3925_v11, %s5935_s20  ;;  %v3999_v47 = vpop.permute.xlu1 %679 }
 0x255   :  { %v4004_v33 = vpop.permute.xlu0 %681  ;;  %1057 = vperm.xlu1 %2996, %v1053_v1  }
 0x257   :  { %1062 = vperm.xlu0 %2995, %v1054_v48   ;;  %v4006_v5 = vpop.permute.xlu1 %719 }
 0x259   :  { %v4008_v3 = vpop.permute.xlu0 %721 }
 0x25b   :  { %v4010_v50 = vpop.permute.xlu1 %727 }
 0x25d   :  { %v4012_v21 = vpop.permute.xlu0 %729 }
 0x25f   :  { %v4014_v49 = vpop.permute.xlu1 %767 }
 0x261   :  { %v4016_v44 = vpop.permute.xlu0 %769 }
 0x263   :  { %v4018_v41 = vpop.permute.xlu1 %775 }
 0x265   :  { %v4020_v46 = vpop.permute.xlu0 %777 }
 0x267   :  { %v4022_v45 = vpop.permute.xlu1 %831 }
 0x269   :  { %v4024_v1 = vpop.permute.xlu0 %833 }
 0x26a   :  { %5940 = vst [vmem:[#allocation44_spill] sm:$0xff] %v4024_v1 }
 0x26b   :  { %v4026_v48 = vpop.permute.xlu1 %823 }
 0x26c   :  { %5941 = vst [vmem:[#allocation45_spill] sm:$0xff] %v4026_v48 }
 0x26d   :  { %v4028_v58 = vpop.permute.xlu0 %825 }
 0x26e   :  { %5942 = vst [vmem:[#allocation46_spill] sm:$0xff] %v4028_v58 }
 0x26f   :  { %v4030_v40 = vpop.permute.xlu1 %879 }
 0x270   :  { %5943 = vst [vmem:[#allocation47_spill] sm:$0xff] %v4030_v40 }
 0x271   :  { %v4032_v4 = vpop.permute.xlu0 %881 }
 0x272   :  { %5944 = vst [vmem:[#allocation48_spill] sm:$0xff] %v4032_v4 }
 0x273   :  { %v4034_v39 = vpop.permute.xlu1 %871 }
 0x274   :  { %5945 = vst [vmem:[#allocation49_spill] sm:$0xff] %v4034_v39 }
 0x275   :  { %v4036_v36 = vpop.permute.xlu0 %873 }
 0x276   :  { %5946 = vst [vmem:[#allocation50_spill] sm:$0xff] %v4036_v36 }
 0x277   :  { %v4038_v24 = vpop.permute.xlu1 %927 }
 0x278   :  { %5947 = vst [vmem:[#allocation51_spill] sm:$0xff] %v4038_v24 }
 0x279   :  { %v4040_v0 = vpop.permute.xlu0 %929 }
 0x27a   :  { %5948 = vst [vmem:[#allocation52_spill] sm:$0xff] %v4040_v0 }
 0x27b   :  { %v4042_v2 = vpop.permute.xlu1 %919 }
 0x27c   :  { %5949 = vst [vmem:[#allocation53_spill] sm:$0xff] %v4042_v2 }
 0x27d   :  { %v4044_v11 = vpop.permute.xlu0 %921 }
 0x27e   :  { %5950 = vst [vmem:[#allocation54_spill] sm:$0xff] %v4044_v11 }
 0x27f   :  { %v4046_v25 = vpop.permute.xlu1 %975 }
 0x280   :  { %5951 = vst [vmem:[#allocation55_spill] sm:$0xff] %v4046_v25 }
 0x281   :  { %v4048_v48 = vpop.permute.xlu0 %977 }
 0x282   :  { %5952 = vst [vmem:[#allocation56_spill] sm:$0xff] %v4048_v48 }
 0x283   :  { %v4050_v58 = vpop.permute.xlu1 %967 }
 0x284   :  { %5953 = vst [vmem:[#allocation57_spill] sm:$0xff] %v4050_v58 }
 0x285   :  { %v4052_v40 = vpop.permute.xlu0 %969 }
 0x286   :  { %5954 = vst [vmem:[#allocation58_spill] sm:$0xff] %v4052_v40 }
 0x287   :  { %v628_v4 = vpop.permute.xlu1 %627 }
 0x288   :  { %v643_v36 = vsel %vm82_vm0, %v624_v34, %v628_v4  ;;  %v641_v24 = vsel %vm82_vm0, %v628_v4, %v632_v54 }
 0x289   :  { %v630_v39 = vpop.permute.xlu0 %629  ;;  %v656_v2 = vmul.f32 %v643_v36, %v3300_v14 }
 0x28a   :  { %v644_v0 = vsel %vm82_vm0, %v626_v51, %v630_v39  ;;  %v642_v11 = vsel %vm82_vm0, %v630_v39, %v634_v6 }
 0x28b   :  { %v660_v25 = vmul.f32 %v644_v0, %v3305_v15  ;;  %v636_v48 = vpop.permute.xlu1 %635  ;;  %v661_v7 = vmul.f32 %v642_v11, %v3331_v28 }
 0x28c   :  { %v639_v58 = vsel %vm82_vm0, %v632_v54, %v636_v48  ;;  %v645_v40 = vsel %vm82_vm0, %v636_v48, %v624_v34 }
 0x28d   :  { %v638_v1 = vpop.permute.xlu0 %637  ;;  %v664_v26 = vpack.c.bf16 %v660_v25, %v656_v2  ;;  %v655_v0 = vmul.f32 %v645_v40, %v3340_v29  ;;  %v658_v36 = vmul.f32 %v639_v58, %v3350_v31  ;;  %v657_v2 = vmul.f32 %v641_v24, %v3326_v27 }
 0x28e   :  { %v640_v14 = vsel %vm82_vm0, %v634_v6, %v638_v1  ;;  %v646_v15 = vsel %vm82_vm0, %v638_v1, %v626_v51 }
 0x28f   :  { %v659_v39 = vmul.f32 %v646_v15, %v3345_v30  ;;  %v662_v34 = vmul.f32 %v640_v14, %v3355_v32  ;;  %1077 = vmatprep.subr.bf16.mxu0 %v664_v26  ;;  %v676_v4 = vpop.permute.xlu1 %675  ;;  %v665_v51 = vpack.c.bf16 %v661_v7, %v657_v2 }
 0x290   :  { %v691_v28 = vsel %vm131_vm2, %v3988_v23, %v676_v4 }
 0x291   :  { %v663_v25 = vpack.c.bf16 %v659_v39, %v655_v0  ;;  %v678_v11 = vpop.permute.xlu0 %677  ;;  %v666_v54 = vpack.c.bf16 %v662_v34, %v658_v36  ;;  %v704_v30 = vmul.f32 %v691_v28, %v3386_v53  ;;  %v689_v53 = vsel %vm131_vm2, %v676_v4, %v3999_v47 }
 0x292   :  { %v692_v29 = vsel %vm131_vm2, %v3990_v35, %v678_v11  ;;  %v690_v31 = vsel %vm131_vm2, %v678_v11, %v4004_v33 }
 0x293   :  { %v708_v27 = vmul.f32 %v692_v29, %v3381_v52  ;;  %1078 = vmatpush1.bf16.msra.mxu0 %v663_v25  ;;  %1120 = vmatprep.subr.bf16.mxu1 %v666_v54  ;;  %v684_v32 = vpop.permute.xlu1 %683  ;;  %v709_v52 = vmul.f32 %v690_v31, %v3397_v63  ;;  %v705_v63 = vmul.f32 %v689_v53, %v3404_v10 }
 0x294   :  { %v687_v24 = vsel %vm131_vm2, %v3999_v47, %v684_v32  ;;  %v693_v40 = vsel %vm131_vm2, %v684_v32, %v3988_v23  ;;  %1121 = vmatpush1.bf16.msra.mxu1 %v665_v51 }
 0x295   :  { %v686_v58 = vpop.permute.xlu0 %685  ;;  %v712_v7 = vpack.c.bf16 %v708_v27, %v704_v30  ;;  %v703_v1 = vmul.f32 %v693_v40, %v3421_v16  ;;  %v706_v23 = vmul.f32 %v687_v24, %v3426_v17 }
 0x296   :  { %v688_v26 = vsel %vm131_vm2, %v4004_v33, %v686_v58  ;;  %v694_v6 = vsel %vm131_vm2, %v686_v58, %v3990_v35  ;;  %v713_v35 = vpack.c.bf16 %v709_v52, %v705_v63  ;;  %v5960_v63 = vld [vmem:[#allocation43_spill] sm:$0xff] }
 0x297   :  { %v707_v48 = vmul.f32 %v694_v6, %v3411_v12  ;;  %v710_v47 = vmul.f32 %v688_v26, %v3416_v13  ;;  %1079 = vmatprep.subr.bf16.mxu0 %v712_v7  ;;  %v724_v14 = vpop.permute.xlu1 %723 }
 0x298   :  { %v739_v33 = vsel %vm180_vm3, %v4006_v5, %v724_v14 }
 0x299   :  { %v711_v15 = vpack.c.bf16 %v707_v48, %v703_v1  ;;  %v726_v0 = vpop.permute.xlu0 %725  ;;  %v714_v36 = vpack.c.bf16 %v710_v47, %v706_v23  ;;  %v752_v12 = vmul.f32 %v739_v33, %v3451_v43  ;;  %v737_v43 = vsel %vm180_vm3, %v724_v14, %v4010_v50  ;;  %v5956_v48 = vld [vmem:[#allocation41_spill] sm:$0xff] }
 0x29a   :  { %v740_v16 = vsel %vm180_vm3, %v4008_v3, %v726_v0  ;;  %v738_v13 = vsel %vm180_vm3, %v726_v0, %v4012_v21 }
 0x29b   :  { %v756_v10 = vmul.f32 %v740_v16, %v3446_v42  ;;  %1080 = vmatpush1.bf16.msra.mxu0 %v711_v15  ;;  %1122 = vmatprep.subr.bf16.mxu1 %v714_v36  ;;  %v732_v17 = vpop.permute.xlu1 %731  ;;  %v757_v42 = vmul.f32 %v738_v13, %v3462_v55  ;;  %v753_v55 = vmul.f32 %v737_v43, %v3469_v57  ;;  %v5961_v15 = vld [vmem:[#allocation45_spill] sm:$0xff]  ;;  %v5963_v16 = vld [vmem:[#allocation4_spill] sm:$0xff] }
 0x29c   :  { %v735_v39 = vsel %vm180_vm3, %v4010_v50, %v732_v17  ;;  %v741_v34 = vsel %vm180_vm3, %v732_v17, %v4006_v5  ;;  %1123 = vmatpush1.bf16.msra.mxu1 %v713_v35  ;;  %v5962_v36 = vld [vmem:[#allocation5_spill] sm:$0xff] }
 0x29d   :  { %v734_v4 = vpop.permute.xlu0 %733  ;;  %v760_v2 = vpack.c.bf16 %v756_v10, %v752_v12  ;;  %v751_v11 = vmul.f32 %v741_v34, %v3486_v61  ;;  %v754_v5 = vmul.f32 %v735_v39, %v3491_v62  ;;  %v5964_v39 = vld [vmem:[#allocation6_spill] sm:$0xff] }
 0x29e   :  { %v736_v28 = vsel %vm180_vm3, %v4012_v21, %v734_v4  ;;  %v742_v25 = vsel %vm180_vm3, %v734_v4, %v4008_v3  ;;  %v761_v3 = vpack.c.bf16 %v757_v42, %v753_v55  ;;  %v5965_v4 = vld [vmem:[#allocation36_spill] sm:$0xff]  ;;  %v5970_v55 = vld [vmem:[#allocation10_spill] sm:$0xff] }
 0x29f   :  { %v755_v54 = vmul.f32 %v742_v25, %v3476_v59  ;;  %v758_v50 = vmul.f32 %v736_v28, %v3481_v60  ;;  %1081 = vmatprep.subr.bf16.mxu0 %v760_v2  ;;  %v772_v51 = vpop.permute.xlu1 %771  ;;  %v5966_v2 = vld [vmem:[#allocation37_spill] sm:$0xff]  ;;  %v5967_v25 = vld [vmem:[#allocation7_spill] sm:$0xff] }
 0x2a0   :  { %v787_v21 = vsel %vm229_vm4, %v4014_v49, %v772_v51  ;;  %v815_v42 = vpack.c.bf16 %v5966_v2, %v5965_v4 }
 0x2a1   :  { %v759_v29 = vpack.c.bf16 %v755_v54, %v751_v11  ;;  %v774_v30 = vpop.permute.xlu0 %773  ;;  %v762_v31 = vpack.c.bf16 %v758_v50, %v754_v5  ;;  %v800_v59 = vmul.f32 %v787_v21, %v3516_v38  ;;  %v785_v38 = vsel %vm229_vm4, %v772_v51, %v4018_v41  ;;  %v5968_v54 = vld [vmem:[#allocation38_spill] sm:$0xff]  ;;  %v5969_v50 = vld [vmem:[#allocation39_spill] sm:$0xff] }
 0x2a2   :  { %v788_v61 = vsel %vm229_vm4, %v4016_v44, %v774_v30  ;;  %v786_v60 = vsel %vm229_vm4, %v774_v30, %v4020_v46  ;;  %v817_v51 = vpack.c.bf16 %v5969_v50, %v5968_v54  ;;  %v5990_v50 = vld [vmem:[#allocation23_spill] sm:$0xff] }
 0x2a3   :  { %v804_v57 = vmul.f32 %v788_v61, %v3511_v37  ;;  %1082 = vmatpush1.bf16.msra.mxu0 %v759_v29  ;;  %1124 = vmatprep.subr.bf16.mxu1 %v762_v31  ;;  %v780_v62 = vpop.permute.xlu1 %779  ;;  %v805_v37 = vmul.f32 %v786_v60, %v3527_v56  ;;  %v801_v56 = vmul.f32 %v785_v38, %v3534_v8  ;;  %v5959_v8 = vld [vmem:[#allocation42_spill] sm:$0xff]  ;;  %v5971_v29 = vld [vmem:[#allocation11_spill] sm:$0xff]  ;;  %v5972_v31 = vld [vmem:[#allocation8_spill] sm:$0xff] }
 0x2a4   :  { %v783_v27 = vsel %vm229_vm4, %v4018_v41, %v780_v62  ;;  %v789_v32 = vsel %vm229_vm4, %v780_v62, %v4014_v49  ;;  %1125 = vmatpush1.bf16.msra.mxu1 %v761_v3  ;;  %v818_v33 = vpack.c.bf16 %v5960_v63, %v5959_v8  ;;  %v5973_v61 = vld [vmem:[#allocation9_spill] sm:$0xff] }
 0x2a5   :  { %v782_v24 = vpop.permute.xlu0 %781  ;;  %v808_v40 = vpack.c.bf16 %v804_v57, %v800_v59  ;;  %v799_v7 = vmul.f32 %v789_v32, %v3551_v20  ;;  %v802_v49 = vmul.f32 %v783_v27, %v3556_v22  ;;  %v809_v47 = vpack.c.bf16 %v805_v37, %v801_v56  ;;  %v5957_v22 = vld [vmem:[#allocation44_spill] sm:$0xff]  ;;  %v5974_v57 = vld [vmem:[#allocation47_spill] sm:$0xff]  ;;  %v5975_v27 = vld [vmem:[#allocation49_spill] sm:$0xff] }
 0x2a6   :  { %v784_v53 = vsel %vm229_vm4, %v4020_v46, %v782_v24  ;;  %v790_v58 = vsel %vm229_vm4, %v782_v24, %v4016_v44  ;;  %v5955_v44 = vld [vmem:[#allocation40_spill] sm:$0xff] }
 0x2a7   :  { %v803_v52 = vmul.f32 %v790_v58, %v3541_v18  ;;  %v806_v41 = vmul.f32 %v784_v53, %v3546_v19  ;;  %1083 = vmatprep.subr.bf16.mxu0 %v808_v40  ;;  %v828_v26 = vpop.permute.xlu1 %827  ;;  %v816_v20 = vpack.c.bf16 %v5956_v48, %v5955_v44  ;;  %v5958_v19 = vld [vmem:[#allocation46_spill] sm:$0xff]  ;;  %v5976_v53 = vld [vmem:[#allocation15_spill] sm:$0xff] }
 0x2a8   :  { %v841_v46 = vsel %vm286_vm5, %v828_v26, %v4022_v45  ;;  %v843_v0 = vsel %vm286_vm5, %v5961_v15, %v828_v26  ;;  %v5979_v26 = vld [vmem:[#allocation13_spill] sm:$0xff] }
 0x2a9   :  { %v807_v6 = vpack.c.bf16 %v803_v52, %v799_v7  ;;  %v830_v1 = vpop.permute.xlu0 %829  ;;  %v810_v23 = vpack.c.bf16 %v806_v41, %v802_v49  ;;  %v856_v35 = vmul.f32 %v841_v46, %v5962_v36  ;;  %v855_v11 = vmul.f32 %v843_v0, %v5967_v25  ;;  %v5977_v7 = vld [vmem:[#allocation48_spill] sm:$0xff]  ;;  %v5978_v52 = vld [vmem:[#allocation50_spill] sm:$0xff]  ;;  %v5983_v0 = vld [vmem:[#allocation19_spill] sm:$0xff] }
 0x2aa   :  { %v842_v18 = vsel %vm286_vm5, %v830_v1, %v5957_v22  ;;  %v844_v14 = vsel %vm286_vm5, %v5958_v19, %v830_v1  ;;  %v5980_v46 = vld [vmem:[#allocation14_spill] sm:$0xff]  ;;  %v5981_v1 = vld [vmem:[#allocation12_spill] sm:$0xff] }
 0x2ab   :  { %v860_v12 = vmul.f32 %v842_v18, %v5963_v16  ;;  %1084 = vmatpush1.bf16.msra.mxu0 %v807_v6  ;;  %1126 = vmatprep.subr.bf16.mxu1 %v810_v23  ;;  %v836_v13 = vpop.permute.xlu1 %835  ;;  %v859_v34 = vmul.f32 %v844_v14, %v5964_v39  ;;  %v5988_v25 = vld [vmem:[#allocation52_spill] sm:$0xff] }
 0x2ac   :  { %v839_v10 = vsel %vm286_vm5, %v4022_v45, %v836_v13  ;;  %v845_v17 = vsel %vm286_vm5, %v836_v13, %v5961_v15  ;;  %1085 = vmatprep.subr.bf16.mxu0 %v816_v20  ;;  %1127 = vmatpush1.bf16.msra.mxu1 %v809_v47 }
 0x2ad   :  { %v838_v43 = vpop.permute.xlu0 %837  ;;  %1128 = vmatprep.subr.bf16.mxu1 %v818_v33  ;;  %v864_v28 = vpack.c.bf16 %v860_v12, %v856_v35  ;;  %v857_v21 = vmul.f32 %v839_v10, %v5970_v55  ;;  %v858_v30 = vmul.f32 %v845_v17, %v5971_v29  ;;  %v863_v38 = vpack.c.bf16 %v859_v34, %v855_v11  ;;  %v5982_v33 = vld [vmem:[#allocation18_spill] sm:$0xff]  ;;  %v5984_v35 = vld [vmem:[#allocation16_spill] sm:$0xff]  ;;  %v5985_v12 = vld [vmem:[#allocation17_spill] sm:$0xff] }
 0x2ae   :  { %v840_v45 = vsel %vm286_vm5, %v5957_v22, %v838_v43  ;;  %v846_v5 = vsel %vm286_vm5, %v838_v43, %v5958_v19  ;;  %v5986_v17 = vld [vmem:[#allocation51_spill] sm:$0xff]  ;;  %v5987_v34 = vld [vmem:[#allocation53_spill] sm:$0xff]  ;;  %v5992_v29 = vld [vmem:[#allocation22_spill] sm:$0xff] }
 0x2af   :  { %v861_v3 = vmul.f32 %v840_v45, %v5972_v31  ;;  %v862_v59 = vmul.f32 %v846_v5, %v5973_v61  ;;  %v876_v60 = vpop.permute.xlu1 %875  ;;  %1086 = vmatpush1.bf16.msra.mxu0 %v815_v42  ;;  %v5989_v45 = vld [vmem:[#allocation54_spill] sm:$0xff]  ;;  %v5991_v55 = vld [vmem:[#allocation21_spill] sm:$0xff]  ;;  %v5993_v31 = vld [vmem:[#allocation20_spill] sm:$0xff] }
 0x2b0   :  { %v889_v62 = vsel %vm335_vm6, %v876_v60, %v5974_v57  ;;  %v891_v32 = vsel %vm335_vm6, %v5975_v27, %v876_v60  ;;  %1087 = vmatprep.subr.bf16.mxu0 %v864_v28  ;;  %1129 = vmatpush1.bf16.msra.mxu1 %v817_v51 }
 0x2b1   :  { %v865_v24 = vpack.c.bf16 %v861_v3, %v857_v21  ;;  %v878_v40 = vpop.permute.xlu0 %877  ;;  %v866_v37 = vpack.c.bf16 %v862_v59, %v858_v30  ;;  %v903_v58 = vmul.f32 %v891_v32, %v5976_v53  ;;  %v904_v56 = vmul.f32 %v889_v62, %v5979_v26  ;;  %v5998_v26 = vld [vmem:[#allocation55_spill] sm:$0xff] }
 0x2b2   :  { %v890_v49 = vsel %vm335_vm6, %v878_v40, %v5977_v7  ;;  %v892_v41 = vsel %vm335_vm6, %v5978_v52, %v878_v40 }
 0x2b3   :  { %v907_v6 = vmul.f32 %v892_v41, %v5980_v46  ;;  %v908_v23 = vmul.f32 %v890_v49, %v5981_v1  ;;  %1130 = vmatprep.subr.bf16.mxu1 %v866_v37  ;;  %v884_v48 = vpop.permute.xlu1 %883  ;;  %1088 = vmatpush1.bf16.msra.mxu0 %v863_v38  ;;  %v5995_v37 = vld [vmem:[#allocation27_spill] sm:$0xff]  ;;  %v5997_v49 = vld [vmem:[#allocation25_spill] sm:$0xff] }
 0x2b4   :  { %v887_v20 = vsel %vm335_vm6, %v5974_v57, %v884_v48  ;;  %v893_v47 = vsel %vm335_vm6, %v884_v48, %v5975_v27  ;;  %1131 = vmatpush1.bf16.msra.mxu1 %v865_v24  ;;  %v5994_v24 = vld [vmem:[#allocation26_spill] sm:$0xff]  ;;  %v5999_v46 = vld [vmem:[#allocation57_spill] sm:$0xff] }
 0x2b5   :  { %v911_v22 = vpack.c.bf16 %v907_v6, %v903_v58  ;;  %v886_v18 = vpop.permute.xlu0 %885  ;;  %v912_v19 = vpack.c.bf16 %v908_v23, %v904_v56  ;;  %v905_v15 = vmul.f32 %v887_v20, %v5982_v33  ;;  %v906_v36 = vmul.f32 %v893_v47, %v5983_v0  ;;  %v5996_v58 = vld [vmem:[#allocation24_spill] sm:$0xff] }
 0x2b6   :  { %v888_v14 = vsel %vm335_vm6, %v5977_v7, %v886_v18  ;;  %v894_v63 = vsel %vm335_vm6, %v886_v18, %v5978_v52  ;;  %v6000_v20 = vld [vmem:[#allocation56_spill] sm:$0xff] }
 0x2b7   :  { %v909_v16 = vmul.f32 %v888_v14, %v5984_v35  ;;  %v910_v13 = vmul.f32 %v894_v63, %v5985_v12  ;;  %v924_v10 = vpop.permute.xlu1 %923  ;;  %1089 = vmatprep.subr.bf16.mxu0 %v912_v19  ;;  %v6002_v19 = vld [vmem:[#allocation31_spill] sm:$0xff]  ;;  %v6003_v63 = vld [vmem:[#allocation29_spill] sm:$0xff] }
 0x2b8   :  { %v937_v39 = vsel %vm384_vm7, %v924_v10, %v5986_v17  ;;  %v939_v43 = vsel %vm384_vm7, %v5987_v34, %v924_v10  ;;  %1090 = vmatpush1.bf16.msra.mxu0 %v911_v22  ;;  %v6001_v22 = vld [vmem:[#allocation58_spill] sm:$0xff] }
 0x2b9   :  { %v913_v2 = vpack.c.bf16 %v909_v16, %v905_v15  ;;  %v926_v42 = vpop.permute.xlu0 %925  ;;  %v914_v28 = vpack.c.bf16 %v910_v13, %v906_v36  ;;  %v951_v51 = vmul.f32 %v939_v43, %v5990_v50  ;;  %v952_v21 = vmul.f32 %v937_v39, %v5991_v55  ;;  %v6004_v15 = vld [vmem:[#allocation30_spill] sm:$0xff]  ;;  %v6005_v36 = vld [vmem:[#allocation28_spill] sm:$0xff] }
 0x2ba   :  { %v938_v11 = vsel %vm384_vm7, %v926_v42, %v5988_v25  ;;  %v940_v5 = vsel %vm384_vm7, %v5989_v45, %v926_v42 }
 0x2bb   :  { %v955_v30 = vmul.f32 %v940_v5, %v5992_v29  ;;  %v956_v3 = vmul.f32 %v938_v11, %v5993_v31  ;;  %1132 = vmatprep.subr.bf16.mxu1 %v914_v28  ;;  %v932_v61 = vpop.permute.xlu1 %931  ;;  %v6007_v28 = vld [vmem:[#allocation35_spill] sm:$0xff]  ;;  %v6008_v11 = vld [vmem:[#allocation32_spill] sm:$0xff]  ;;  %v6009_v5 = vld [vmem:[#allocation33_spill] sm:$0xff] }
 0x2bc   :  { %v935_v59 = vsel %vm384_vm7, %v5986_v17, %v932_v61  ;;  %v941_v60 = vsel %vm384_vm7, %v932_v61, %v5987_v34  ;;  %1133 = vmatpush1.bf16.msra.mxu1 %v913_v2  ;;  %v6006_v2 = vld [vmem:[#allocation34_spill] sm:$0xff] }
 0x2bd   :  { %v959_v57 = vpack.c.bf16 %v955_v30, %v951_v51  ;;  %v934_v62 = vpop.permute.xlu0 %933  ;;  %v960_v27 = vpack.c.bf16 %v956_v3, %v952_v21  ;;  %v953_v40 = vmul.f32 %v935_v59, %v5994_v24  ;;  %v954_v53 = vmul.f32 %v941_v60, %v5995_v37  ;;  %v3002_v51 = vld [vmem:[%s5774_s4] ss:$8 sps:$4 sm:$0xff]  }
 0x2be   :  { %v936_v32 = vsel %vm384_vm7, %v5988_v25, %v934_v62  ;;  %v942_v38 = vsel %vm384_vm7, %v934_v62, %v5989_v45 }
 0x2bf   :  { %v957_v7 = vmul.f32 %v936_v32, %v5996_v58  ;;  %v958_v52 = vmul.f32 %v942_v38, %v5997_v49  ;;  %v972_v41 = vpop.permute.xlu1 %971  ;;  %1091 = vmatprep.subr.bf16.mxu0 %v960_v27 }
 0x2c0   :  { %v985_v56 = vsel %vm433_vm8, %v972_v41, %v5998_v26  ;;  %v987_v6 = vsel %vm433_vm8, %v5999_v46, %v972_v41  ;;  %1092 = vmatpush1.bf16.msra.mxu0 %v959_v57 }
 0x2c1   :  { %v961_v1 = vpack.c.bf16 %v957_v7, %v953_v40  ;;  %v974_v23 = vpop.permute.xlu0 %973  ;;  %v962_v48 = vpack.c.bf16 %v958_v52, %v954_v53  ;;  %v999_v14 = vmul.f32 %v987_v6, %v6002_v19  ;;  %v1000_v33 = vmul.f32 %v985_v56, %v6003_v63 }
 0x2c2   :  { %v986_v47 = vsel %vm433_vm8, %v974_v23, %v6000_v20  ;;  %v988_v18 = vsel %vm433_vm8, %v6001_v22, %v974_v23 }
 0x2c3   :  { %v1003_v0 = vmul.f32 %v988_v18, %v6004_v15  ;;  %v1004_v35 = vmul.f32 %v986_v47, %v6005_v36  ;;  %1134 = vmatprep.subr.bf16.mxu1 %v962_v48  ;;  %v980_v16 = vpop.permute.xlu1 %979 }
 0x2c4   :  { %v983_v12 = vsel %vm433_vm8, %v5998_v26, %v980_v16  ;;  %v989_v13 = vsel %vm433_vm8, %v980_v16, %v5999_v46  ;;  %1135 = vmatpush1.bf16.msra.mxu1 %v961_v1 }
 0x2c5   :  { %v1007_v10 = vpack.c.bf16 %v1003_v0, %v999_v14  ;;  %v982_v17 = vpop.permute.xlu0 %981  ;;  %v1008_v39 = vpack.c.bf16 %v1004_v35, %v1000_v33  ;;  %v1001_v42 = vmul.f32 %v983_v12, %v6006_v2  ;;  %v1002_v25 = vmul.f32 %v989_v13, %v6007_v28  ;;  %v1601_v33 = vld [vmem:[%s5777_s7] sm:$0xff]  ;;  %v1602_v0 = vld [vmem:[%s5777_s7 + $0x8] sm:$0xff] }
 0x2c6   :  { %v984_v34 = vsel %vm433_vm8, %v6000_v20, %v982_v17  ;;  %v990_v43 = vsel %vm433_vm8, %v982_v17, %v6001_v22  ;;  %v3003_v22 = vld [vmem:[%s5776_s6 + $0x4] ss:$8 sps:$4 sm:$0xff]  }
 0x2c7   :  { %v1005_v45 = vmul.f32 %v984_v34, %v6008_v11  ;;  %v1006_v50 = vmul.f32 %v990_v43, %v6009_v5  ;;  %1093 = vmatprep.subr.bf16.mxu0 %v1008_v39 }
 0x2c8   :  { %1094 = vmatpush1.bf16.msra.mxu0 %v1007_v10 }
 0x2c9   :  { %v1009_v55 = vpack.c.bf16 %v1005_v45, %v1001_v42  ;;  %v1010_v21 = vpack.c.bf16 %v1006_v50, %v1002_v25 }
 0x2cb   :  { %1110 = vmatmul.mubr.bf16.vlgmr.msra.gmra.mrb[4].mxu0 %v3002_v51  ;;  %1136 = vmatprep.subr.bf16.mxu1 %v1010_v21 }
 0x2cc   :  { %1137 = vmatpush1.bf16.msra.mxu1 %v1009_v55  ;;  %2920 = vmatprep.mubr.msk.bf16.mxu0 %vm525_vm1, %v3003_v22 }
 0x2cf   :  { %1153 = vmatmul.mubr.bf16.vlgmr.msra.gmra.mrb[4].mxu1 %v3002_v51 }
 0x2d0   :  { %2921 = vmatprep.mubr.msk.bf16.mxu1 %vm525_vm1, %v3003_v22 }
 0x2d4   :  { %v1058_v29 = vpop.permute.xlu1 %1057 }
 0x2d6   :  { %v1063_v61 = vpop.permute.xlu0 %1062 }
 0x39e   :  { %v1111_v30 = vpop.f32.mrb[4].mxu0 }
 0x39f   :  { %v1112_v31 = vadd.f32 %v1111_v30, %v1058_v29  ;;  %v1113_v3 = vpop.f32.mrb[5].mxu0 }
 0x3a0   :  { %v1115_v59 = vpop.f32.mrb[6].mxu0  ;;  %v1114_v41 = vadd.f32 %v1113_v3, %v1058_v29 }
 0x3a1   :  { %v4313_v60 = vmax.f32 %v1112_v31, 0.0  ;;  %v1116_v57 = vadd.f32 %v1115_v59, %v1063_v61  ;;  %v1117_v62 = vpop.f32.mrb[7].mxu0  ;;  %v4533_v59 = vld [vmem:[%s5772_s1 + $0x8] sm:$0xff] }
 0x3a2   :  { %v1154_v27 = vpop.f32.mrb[4].mxu1  ;;  %v1118_v26 = vadd.f32 %v1117_v62, %v1063_v61  ;;  %v4387_v56 = vmax.f32 %v1114_v41, 0.0  ;;  %6012 = vst [vmem:[#allocation46_spill] sm:$0xff] %v4533_v59  ;;  %v4540_v62 = vld [vmem:[%s5772_s1 + $0x28] sm:$0xff]  ;;  %v4555_v41 = vld [vmem:[%s5772_s1] sm:$0xff] }
 0x3a3   :  { %v4315_v32 = vmax.f32 %v1116_v57, 0.0  ;;  %v1155_v38 = vadd.f32 %v1154_v27, %v1058_v29  ;;  %v1156_v24 = vpop.f32.mrb[5].mxu1  ;;  %1171 = vrot.lane.b32.xlu1 %v4313_v60, %s3032_s26  ;;  %6013 = vst [vmem:[#allocation43_spill] sm:$0xff] %v4540_v62 }
 0x3a4   :  { %v1158_v40 = vpop.f32.mrb[6].mxu1  ;;  %v1157_v46 = vadd.f32 %v1156_v24, %v1058_v29  ;;  %v4391_v6 = vmax.f32 %v1118_v26, 0.0 }
 0x3a5   :  { %v4319_v37 = vmax.f32 %v1155_v38, 0.0  ;;  %v1159_v53 = vadd.f32 %v1158_v40, %v1063_v61  ;;  %v1160_v58 = vpop.f32.mrb[7].mxu1  ;;  %1173 = vrot.lane.b32.xlu0 %v4315_v32, %s3032_s26  ;;  %v1201_v40 = vld [vmem:[%s5772_s1 + $0x30] sm:$0xff] }
 0x3a6   :  { %v1161_v1 = vadd.f32 %v1160_v58, %v1063_v61  ;;  %v4395_v23 = vmax.f32 %v1157_v46, 0.0  ;;  %v1198_v46 = vld [vmem:[%s5772_s1 + $0x18] sm:$0xff] }
 0x3a7   :  { %6010 = vst [vmem:[#allocation41_spill] sm:$0xff] %v4319_v37  ;;  %v4325_v49 = vmax.f32 %v1159_v53, 0.0  ;;  %1179 = vrot.lane.b32.xlu1 %v4319_v37, %s3032_s26 }
 0x3a8   :  { %6011 = vst [vmem:[#allocation44_spill] sm:$0xff] %v4395_v23  ;;  %v4399_v48 = vmax.f32 %v1161_v1, 0.0 }
 0x3a9   :  { %1181 = vrot.lane.b32.xlu0 %v4325_v49, %s3032_s26 }
 0x3ab   :  { %1219 = vrot.lane.b32.xlu1 %v4313_v60, %s3033_s25 }
 0x3ad   :  { %1221 = vrot.lane.b32.xlu0 %v4315_v32, %s3033_s25 }
 0x3af   :  { %1227 = vrot.lane.b32.xlu1 %v4319_v37, %s3033_s25 }
 0x3b1   :  { %1229 = vrot.lane.b32.xlu0 %v4325_v49, %s3033_s25 }
 0x3b3   :  { %1267 = vrot.lane.b32.xlu1 %v4313_v60, %s3034_s27 }
 0x3b5   :  { %1269 = vrot.lane.b32.xlu0 %v4315_v32, %s3034_s27 }
 0x3b7   :  { %1275 = vrot.lane.b32.xlu1 %v4319_v37, %s3034_s27 }
 0x3b9   :  { %1277 = vrot.lane.b32.xlu0 %v4325_v49, %s3034_s27 }
 0x3bb   :  { %1315 = vrot.lane.b32.xlu1 %v4313_v60, %s3035_s28 }
 0x3bd   :  { %1317 = vrot.lane.b32.xlu0 %v4315_v32, %s3035_s28 }
 0x3bf   :  { %1323 = vrot.lane.b32.xlu1 %v4319_v37, %s3035_s28 }
 0x3c1   :  { %1325 = vrot.lane.b32.xlu0 %v4325_v49, %s3035_s28 }
 0x3c3   :  { %1379 = vrot.lane.b32.xlu1 %v4319_v37, %s3036_s29 }
 0x3c5   :  { %1381 = vrot.lane.b32.xlu0 %v4325_v49, %s3036_s29 }
 0x3c7   :  { %1371 = vrot.lane.b32.xlu1 %v4313_v60, %s3036_s29 }
 0x3c9   :  { %1373 = vrot.lane.b32.xlu0 %v4315_v32, %s3036_s29 }
 0x3cb   :  { %1427 = vrot.lane.b32.xlu1 %v4319_v37, %s5933_s2 }
 0x3cd   :  { %1429 = vrot.lane.b32.xlu0 %v4325_v49, %s5933_s2 }
 0x3cf   :  { %1419 = vrot.lane.b32.xlu1 %v4313_v60, %s5933_s2 }
 0x3d1   :  { %1421 = vrot.lane.b32.xlu0 %v4315_v32, %s5933_s2 }
 0x3d3   :  { %1475 = vrot.lane.b32.xlu1 %v4319_v37, %s5934_s19 }
 0x3d5   :  { %1477 = vrot.lane.b32.xlu0 %v4325_v49, %s5934_s19 }
 0x3d7   :  { %1467 = vrot.lane.b32.xlu1 %v4313_v60, %s5934_s19 }
 0x3d9   :  { %1469 = vrot.lane.b32.xlu0 %v4315_v32, %s5934_s19 }
 0x3db   :  { %1523 = vrot.lane.b32.xlu1 %v4319_v37, %s5935_s20 }
 0x3dd   :  { %1525 = vrot.lane.b32.xlu0 %v4325_v49, %s5935_s20 }
 0x3df   :  { %1515 = vrot.lane.b32.xlu1 %v4313_v60, %s5935_s20 }
 0x3e1   :  { %1517 = vrot.lane.b32.xlu0 %v4315_v32, %s5935_s20 }
 0x3e3   :  { %1175 = vrot.lane.b32.xlu1 %v4387_v56, %s3032_s26 }
 0x3e5   :  { %1177 = vrot.lane.b32.xlu0 %v4391_v6, %s3032_s26 }
 0x3e7   :  { %1183 = vrot.lane.b32.xlu1 %v4395_v23, %s3032_s26 }
 0x3e9   :  { %1185 = vrot.lane.b32.xlu0 %v4399_v48, %s3032_s26 }
 0x3eb   :  { %1223 = vrot.lane.b32.xlu1 %v4387_v56, %s3033_s25 }
 0x3ed   :  { %1225 = vrot.lane.b32.xlu0 %v4391_v6, %s3033_s25 }
 0x3ef   :  { %1231 = vrot.lane.b32.xlu1 %v4395_v23, %s3033_s25 }
 0x3f1   :  { %1233 = vrot.lane.b32.xlu0 %v4399_v48, %s3033_s25 }
 0x3f3   :  { %1271 = vrot.lane.b32.xlu1 %v4387_v56, %s3034_s27 }
 0x3f5   :  { %1273 = vrot.lane.b32.xlu0 %v4391_v6, %s3034_s27 }
 0x3f7   :  { %1279 = vrot.lane.b32.xlu1 %v4395_v23, %s3034_s27 }
 0x3f9   :  { %1281 = vrot.lane.b32.xlu0 %v4399_v48, %s3034_s27 }
 0x3fb   :  { %1319 = vrot.lane.b32.xlu1 %v4387_v56, %s3035_s28 }
 0x3fd   :  { %1321 = vrot.lane.b32.xlu0 %v4391_v6, %s3035_s28 }
 0x3ff   :  { %1327 = vrot.lane.b32.xlu1 %v4395_v23, %s3035_s28 }
 0x401   :  { %1329 = vrot.lane.b32.xlu0 %v4399_v48, %s3035_s28 }
 0x403   :  { %1375 = vrot.lane.b32.xlu1 %v4387_v56, %s3036_s29 }
 0x405   :  { %1377 = vrot.lane.b32.xlu0 %v4391_v6, %s3036_s29 }
 0x407   :  { %1383 = vrot.lane.b32.xlu1 %v4395_v23, %s3036_s29 }
 0x409   :  { %1385 = vrot.lane.b32.xlu0 %v4399_v48, %s3036_s29 }
 0x40b   :  { %1423 = vrot.lane.b32.xlu1 %v4387_v56, %s5933_s2 }
 0x40d   :  { %1425 = vrot.lane.b32.xlu0 %v4391_v6, %s5933_s2 }
 0x40f   :  { %1431 = vrot.lane.b32.xlu1 %v4395_v23, %s5933_s2 }
 0x411   :  { %1433 = vrot.lane.b32.xlu0 %v4399_v48, %s5933_s2 }
 0x413   :  { %1471 = vrot.lane.b32.xlu1 %v4387_v56, %s5934_s19 }
 0x415   :  { %1473 = vrot.lane.b32.xlu0 %v4391_v6, %s5934_s19  ;;  %v1172_v20 = vpop.permute.xlu1 %1171 }
 0x417   :  { %v4449_v47 = vpop.permute.xlu0 %1173  ;;  %1479 = vrot.lane.b32.xlu1 %v4395_v23, %s5934_s19 }
 0x419   :  { %1481 = vrot.lane.b32.xlu0 %v4399_v48, %s5934_s19  ;;  %v1180_v18 = vpop.permute.xlu1 %1179 }
 0x41b   :  { %v1182_v19 = vpop.permute.xlu0 %1181  ;;  %1519 = vrot.lane.b32.xlu1 %v4387_v56, %s5935_s20 }
 0x41d   :  { %1521 = vrot.lane.b32.xlu0 %v4391_v6, %s5935_s20  ;;  %v4464_v14 = vpop.permute.xlu1 %1219 }
 0x41f   :  { %v4466_v63 = vpop.permute.xlu0 %1221  ;;  %1527 = vrot.lane.b32.xlu1 %v4395_v23, %s5935_s20 }
 0x421   :  { %1529 = vrot.lane.b32.xlu0 %v4399_v48, %s5935_s20  ;;  %v4475_v15 = vpop.permute.xlu1 %1227 }
 0x423   :  { %v4480_v36 = vpop.permute.xlu0 %1229  ;;  %1605 = vperm.xlu1 %2996, %v1601_v33   ;;  %v4567_v33 = vld [vmem:[%s5772_s1 + $0x20] sm:$0xff] }
 0x425   :  { %1610 = vperm.xlu0 %2995, %v1602_v0   ;;  %v4482_v35 = vpop.permute.xlu1 %1267  ;;  %v1202_v0 = vld [vmem:[%s5772_s1 + $0x38] sm:$0xff] }
 0x427   :  { %v4484_v16 = vpop.permute.xlu0 %1269 }
 0x429   :  { %v4486_v12 = vpop.permute.xlu1 %1275 }
 0x42b   :  { %v4488_v13 = vpop.permute.xlu0 %1277 }
 0x42d   :  { %v4490_v10 = vpop.permute.xlu1 %1315 }
 0x42f   :  { %v4492_v17 = vpop.permute.xlu0 %1317 }
 0x431   :  { %v4494_v39 = vpop.permute.xlu1 %1323 }
 0x433   :  { %v4496_v34 = vpop.permute.xlu0 %1325 }
 0x435   :  { %v4498_v43 = vpop.permute.xlu1 %1379 }
 0x437   :  { %v4500_v2 = vpop.permute.xlu0 %1381 }
 0x439   :  { %v4502_v42 = vpop.permute.xlu1 %1371 }
 0x43b   :  { %v4504_v28 = vpop.permute.xlu0 %1373 }
 0x43d   :  { %v4506_v25 = vpop.permute.xlu1 %1427 }
 0x43f   :  { %v4508_v11 = vpop.permute.xlu0 %1429 }
 0x441   :  { %v4510_v45 = vpop.permute.xlu1 %1419 }
 0x443   :  { %v4512_v5 = vpop.permute.xlu0 %1421 }
 0x445   :  { %v4514_v50 = vpop.permute.xlu1 %1475 }
 0x447   :  { %v4516_v51 = vpop.permute.xlu0 %1477 }
 0x449   :  { %v4518_v55 = vpop.permute.xlu1 %1467 }
 0x44b   :  { %v4520_v21 = vpop.permute.xlu0 %1469 }
 0x44d   :  { %v4522_v29 = vpop.permute.xlu1 %1523 }
 0x44f   :  { %v4524_v30 = vpop.permute.xlu0 %1525 }
 0x451   :  { %v4526_v31 = vpop.permute.xlu1 %1515 }
 0x453   :  { %v4528_v3 = vpop.permute.xlu0 %1517 }
 0x455   :  { %v1176_v61 = vpop.permute.xlu1 %1175 }
 0x456   :  { %v1191_v57 = vsel %vm82_vm0, %v1172_v20, %v1176_v61 }
 0x457   :  { %v1178_v27 = vpop.permute.xlu0 %1177  ;;  %v1204_v24 = vmul.f32 %v4533_v59, %v1191_v57  ;;  %v1197_v57 = vld [vmem:[%s5772_s1 + $0x10] sm:$0xff] }
 0x458   :  { %v1192_v38 = vsel %vm82_vm0, %v4449_v47, %v1178_v27  ;;  %v1190_v53 = vsel %vm82_vm0, %v1178_v27, %v1182_v19  ;;  %v1189_v27 = vsel %vm82_vm0, %v1176_v61, %v1180_v18 }
 0x459   :  { %v1208_v58 = vmul.f32 %v4540_v62, %v1192_v38  ;;  %v1184_v26 = vpop.permute.xlu1 %1183  ;;  %v1209_v7 = vmul.f32 %v1201_v40, %v1190_v53  ;;  %v1205_v4 = vmul.f32 %v1197_v57, %v1189_v27  ;;  %v1245_v57 = vld [vmem:[%s5772_s1 + $0x50] sm:$0xff] }
 0x45a   :  { %v1187_v1 = vsel %vm82_vm0, %v1180_v18, %v1184_v26  ;;  %v1193_v22 = vsel %vm82_vm0, %v1184_v26, %v1172_v20  ;;  %v4587_v18 = vld [vmem:[%s5772_s1 + $0x48] sm:$0xff] }
 0x45b   :  { %v1186_v38 = vpop.permute.xlu0 %1185  ;;  %v1212_v52 = vpack.c.bf16 %v1208_v58, %v1204_v24  ;;  %v1203_v8 = vmul.f32 %v4555_v41, %v1193_v22  ;;  %v1206_v54 = vmul.f32 %v1198_v46, %v1187_v1  ;;  %v1249_v46 = vld [vmem:[%s5772_s1 + $0x70] sm:$0xff] }
 0x45c   :  { %v1188_v20 = vsel %vm82_vm0, %v1182_v19, %v1186_v38  ;;  %v1194_v26 = vsel %vm82_vm0, %v1186_v38, %v4449_v47  ;;  %v4595_v47 = vld [vmem:[%s5772_s1 + $0x68] sm:$0xff] }
 0x45d   :  { %v1207_v62 = vmul.f32 %v4567_v33, %v1194_v26  ;;  %v1210_v59 = vmul.f32 %v1202_v0, %v1188_v20  ;;  %1625 = vmatprep.subr.bf16.mxu0 %v1212_v52  ;;  %v1224_v44 = vpop.permute.xlu1 %1223  ;;  %v1213_v52 = vpack.c.bf16 %v1209_v7, %v1205_v4  ;;  %v1250_v0 = vld [vmem:[%s5772_s1 + $0x78] sm:$0xff] }
 0x45e   :  { %v1239_v19 = vsel %vm131_vm2, %v4464_v14, %v1224_v44  ;;  %v1237_v27 = vsel %vm131_vm2, %v1224_v44, %v4475_v15 }
 0x45f   :  { %v1211_v61 = vpack.c.bf16 %v1207_v62, %v1203_v8  ;;  %v1226_v24 = vpop.permute.xlu0 %1225  ;;  %v1214_v40 = vpack.c.bf16 %v1210_v59, %v1206_v54  ;;  %v1252_v58 = vmul.f32 %v4587_v18, %v1239_v19  ;;  %v4611_v8 = vld [vmem:[%s5772_s1 + $0x40] sm:$0xff]  ;;  %v1246_v54 = vld [vmem:[%s5772_s1 + $0x58] sm:$0xff]  ;;  %v1253_v44 = vmul.f32 %v1245_v57, %v1237_v27 }
 0x460   :  { %v1240_v53 = vsel %vm131_vm2, %v4466_v63, %v1226_v24  ;;  %v1238_v1 = vsel %vm131_vm2, %v1226_v24, %v4480_v36  ;;  %v4625_v62 = vld [vmem:[%s5772_s1 + $0x60] sm:$0xff] }
 0x461   :  { %v1256_v22 = vmul.f32 %v4595_v47, %v1240_v53  ;;  %1626 = vmatpush1.bf16.msra.mxu0 %v1211_v61  ;;  %1668 = vmatprep.subr.bf16.mxu1 %v1214_v40  ;;  %v1232_v4 = vpop.permute.xlu1 %1231  ;;  %v1257_v20 = vmul.f32 %v1249_v46, %v1238_v1  ;;  %v4671_v57 = vld [vmem:[%s5772_s1 + $0x80] sm:$0xff] }
 0x462   :  { %v1235_v7 = vsel %vm131_vm2, %v4475_v15, %v1232_v4  ;;  %v1241_v59 = vsel %vm131_vm2, %v1232_v4, %v4464_v14  ;;  %1669 = vmatpush1.bf16.msra.mxu1 %v1213_v52  ;;  %v4647_v15 = vld [vmem:[%s5772_s1 + $0x88] sm:$0xff] }
 0x463   :  { %v1234_v38 = vpop.permute.xlu0 %1233  ;;  %v1260_v14 = vpack.c.bf16 %v1256_v22, %v1252_v58  ;;  %v1251_v61 = vmul.f32 %v4611_v8, %v1241_v59  ;;  %v1254_v24 = vmul.f32 %v1246_v54, %v1235_v7  ;;  %v1261_v22 = vpack.c.bf16 %v1257_v20, %v1253_v44  ;;  %v1297_v7 = vld [vmem:[%s5772_s1 + $0xb0] sm:$0xff] }
 0x464   :  { %v1236_v26 = vsel %vm131_vm2, %v4480_v36, %v1234_v38  ;;  %v1242_v19 = vsel %vm131_vm2, %v1234_v38, %v4466_v63  ;;  %v4655_v63 = vld [vmem:[%s5772_s1 + $0xa8] sm:$0xff]  ;;  %v1294_v38 = vld [vmem:[%s5772_s1 + $0x98] sm:$0xff] }
 0x465   :  { %v1255_v40 = vmul.f32 %v4625_v62, %v1242_v19  ;;  %v1258_v52 = vmul.f32 %v1250_v0, %v1236_v26  ;;  %1627 = vmatprep.subr.bf16.mxu0 %v1260_v14  ;;  %v1272_v53 = vpop.permute.xlu1 %1271  ;;  %v4685_v26 = vld [vmem:[%s5772_s1 + $0xa0] sm:$0xff]  ;;  %v1298_v19 = vld [vmem:[%s5772_s1 + $0xb8] sm:$0xff] }
 0x466   :  { %v1287_v36 = vsel %vm180_vm3, %v4482_v35, %v1272_v53 }
 0x467   :  { %v1259_v58 = vpack.c.bf16 %v1255_v40, %v1251_v61  ;;  %v1274_v46 = vpop.permute.xlu0 %1273  ;;  %v1262_v1 = vpack.c.bf16 %v1258_v52, %v1254_v24  ;;  %v1300_v54 = vmul.f32 %v4647_v15, %v1287_v36  ;;  %v1293_v61 = vld [vmem:[%s5772_s1 + $0x90] sm:$0xff]  ;;  %v1285_v24 = vsel %vm180_vm3, %v1272_v53, %v4486_v12  ;;  %v4707_v53 = vld [vmem:[%s5772_s1 + $0xc8] sm:$0xff] }
 0x468   :  { %v1288_v4 = vsel %vm180_vm3, %v4484_v16, %v1274_v46  ;;  %v1286_v59 = vsel %vm180_vm3, %v1274_v46, %v4488_v13 }
 0x469   :  { %v1304_v0 = vmul.f32 %v4655_v63, %v1288_v4  ;;  %1628 = vmatpush1.bf16.msra.mxu0 %v1259_v58  ;;  %1670 = vmatprep.subr.bf16.mxu1 %v1262_v1  ;;  %v1280_v27 = vpop.permute.xlu1 %1279  ;;  %v1305_v52 = vmul.f32 %v1297_v7, %v1286_v59 }
 0x46a   :  { %v1283_v14 = vsel %vm180_vm3, %v4486_v12, %v1280_v27  ;;  %v1289_v20 = vsel %vm180_vm3, %v1280_v27, %v4482_v35  ;;  %1671 = vmatpush1.bf16.msra.mxu1 %v1261_v22  ;;  %v1301_v12 = vmul.f32 %v1293_v61, %v1285_v24  ;;  %v4731_v61 = vld [vmem:[%s5772_s1 + $0xc0] sm:$0xff] }
 0x46b   :  { %v1282_v40 = vpop.permute.xlu0 %1281  ;;  %v1308_v35 = vpack.c.bf16 %v1304_v0, %v1300_v54  ;;  %v1299_v58 = vmul.f32 %v4671_v57, %v1289_v20  ;;  %v1302_v46 = vmul.f32 %v1294_v38, %v1283_v14  ;;  %v1345_v14 = vld [vmem:[%s5772_s1 + $0xf0] sm:$0xff] }
 0x46c   :  { %v1284_v44 = vsel %vm180_vm3, %v4488_v13, %v1282_v40  ;;  %v1290_v36 = vsel %vm180_vm3, %v1282_v40, %v4484_v16  ;;  %v4715_v16 = vld [vmem:[%s5772_s1 + $0xe8] sm:$0xff]  ;;  %v1309_v0 = vpack.c.bf16 %v1305_v52, %v1301_v12  ;;  %v1342_v40 = vld [vmem:[%s5772_s1 + $0xd8] sm:$0xff] }
 0x46d   :  { %v1303_v1 = vmul.f32 %v4685_v26, %v1290_v36  ;;  %v1306_v22 = vmul.f32 %v1298_v19, %v1284_v44  ;;  %1629 = vmatprep.subr.bf16.mxu0 %v1308_v35  ;;  %v1320_v4 = vpop.permute.xlu1 %1319  ;;  %v4745_v44 = vld [vmem:[%s5772_s1 + $0xe0] sm:$0xff]  ;;  %v1346_v36 = vld [vmem:[%s5772_s1 + $0xf8] sm:$0xff] }
 0x46e   :  { %v1335_v13 = vsel %vm229_vm4, %v4490_v10, %v1320_v4 }
 0x46f   :  { %v1307_v54 = vpack.c.bf16 %v1303_v1, %v1299_v58  ;;  %v1322_v7 = vpop.permute.xlu0 %1321  ;;  %v1310_v59 = vpack.c.bf16 %v1306_v22, %v1302_v46  ;;  %v1348_v38 = vmul.f32 %v4707_v53, %v1335_v13  ;;  %v1341_v58 = vld [vmem:[%s5772_s1 + $0xd0] sm:$0xff]  ;;  %v1333_v46 = vsel %vm229_vm4, %v1320_v4, %v4494_v39  ;;  %v4767_v4 = vld [vmem:[%s5772_s1 + $0x148] sm:$0xff] }
 0x470   :  { %v1336_v27 = vsel %vm229_vm4, %v4492_v17, %v1322_v7  ;;  %v1334_v20 = vsel %vm229_vm4, %v1322_v7, %v4496_v34 }
 0x471   :  { %v1352_v19 = vmul.f32 %v4715_v16, %v1336_v27  ;;  %1630 = vmatpush1.bf16.msra.mxu0 %v1307_v54  ;;  %1672 = vmatprep.subr.bf16.mxu1 %v1310_v59  ;;  %v1328_v24 = vpop.permute.xlu1 %1327  ;;  %v1353_v22 = vmul.f32 %v1345_v14, %v1334_v20 }
 0x472   :  { %v1331_v35 = vsel %vm229_vm4, %v4494_v39, %v1328_v24  ;;  %v1337_v52 = vsel %vm229_vm4, %v1328_v24, %v4490_v10  ;;  %1673 = vmatpush1.bf16.msra.mxu1 %v1309_v0  ;;  %v1349_v39 = vmul.f32 %v1341_v58, %v1333_v46 }
 0x473   :  { %v1330_v1 = vpop.permute.xlu0 %1329  ;;  %v1356_v10 = vpack.c.bf16 %v1352_v19, %v1348_v38  ;;  %v1347_v54 = vmul.f32 %v4731_v61, %v1337_v52  ;;  %v1350_v7 = vmul.f32 %v1342_v40, %v1331_v35  ;;  %v1364_v19 = vpack.c.bf16 %v4391_v6, %v4387_v56  ;;  %v4782_v40 = vld [vmem:[%s5772_s1 + $0x160] sm:$0xff] }
 0x474   :  { %v1332_v12 = vsel %vm229_vm4, %v4496_v34, %v1330_v1  ;;  %v1338_v13 = vsel %vm229_vm4, %v1330_v1, %v4492_v17  ;;  %v4775_v17 = vld [vmem:[%s5772_s1 + $0x168] sm:$0xff]  ;;  %v1357_v24 = vpack.c.bf16 %v1353_v22, %v1349_v39  ;;  %v4795_v6 = vld [vmem:[%s5772_s1 + $0x140] sm:$0xff]  ;;  %v4810_v22 = vld [vmem:[%s5772_s1 + $0x158] sm:$0xff] }
 0x475   :  { %v1351_v59 = vmul.f32 %v4745_v44, %v1338_v13  ;;  %v1354_v0 = vmul.f32 %v1346_v36, %v1332_v12  ;;  %1631 = vmatprep.subr.bf16.mxu0 %v1356_v10  ;;  %v1376_v27 = vpop.permute.xlu1 %1375  ;;  %v1366_v36 = vpack.c.bf16 %v4399_v48, %v4395_v23  ;;  %v4805_v10 = vld [vmem:[%s5772_s1 + $0x150] sm:$0xff]  ;;  %6015 = vst [vmem:[#allocation5_spill] sm:$0xff] %v4810_v22 }
 0x476   :  { %v1389_v34 = vsel %vm286_vm5, %v1376_v27, %v4498_v43  ;;  %v1391_v58 = vsel %vm286_vm5, %v4502_v42, %v1376_v27  ;;  %6014 = vst [vmem:[#allocation45_spill] sm:$0xff] %v4805_v10 }
 0x477   :  { %v1355_v38 = vpack.c.bf16 %v1351_v59, %v1347_v54  ;;  %v1378_v14 = vpop.permute.xlu0 %1377  ;;  %v1358_v20 = vpack.c.bf16 %v1354_v0, %v1350_v7  ;;  %v1404_v46 = vmul.f32 %v4767_v4, %v1389_v34  ;;  %v4821_v54 = vld [vmem:[%s5772_s1 + $0x170] sm:$0xff]  ;;  %v4826_v7 = vld [vmem:[%s5772_s1 + $0x178] sm:$0xff]  ;;  %v1403_v27 = vmul.f32 %v4795_v6, %v1391_v58  ;;  %v4870_v58 = vld [vmem:[%s5772_s1 + $0x1a8] sm:$0xff] }
 0x478   :  { %v1390_v35 = vsel %vm286_vm5, %v1378_v14, %v4500_v2  ;;  %v1392_v52 = vsel %vm286_vm5, %v4504_v28, %v1378_v14  ;;  %6016 = vst [vmem:[#allocation4_spill] sm:$0xff] %v4821_v54  ;;  %6017 = vst [vmem:[#allocation6_spill] sm:$0xff] %v4826_v7 }
 0x479   :  { %v1408_v1 = vmul.f32 %v4775_v17, %v1390_v35  ;;  %1632 = vmatpush1.bf16.msra.mxu0 %v1355_v38  ;;  %1674 = vmatprep.subr.bf16.mxu1 %v1358_v20  ;;  %v1384_v48 = vpop.permute.xlu1 %1383  ;;  %v1407_v59 = vmul.f32 %v4782_v40, %v1392_v52 }
 0x47a   :  { %v1387_v12 = vsel %vm286_vm5, %v4498_v43, %v1384_v48  ;;  %v1393_v13 = vsel %vm286_vm5, %v1384_v48, %v4502_v42  ;;  %1633 = vmatprep.subr.bf16.mxu0 %v1364_v19  ;;  %1675 = vmatpush1.bf16.msra.mxu1 %v1357_v24  ;;  %v4843_v19 = vld [vmem:[%s5772_s1 + $0x180] sm:$0xff] }
 0x47b   :  { %v1386_v0 = vpop.permute.xlu0 %1385  ;;  %1676 = vmatprep.subr.bf16.mxu1 %v1366_v36  ;;  %v1412_v43 = vpack.c.bf16 %v1408_v1, %v1404_v46  ;;  %v1405_v34 = vmul.f32 %v4805_v10, %v1387_v12  ;;  %v1406_v38 = vmul.f32 %v4810_v22, %v1393_v13  ;;  %v6019_v36 = vpack.c.bf16 %v4325_v49, %v4319_v37  ;;  %v6042_v22 = vld [vmem:[#allocation36_spill] sm:$0xff] }
 0x47c   :  { %v1388_v42 = vsel %vm286_vm5, %v4500_v2, %v1386_v0  ;;  %v1394_v39 = vsel %vm286_vm5, %v1386_v0, %v4504_v28  ;;  %v6018_v2 = vpack.c.bf16 %v4315_v32, %v4313_v60  ;;  %v4851_v28 = vld [vmem:[%s5772_s1 + $0x188] sm:$0xff]  ;;  %v4865_v32 = vld [vmem:[%s5772_s1 + $0x1a0] sm:$0xff]  ;;  %v1411_v46 = vpack.c.bf16 %v1407_v59, %v1403_v27  ;;  %v4885_v59 = vld [vmem:[%s5772_s1 + $0x190] sm:$0xff] }
 0x47d   :  { %v1409_v14 = vmul.f32 %v4821_v54, %v1388_v42  ;;  %v1410_v20 = vmul.f32 %v4826_v7, %v1394_v39  ;;  %v1424_v24 = vpop.permute.xlu1 %1423  ;;  %6020 = vst [vmem:[#allocation37_spill] sm:$0xff] %v4885_v59 }
 0x47e   :  { %1634 = vmatpush1.bf16.msra.mxu0 %v6018_v2  ;;  %v1437_v35 = vsel %vm335_vm6, %v1424_v24, %v4506_v25  ;;  %v1439_v52 = vsel %vm335_vm6, %v4510_v45, %v1424_v24  ;;  %1677 = vmatpush1.bf16.msra.mxu1 %v6019_v36  ;;  %v4906_v24 = vld [vmem:[%s5772_s1 + $0x1b8] sm:$0xff] }
 0x47f   :  { %1635 = vmatprep.subr.bf16.mxu0 %v1412_v43  ;;  %v1413_v1 = vpack.c.bf16 %v1409_v14, %v1405_v34  ;;  %v1426_v48 = vpop.permute.xlu0 %1425  ;;  %v1414_v12 = vpack.c.bf16 %v1410_v20, %v1406_v38  ;;  %v1451_v13 = vmul.f32 %v4843_v19, %v1439_v52  ;;  %v1452_v43 = vmul.f32 %v4851_v28, %v1437_v35  ;;  %v4890_v34 = vld [vmem:[%s5772_s1 + $0x198] sm:$0xff]  ;;  %v4901_v20 = vld [vmem:[%s5772_s1 + $0x1b0] sm:$0xff] }
 0x480   :  { %v1438_v49 = vsel %vm335_vm6, %v1426_v48, %v4508_v11  ;;  %v1440_v0 = vsel %vm335_vm6, %v4512_v5, %v1426_v48  ;;  %6021 = vst [vmem:[#allocation7_spill] sm:$0xff] %v4890_v34  ;;  %6022 = vst [vmem:[#allocation39_spill] sm:$0xff] %v4901_v20 }
 0x481   :  { %v1455_v42 = vmul.f32 %v4865_v32, %v1440_v0  ;;  %v1456_v39 = vmul.f32 %v4870_v58, %v1438_v49  ;;  %1678 = vmatprep.subr.bf16.mxu1 %v1414_v12  ;;  %v1432_v27 = vpop.permute.xlu1 %1431  ;;  %6023 = vst [vmem:[#allocation10_spill] sm:$0xff] %v4906_v24  ;;  %v4921_v12 = vld [vmem:[%s5772_s1 + $0x1c0] sm:$0xff] }
 0x482   :  { %1636 = vmatpush1.bf16.msra.mxu0 %v1411_v46  ;;  %v1435_v38 = vsel %vm335_vm6, %v4506_v25, %v1432_v27  ;;  %v1441_v14 = vsel %vm335_vm6, %v1432_v27, %v4510_v45  ;;  %1679 = vmatpush1.bf16.msra.mxu1 %v1413_v1  ;;  %6024 = vst [vmem:[#allocation11_spill] sm:$0xff] %v4921_v12  ;;  %v4937_v0 = vld [vmem:[%s5772_s1 + $0x1e0] sm:$0xff] }
 0x483   :  { %v1459_v2 = vpack.c.bf16 %v1455_v42, %v1451_v13  ;;  %v1434_v35 = vpop.permute.xlu0 %1433  ;;  %v1460_v52 = vpack.c.bf16 %v1456_v39, %v1452_v43  ;;  %v1453_v36 = vmul.f32 %v4885_v59, %v1435_v38  ;;  %v1454_v46 = vmul.f32 %v4890_v34, %v1441_v14  ;;  %v4942_v43 = vld [vmem:[%s5772_s1 + $0x1e8] sm:$0xff] }
 0x484   :  { %v1436_v25 = vsel %vm335_vm6, %v4508_v11, %v1434_v35  ;;  %v1442_v45 = vsel %vm335_vm6, %v1434_v35, %v4512_v5  ;;  %v4926_v11 = vld [vmem:[%s5772_s1 + $0x1c8] sm:$0xff] }
 0x485   :  { %v1457_v1 = vmul.f32 %v4901_v20, %v1436_v25  ;;  %v1458_v48 = vmul.f32 %v4906_v24, %v1442_v45  ;;  %v1472_v13 = vpop.permute.xlu1 %1471  ;;  %1637 = vmatprep.subr.bf16.mxu0 %v1460_v52  ;;  %v4957_v45 = vld [vmem:[%s5772_s1 + $0x1d0] sm:$0xff]  ;;  %v2257_v24 = vrot.slane %v4313_v60, 4 }
 0x486   :  { %v1485_v5 = vsel %vm384_vm7, %v1472_v13, %v4514_v50  ;;  %v1487_v49 = vsel %vm384_vm7, %v4518_v55, %v1472_v13  ;;  %1638 = vmatpush1.bf16.msra.mxu0 %v1459_v2  ;;  %6025 = vst [vmem:[#allocation8_spill] sm:$0xff] %v4957_v45  ;;  %v4973_v13 = vld [vmem:[%s5772_s1 + $0x1f0] sm:$0xff] }
 0x487   :  { %v1461_v42 = vpack.c.bf16 %v1457_v1, %v1453_v36  ;;  %v1474_v39 = vpop.permute.xlu0 %1473  ;;  %v1462_v27 = vpack.c.bf16 %v1458_v48, %v1454_v46  ;;  %v1499_v2 = vmul.f32 %v4921_v12, %v1487_v49  ;;  %v1500_v35 = vmul.f32 %v4926_v11, %v1485_v5  ;;  %v4962_v46 = vld [vmem:[%s5772_s1 + $0x1d8] sm:$0xff]  ;;  %6027 = vst [vmem:[#allocation47_spill] sm:$0xff] %v4973_v13 }
 0x488   :  { %v1486_v38 = vsel %vm384_vm7, %v1474_v39, %v4516_v51  ;;  %v1488_v14 = vsel %vm384_vm7, %v4520_v21, %v1474_v39  ;;  %6026 = vst [vmem:[#allocation9_spill] sm:$0xff] %v4962_v46  ;;  %v4978_v5 = vld [vmem:[%s5772_s1 + $0x1f8] sm:$0xff] }
 0x489   :  { %v1503_v52 = vmul.f32 %v4937_v0, %v1488_v14  ;;  %v1504_v25 = vmul.f32 %v4942_v43, %v1486_v38  ;;  %1680 = vmatprep.subr.bf16.mxu1 %v1462_v27  ;;  %v1480_v36 = vpop.permute.xlu1 %1479  ;;  %6028 = vst [vmem:[#allocation49_spill] sm:$0xff] %v4978_v5 }
 0x48a   :  { %v1483_v1 = vsel %vm384_vm7, %v4514_v50, %v1480_v36  ;;  %v1489_v48 = vsel %vm384_vm7, %v1480_v36, %v4518_v55  ;;  %1681 = vmatpush1.bf16.msra.mxu1 %v1461_v42 }
 0x48b   :  { %v1507_v49 = vpack.c.bf16 %v1503_v52, %v1499_v2  ;;  %v1482_v39 = vpop.permute.xlu0 %1481  ;;  %v1508_v27 = vpack.c.bf16 %v1504_v25, %v1500_v35  ;;  %v1501_v42 = vmul.f32 %v4957_v45, %v1483_v1  ;;  %v1502_v38 = vmul.f32 %v4962_v46, %v1489_v48  ;;  %v4993_v2 = vld [vmem:[%s5772_s1 + $0x200] sm:$0xff]  ;;  %v5014_v1 = vld [vmem:[%s5772_s1 + $0x228] sm:$0xff] }
 0x48c   :  { %v1484_v50 = vsel %vm384_vm7, %v4516_v51, %v1482_v39  ;;  %v1490_v55 = vsel %vm384_vm7, %v1482_v39, %v4520_v21  ;;  %6029 = vst [vmem:[#allocation15_spill] sm:$0xff] %v4993_v2  ;;  %v4998_v51 = vld [vmem:[%s5772_s1 + $0x208] sm:$0xff]  ;;  %v5009_v25 = vld [vmem:[%s5772_s1 + $0x220] sm:$0xff]  ;;  %6032 = vst [vmem:[#allocation13_spill] sm:$0xff] %v5014_v1 }
 0x48d   :  { %v1505_v14 = vmul.f32 %v4973_v13, %v1484_v50  ;;  %v1506_v36 = vmul.f32 %v4978_v5, %v1490_v55  ;;  %v1520_v35 = vpop.permute.xlu1 %1519  ;;  %1639 = vmatprep.subr.bf16.mxu0 %v1508_v27  ;;  %6030 = vst [vmem:[#allocation48_spill] sm:$0xff] %v4998_v51  ;;  %6031 = vst [vmem:[#allocation50_spill] sm:$0xff] %v5009_v25 }
 0x48e   :  { %v1533_v21 = vsel %vm433_vm8, %v1520_v35, %v4522_v29  ;;  %v1535_v52 = vsel %vm433_vm8, %v4526_v31, %v1520_v35  ;;  %1640 = vmatpush1.bf16.msra.mxu0 %v1507_v49 }
 0x48f   :  { %v1509_v48 = vpack.c.bf16 %v1505_v14, %v1501_v42  ;;  %v1522_v39 = vpop.permute.xlu0 %1521  ;;  %v1510_v27 = vpack.c.bf16 %v1506_v36, %v1502_v38  ;;  %v1547_v55 = vmul.f32 %v4993_v2, %v1535_v52  ;;  %v1548_v35 = vmul.f32 %v4998_v51, %v1533_v21  ;;  %v5029_v42 = vld [vmem:[%s5772_s1 + $0x210] sm:$0xff]  ;;  %v5034_v14 = vld [vmem:[%s5772_s1 + $0x218] sm:$0xff] }
 0x490   :  { %v1534_v50 = vsel %vm433_vm8, %v1522_v39, %v4524_v30  ;;  %v1536_v49 = vsel %vm433_vm8, %v4528_v3, %v1522_v39  ;;  %6033 = vst [vmem:[#allocation14_spill] sm:$0xff] %v5029_v42  ;;  %6034 = vst [vmem:[#allocation12_spill] sm:$0xff] %v5034_v14  ;;  %v5045_v52 = vld [vmem:[%s5772_s1 + $0x230] sm:$0xff]  ;;  %v5050_v39 = vld [vmem:[%s5772_s1 + $0x238] sm:$0xff] }
 0x491   :  { %v1551_v23 = vmul.f32 %v5009_v25, %v1536_v49  ;;  %v1552_v37 = vmul.f32 %v5014_v1, %v1534_v50  ;;  %1682 = vmatprep.subr.bf16.mxu1 %v1510_v27  ;;  %v1528_v38 = vpop.permute.xlu1 %1527  ;;  %6035 = vst [vmem:[#allocation18_spill] sm:$0xff] %v5045_v52  ;;  %6036 = vst [vmem:[#allocation19_spill] sm:$0xff] %v5050_v39  ;;  %v6050_v1 = vld [vmem:[#allocation43_spill] sm:$0xff] }
 0x492   :  { %v1531_v36 = vsel %vm433_vm8, %v4522_v29, %v1528_v38  ;;  %v1537_v21 = vsel %vm433_vm8, %v1528_v38, %v4526_v31  ;;  %1683 = vmatpush1.bf16.msra.mxu1 %v1509_v48 }
 0x493   :  { %v1555_v27 = vpack.c.bf16 %v1551_v23, %v1547_v55  ;;  %v1530_v50 = vpop.permute.xlu0 %1529  ;;  %v1556_v49 = vpack.c.bf16 %v1552_v37, %v1548_v35  ;;  %v1549_v48 = vmul.f32 %v5029_v42, %v1531_v36  ;;  %v1550_v38 = vmul.f32 %v5034_v14, %v1537_v21  ;;  %v3005_v37 = vld [vmem:[%s5776_s6] ss:$8 sps:$4 sm:$0xff]  }
 0x494   :  { %v1532_v29 = vsel %vm433_vm8, %v4524_v30, %v1530_v50  ;;  %v1538_v31 = vsel %vm433_vm8, %v1530_v50, %v4528_v3 }
 0x495   :  { %v1553_v5 = vmul.f32 %v5045_v52, %v1532_v29  ;;  %v1554_v13 = vmul.f32 %v5050_v39, %v1538_v31  ;;  %1641 = vmatprep.subr.bf16.mxu0 %v1556_v49 }
 0x496   :  { %1642 = vmatpush1.bf16.msra.mxu0 %v1555_v27 }
 0x497   :  { %v1557_v23 = vpack.c.bf16 %v1553_v5, %v1549_v48  ;;  %v1558_v30 = vpack.c.bf16 %v1554_v13, %v1550_v38 }
 0x499   :  { %1658 = vmatmul.mubr.bf16.vlgmr.msra.gmra.mrb[8].mxu0 %v3005_v37  ;;  %1684 = vmatprep.subr.bf16.mxu1 %v1558_v30 }
 0x49a   :  { %1685 = vmatpush1.bf16.msra.mxu1 %v1557_v23 }
 0x49d   :  { %1701 = vmatmul.mubr.bf16.vlgmr.msra.gmra.mrb[8].mxu1 %v3005_v37 }
 0x4a2   :  { %v1606_v3 = vpop.permute.xlu1 %1605 }
 0x4a4   :  { %v1611_v21 = vpop.permute.xlu0 %1610 }
 0x56c   :  { %v1659_v55 = vpop.f32.mrb[8].mxu0 }
 0x56d   :  { %v1660_v35 = vadd.f32 %v1659_v55, %v1606_v3  ;;  %v1661_v36 = vpop.f32.mrb[9].mxu0 }
 0x56e   :  { %v1663_v50 = vpop.f32.mrb[10].mxu0 }
 0x56f   :  { %v5065_v29 = vmax.f32 %v1660_v35, 0.0  ;;  %v1664_v49 = vadd.f32 %v1663_v50, %v1611_v21  ;;  %v1665_v31 = vpop.f32.mrb[11].mxu0 }
 0x570   :  { %v1702_v39 = vpop.f32.mrb[8].mxu1  ;;  %v1666_v30 = vadd.f32 %v1665_v31, %v1611_v21 }
 0x571   :  { %v5067_v52 = vmax.f32 %v1664_v49, 0.0  ;;  %v1704_v27 = vpop.f32.mrb[9].mxu1  ;;  %1719 = vrot.lane.b32.xlu1 %v5065_v29, %s3032_s26  ;;  %v1703_v48 = vadd.f32 %v1702_v39, %v1606_v3  ;;  %v1662_v39 = vadd.f32 %v1661_v36, %v1606_v3 }
 0x572   :  { %v1706_v13 = vpop.f32.mrb[10].mxu1  ;;  %v1705_v35 = vadd.f32 %v1704_v27, %v1606_v3  ;;  %v5119_v50 = vmax.f32 %v1666_v30, 0.0  ;;  %v5172_v3 = vld.sshfl [vmem:[%s5778_s8] sm:$0x33 pattern:$0x76325410] }
 0x573   :  { %v1708_v5 = vpop.f32.mrb[11].mxu1  ;;  %1721 = vrot.lane.b32.xlu0 %v5067_v52, %s3032_s26  ;;  %v1707_v38 = vadd.f32 %v1706_v13, %v1611_v21  ;;  %v5083_v37 = vmax.f32 %v1703_v48, 0.0  ;;  %v5115_v55 = vmax.f32 %v1662_v39, 0.0  ;;  %6041 = vst [vmem:[#allocation52_spill] sm:$0xff] %v5172_v3 }
 0x574   :  { %v1709_v49 = vadd.f32 %v1708_v5, %v1611_v21  ;;  %v5123_v36 = vmax.f32 %v1705_v35, 0.0  ;;  %v2162_v21 = vcombine.high %v5172_v3, %v5172_v3  ;;  %v2148_v5 = vld [vmem:[%s5779_s9] sm:$0xf] }
 0x575   :  { %1767 = vrot.lane.b32.xlu1 %v5065_v29, %s3033_s25  ;;  %6037 = vst [vmem:[#allocation16_spill] sm:$0xff] %v5083_v37  ;;  %v5087_v23 = vmax.f32 %v1707_v38, 0.0 }
 0x576   :  { %6039 = vst [vmem:[#allocation51_spill] sm:$0xff] %v5123_v36  ;;  %v5127_v31 = vmax.f32 %v1709_v49, 0.0  ;;  %2923 = vmatprep.mubr.msk.bf16.mxu0 %vm525_vm1, %v2162_v21  ;;  %2924 = vmatprep.mubr.msk.bf16.mxu1 %vm525_vm1, %v2162_v21 }
 0x577   :  { %1769 = vrot.lane.b32.xlu0 %v5067_v52, %s3033_s25  ;;  %6038 = vst [vmem:[#allocation17_spill] sm:$0xff] %v5087_v23 }
 0x578   :  { %6040 = vst [vmem:[#allocation53_spill] sm:$0xff] %v5127_v31 }
 0x579   :  { %1815 = vrot.lane.b32.xlu1 %v5065_v29, %s3034_s27 }
 0x57b   :  { %1817 = vrot.lane.b32.xlu0 %v5067_v52, %s3034_s27 }
 0x57d   :  { %1863 = vrot.lane.b32.xlu1 %v5065_v29, %s3035_s28 }
 0x57f   :  { %1865 = vrot.lane.b32.xlu0 %v5067_v52, %s3035_s28 }
 0x581   :  { %1927 = vrot.lane.b32.xlu1 %v5083_v37, %s3036_s29 }
 0x583   :  { %1929 = vrot.lane.b32.xlu0 %v5087_v23, %s3036_s29 }
 0x585   :  { %1919 = vrot.lane.b32.xlu1 %v5065_v29, %s3036_s29 }
 0x587   :  { %1921 = vrot.lane.b32.xlu0 %v5067_v52, %s3036_s29 }
 0x589   :  { %1975 = vrot.lane.b32.xlu1 %v5083_v37, %s5933_s2 }
 0x58b   :  { %1977 = vrot.lane.b32.xlu0 %v5087_v23, %s5933_s2 }
 0x58d   :  { %1967 = vrot.lane.b32.xlu1 %v5065_v29, %s5933_s2 }
 0x58f   :  { %1969 = vrot.lane.b32.xlu0 %v5067_v52, %s5933_s2 }
 0x591   :  { %2023 = vrot.lane.b32.xlu1 %v5083_v37, %s5934_s19 }
 0x593   :  { %2025 = vrot.lane.b32.xlu0 %v5087_v23, %s5934_s19 }
 0x595   :  { %2015 = vrot.lane.b32.xlu1 %v5065_v29, %s5934_s19 }
 0x597   :  { %2017 = vrot.lane.b32.xlu0 %v5067_v52, %s5934_s19 }
 0x599   :  { %2071 = vrot.lane.b32.xlu1 %v5083_v37, %s5935_s20 }
 0x59b   :  { %2073 = vrot.lane.b32.xlu0 %v5087_v23, %s5935_s20 }
 0x59d   :  { %1723 = vrot.lane.b32.xlu1 %v5115_v55, %s3032_s26 }
 0x59f   :  { %1725 = vrot.lane.b32.xlu0 %v5119_v50, %s3032_s26 }
 0x5a1   :  { %1731 = vrot.lane.b32.xlu1 %v5123_v36, %s3032_s26 }
 0x5a3   :  { %1733 = vrot.lane.b32.xlu0 %v5127_v31, %s3032_s26 }
 0x5a5   :  { %1771 = vrot.lane.b32.xlu1 %v5115_v55, %s3033_s25 }
 0x5a7   :  { %1773 = vrot.lane.b32.xlu0 %v5119_v50, %s3033_s25 }
 0x5a9   :  { %1779 = vrot.lane.b32.xlu1 %v5123_v36, %s3033_s25 }
 0x5ab   :  { %1781 = vrot.lane.b32.xlu0 %v5127_v31, %s3033_s25 }
 0x5ad   :  { %1819 = vrot.lane.b32.xlu1 %v5115_v55, %s3034_s27 }
 0x5af   :  { %1821 = vrot.lane.b32.xlu0 %v5119_v50, %s3034_s27 }
 0x5b1   :  { %1827 = vrot.lane.b32.xlu1 %v5123_v36, %s3034_s27 }
 0x5b3   :  { %1829 = vrot.lane.b32.xlu0 %v5127_v31, %s3034_s27 }
 0x5b5   :  { %1867 = vrot.lane.b32.xlu1 %v5115_v55, %s3035_s28 }
 0x5b7   :  { %1869 = vrot.lane.b32.xlu0 %v5119_v50, %s3035_s28 }
 0x5b9   :  { %1875 = vrot.lane.b32.xlu1 %v5123_v36, %s3035_s28 }
 0x5bb   :  { %1877 = vrot.lane.b32.xlu0 %v5127_v31, %s3035_s28 }
 0x5bd   :  { %1923 = vrot.lane.b32.xlu1 %v5115_v55, %s3036_s29 }
 0x5bf   :  { %1925 = vrot.lane.b32.xlu0 %v5119_v50, %s3036_s29 }
 0x5c1   :  { %1971 = vrot.lane.b32.xlu1 %v5115_v55, %s5933_s2 }
 0x5c3   :  { %1973 = vrot.lane.b32.xlu0 %v5119_v50, %s5933_s2 }
 0x5c5   :  { %2019 = vrot.lane.b32.xlu1 %v5115_v55, %s5934_s19 }
 0x5c7   :  { %2021 = vrot.lane.b32.xlu0 %v5119_v50, %s5934_s19 }
 0x5c9   :  { %2067 = vrot.lane.b32.xlu1 %v5115_v55, %s5935_s20 }
 0x5cb   :  { %2069 = vrot.lane.b32.xlu0 %v5119_v50, %s5935_s20 }
 0x5cd   :  { %2063 = vrot.lane.b32.xlu1 %v5065_v29, %s5935_s20 }
 0x5cf   :  { %2065 = vrot.lane.b32.xlu0 %v5067_v52, %s5935_s20 }
 0x5d1   :  { %1727 = vrot.lane.b32.xlu1 %v5083_v37, %s3032_s26 }
 0x5d3   :  { %1729 = vrot.lane.b32.xlu0 %v5087_v23, %s3032_s26 }
 0x5d5   :  { %1775 = vrot.lane.b32.xlu1 %v5083_v37, %s3033_s25 }
 0x5d7   :  { %1777 = vrot.lane.b32.xlu0 %v5087_v23, %s3033_s25 }
 0x5d9   :  { %1823 = vrot.lane.b32.xlu1 %v5083_v37, %s3034_s27 }
 0x5db   :  { %1825 = vrot.lane.b32.xlu0 %v5087_v23, %s3034_s27 }
 0x5dd   :  { %1871 = vrot.lane.b32.xlu1 %v5083_v37, %s3035_s28 }
 0x5df   :  { %1873 = vrot.lane.b32.xlu0 %v5087_v23, %s3035_s28  ;;  %v2258_v23 = vrot.slane %v4387_v56, 4 }
 0x5e1   :  { %1931 = vrot.lane.b32.xlu1 %v5123_v36, %s3036_s29 }
 0x5e3   :  { %1933 = vrot.lane.b32.xlu0 %v5127_v31, %s3036_s29  ;;  %v1720_v27 = vpop.permute.xlu1 %1719 }
 0x5e5   :  { %v1722_v13 = vpop.permute.xlu0 %1721  ;;  %1979 = vrot.lane.b32.xlu1 %v5123_v36, %s5933_s2 }
 0x5e7   :  { %1981 = vrot.lane.b32.xlu0 %v5127_v31, %s5933_s2  ;;  %v1768_v48 = vpop.permute.xlu1 %1767 }
 0x5e9   :  { %v1770_v38 = vpop.permute.xlu0 %1769  ;;  %2151 = vperm.xlu1 %2996, %v2148_v5  }
 0x5eb   :  { %2027 = vrot.lane.b32.xlu0 %v5123_v36, %s5934_s19  ;;  %v5215_v39 = vpop.permute.xlu1 %1815 }
 0x5ed   :  { %v5217_v30 = vpop.permute.xlu0 %1817  ;;  %2029 = vrot.lane.b32.xlu1 %v5127_v31, %s5934_s19 }
 0x5ef   :  { %2075 = vrot.lane.b32.xlu0 %v5123_v36, %s5935_s20  ;;  %v5223_v35 = vpop.permute.xlu1 %1863  ;;  %v6044_v36 = vld [vmem:[#allocation40_spill] sm:$0xff] }
 0x5f0   :  { %v5261_v7 = vsel %vm2277_vm9, %v6044_v36, %v2258_v23  ;;  %v6049_v23 = vld [vmem:[#allocation46_spill] sm:$0xff] }
 0x5f1   :  { %v5225_v49 = vpop.permute.xlu0 %1865  ;;  %2077 = vrot.lane.b32.xlu1 %v5127_v31, %s5935_s20  ;;  %v5257_v31 = vsel %vm2277_vm9, %v6042_v22, %v2257_v24  ;;  %6045 = vst [vmem:[#allocation23_spill] sm:$0xff] %v5261_v7 }
 0x5f2   :  { %6043 = vst [vmem:[#allocation54_spill] sm:$0xff] %v5257_v31  ;;  %v2286_v60 = vadd.f32 %v5261_v7, %v5257_v31 }
 0x5f3   :  { %v5229_v21 = vpop.permute.xlu1 %1927 }
 0x5f5   :  { %v5231_v5 = vpop.permute.xlu0 %1929 }
 0x5f7   :  { %v5233_v14 = vpop.permute.xlu1 %1919 }
 0x5f9   :  { %v5235_v42 = vpop.permute.xlu0 %1921  ;;  %v6081_v9 = vld [vmem:[#allocation54_spill] sm:$0xff] }
 0x5fb   :  { %v5237_v46 = vpop.permute.xlu1 %1975 }
 0x5fd   :  { %v5239_v45 = vpop.permute.xlu0 %1977 }
 0x5ff   :  { %v5241_v59 = vpop.permute.xlu1 %1967 }
 0x601   :  { %v5243_v20 = vpop.permute.xlu0 %1969 }
 0x603   :  { %v5245_v34 = vpop.permute.xlu1 %2023 }
 0x605   :  { %v5247_v10 = vpop.permute.xlu0 %2025 }
 0x607   :  { %v5251_v37 = vpop.permute.xlu1 %2015 }
 0x609   :  { %v5253_v54 = vpop.permute.xlu0 %2017 }
 0x60b   :  { %v5263_v3 = vpop.permute.xlu1 %2071 }
 0x60d   :  { %v5267_v25 = vpop.permute.xlu0 %2073 }
 0x60e   :  { %6046 = vst [vmem:[#allocation21_spill] sm:$0xff] %v5267_v25  ;;  %2287 = vadd.xlane.f32.xlu0 %v2286_v60 }
 0x60f   :  { %v5269_v56 = vpop.permute.xlu1 %1723 }
 0x610   :  { %6047 = vst [vmem:[#allocation22_spill] sm:$0xff] %v5269_v56  ;;  %v1739_v2 = vsel %vm82_vm0, %v1720_v27, %v5269_v56 }
 0x611   :  { %v5274_v22 = vpop.permute.xlu0 %1725  ;;  %v1752_v36 = vmul.f32 %v1739_v2, %v6049_v23 }
 0x612   :  { %6048 = vst [vmem:[#allocation20_spill] sm:$0xff] %v5274_v22  ;;  %v1740_v24 = vsel %vm82_vm0, %v1722_v13, %v5274_v22 }
 0x613   :  { %v1756_v51 = vmul.f32 %v1740_v24, %v6050_v1  ;;  %v5281_v7 = vpop.permute.xlu1 %1731 }
 0x614   :  { %v1741_v60 = vsel %vm82_vm0, %v5281_v7, %v1720_v27 }
 0x615   :  { %v5286_v31 = vpop.permute.xlu0 %1733  ;;  %v1760_v12 = vpack.c.bf16 %v1756_v51, %v1752_v36  ;;  %v1751_v25 = vmul.f32 %v1741_v60, %v4555_v41 }
 0x616   :  { %v1742_v56 = vsel %vm82_vm0, %v5286_v31, %v1722_v13 }
 0x617   :  { %v1755_v22 = vmul.f32 %v1742_v56, %v4567_v33  ;;  %2167 = vmatprep.subr.bf16.mxu0 %v1760_v12  ;;  %v5293_v2 = vpop.permute.xlu1 %1771 }
 0x618   :  { %v1787_v1 = vsel %vm131_vm2, %v1768_v48, %v5293_v2 }
 0x619   :  { %v1759_v24 = vpack.c.bf16 %v1755_v22, %v1751_v25  ;;  %v5298_v27 = vpop.permute.xlu0 %1773  ;;  %v1800_v13 = vmul.f32 %v1787_v1, %v4587_v18 }
 0x61a   :  { %v1788_v51 = vsel %vm131_vm2, %v1770_v38, %v5298_v27 }
 0x61b   :  { %v1804_v41 = vmul.f32 %v1788_v51, %v4595_v47  ;;  %2168 = vmatpush1.bf16.msra.mxu0 %v1759_v24  ;;  %v5305_v33 = vpop.permute.xlu1 %1779 }
 0x61c   :  { %v1789_v12 = vsel %vm131_vm2, %v5305_v33, %v1768_v48 }
 0x61d   :  { %v5310_v56 = vpop.permute.xlu0 %1781  ;;  %v1808_v25 = vpack.c.bf16 %v1804_v41, %v1800_v13  ;;  %v1799_v23 = vmul.f32 %v1789_v12, %v4611_v8 }
 0x61e   :  { %v1790_v22 = vsel %vm131_vm2, %v5310_v56, %v1770_v38 }
 0x61f   :  { %v1803_v18 = vmul.f32 %v1790_v22, %v4625_v62  ;;  %2169 = vmatprep.subr.bf16.mxu0 %v1808_v25  ;;  %v5317_v47 = vpop.permute.xlu1 %1819 }
 0x620   :  { %v1835_v36 = vsel %vm180_vm3, %v5215_v39, %v5317_v47 }
 0x621   :  { %v1807_v48 = vpack.c.bf16 %v1803_v18, %v1799_v23  ;;  %v5323_v60 = vpop.permute.xlu0 %1821  ;;  %v1848_v8 = vmul.f32 %v1835_v36, %v4647_v15 }
 0x622   :  { %v1836_v38 = vsel %vm180_vm3, %v5217_v30, %v5323_v60 }
 0x623   :  { %v1852_v62 = vmul.f32 %v1836_v38, %v4655_v63  ;;  %2170 = vmatpush1.bf16.msra.mxu0 %v1807_v48  ;;  %v5331_v1 = vpop.permute.xlu1 %1827 }
 0x624   :  { %v1837_v24 = vsel %vm180_vm3, %v5331_v1, %v5215_v39 }
 0x625   :  { %v5337_v51 = vpop.permute.xlu0 %1829  ;;  %v1856_v13 = vpack.c.bf16 %v1852_v62, %v1848_v8  ;;  %v1847_v15 = vmul.f32 %v1837_v24, %v4671_v57 }
 0x626   :  { %v1838_v41 = vsel %vm180_vm3, %v5337_v51, %v5217_v30 }
 0x627   :  { %v1851_v63 = vmul.f32 %v1838_v41, %v4685_v26  ;;  %2171 = vmatprep.subr.bf16.mxu0 %v1856_v13  ;;  %v5345_v12 = vpop.permute.xlu1 %1867 }
 0x628   :  { %v1883_v39 = vsel %vm229_vm4, %v5223_v35, %v5345_v12 }
 0x629   :  { %v1855_v25 = vpack.c.bf16 %v1851_v63, %v1847_v15  ;;  %v5351_v22 = vpop.permute.xlu0 %1869  ;;  %v1896_v57 = vmul.f32 %v1883_v39, %v4707_v53 }
 0x62a   :  { %v1884_v30 = vsel %vm229_vm4, %v5225_v49, %v5351_v22 }
 0x62b   :  { %v1900_v26 = vmul.f32 %v1884_v30, %v4715_v16  ;;  %2172 = vmatpush1.bf16.msra.mxu0 %v1855_v25  ;;  %v5359_v23 = vpop.permute.xlu1 %1875 }
 0x62c   :  { %v1885_v18 = vsel %vm229_vm4, %v5359_v23, %v5223_v35 }
 0x62d   :  { %v5365_v36 = vpop.permute.xlu0 %1877  ;;  %v1904_v48 = vpack.c.bf16 %v1900_v26, %v1896_v57  ;;  %v1895_v53 = vmul.f32 %v1885_v18, %v4731_v61  ;;  %v1912_v61 = vpack.c.bf16 %v5119_v50, %v5115_v55  ;;  %v1911_v50 = vpack.c.bf16 %v5067_v52, %v5065_v29 }
 0x62e   :  { %v1886_v38 = vsel %vm229_vm4, %v5365_v36, %v5225_v49 }
 0x62f   :  { %v1899_v16 = vmul.f32 %v1886_v38, %v4745_v44  ;;  %2173 = vmatprep.subr.bf16.mxu0 %v1904_v48  ;;  %v1924_v8 = vpop.permute.xlu1 %1923 }
 0x630   :  { %v1937_v62 = vsel %vm286_vm5, %v1924_v8, %v5229_v21  ;;  %v1939_v63 = vsel %vm286_vm5, %v5233_v14, %v1924_v8 }
 0x631   :  { %v1903_v24 = vpack.c.bf16 %v1899_v16, %v1895_v53  ;;  %v1926_v35 = vpop.permute.xlu0 %1925  ;;  %v1952_v44 = vmul.f32 %v1937_v62, %v4767_v4  ;;  %v1951_v26 = vmul.f32 %v1939_v63, %v4795_v6 }
 0x632   :  { %v1938_v13 = vsel %vm286_vm5, %v1926_v35, %v5231_v5  ;;  %v1940_v49 = vsel %vm286_vm5, %v5235_v42, %v1926_v35 }
 0x633   :  { %v1956_v41 = vmul.f32 %v1938_v13, %v4775_v17  ;;  %2174 = vmatpush1.bf16.msra.mxu0 %v1903_v24  ;;  %v1972_v15 = vpop.permute.xlu1 %1971  ;;  %v1955_v25 = vmul.f32 %v1940_v49, %v4782_v40 }
 0x634   :  { %v1985_v39 = vsel %vm335_vm6, %v1972_v15, %v5237_v46  ;;  %2175 = vmatprep.subr.bf16.mxu0 %v1912_v61  ;;  %v1987_v52 = vsel %vm335_vm6, %v5241_v59, %v1972_v15  ;;  %v6051_v15 = vld [vmem:[#allocation21_spill] sm:$0xff] }
 0x635   :  { %v1974_v30 = vpop.permute.xlu0 %1973  ;;  %v1960_v4 = vpack.c.bf16 %v1956_v41, %v1952_v44  ;;  %v2000_v18 = vmul.f32 %v1985_v39, %v4851_v28  ;;  %v1959_v53 = vpack.c.bf16 %v1955_v25, %v1951_v26  ;;  %v1999_v62 = vmul.f32 %v1987_v52, %v4843_v19  ;;  %v6053_v39 = vld [vmem:[#allocation48_spill] sm:$0xff]  ;;  %v6056_v52 = vld [vmem:[#allocation50_spill] sm:$0xff] }
 0x636   :  { %v1986_v17 = vsel %vm335_vm6, %v1974_v30, %v5239_v45  ;;  %v1988_v57 = vsel %vm335_vm6, %v5243_v20, %v1974_v30  ;;  %v6054_v30 = vld [vmem:[#allocation13_spill] sm:$0xff] }
 0x637   :  { %v2004_v48 = vmul.f32 %v1986_v17, %v4870_v58  ;;  %v2020_v40 = vpop.permute.xlu1 %2019  ;;  %2176 = vmatpush1.bf16.msra.mxu0 %v1911_v50  ;;  %v2003_v16 = vmul.f32 %v1988_v57, %v4865_v32 }
 0x638   :  { %v2033_v38 = vsel %vm384_vm7, %v2020_v40, %v5245_v34  ;;  %2177 = vmatprep.subr.bf16.mxu0 %v1960_v4  ;;  %v2035_v32 = vsel %vm384_vm7, %v5251_v37, %v2020_v40 }
 0x639   :  { %v2022_v8 = vpop.permute.xlu0 %2021  ;;  %v2008_v6 = vpack.c.bf16 %v2004_v48, %v2000_v18  ;;  %v2048_v24 = vmul.f32 %v2033_v38, %v4926_v11  ;;  %v2007_v61 = vpack.c.bf16 %v2003_v16, %v1999_v62  ;;  %v6055_v48 = vld [vmem:[#allocation15_spill] sm:$0xff]  ;;  %v1749_v62 = vld [vmem:[%s5772_s1 + $0x30] sm:$0xff] }
 0x63a   :  { %v2034_v28 = vsel %vm384_vm7, %v2022_v8, %v5247_v10  ;;  %v2036_v58 = vsel %vm384_vm7, %v5253_v54, %v2022_v8  ;;  %v1746_v8 = vld [vmem:[%s5772_s1 + $0x18] sm:$0xff] }
 0x63b   :  { %v2052_v35 = vmul.f32 %v2034_v28, %v4942_v43  ;;  %v2068_v13 = vpop.permute.xlu1 %2067  ;;  %2178 = vmatpush1.bf16.msra.mxu0 %v1959_v53  ;;  %v2051_v44 = vmul.f32 %v2036_v58, %v4937_v0  ;;  %v6052_v43 = vld [vmem:[#allocation11_spill] sm:$0xff]  ;;  %v1745_v53 = vld [vmem:[%s5772_s1 + $0x10] sm:$0xff] }
 0x63c   :  { %v2081_v49 = vsel %vm433_vm8, %v2068_v13, %v5263_v3  ;;  %2179 = vmatprep.subr.bf16.mxu0 %v2008_v6  ;;  %v2047_v63 = vmul.f32 %v2035_v32, %v6052_v43  ;;  %v6057_v28 = vld [vmem:[#allocation22_spill] sm:$0xff] }
 0x63d   :  { %v2070_v41 = vpop.permute.xlu0 %2069  ;;  %v2056_v19 = vpack.c.bf16 %v2052_v35, %v2048_v24  ;;  %v2096_v25 = vmul.f32 %v2081_v49, %v6053_v39  ;;  %v1750_v24 = vld [vmem:[%s5772_s1 + $0x38] sm:$0xff] }
 0x63e   :  { %v2082_v11 = vsel %vm433_vm8, %v2070_v41, %v6051_v15  ;;  %v2055_v0 = vpack.c.bf16 %v2051_v44, %v2047_v63  ;;  %v1794_v63 = vld [vmem:[%s5772_s1 + $0x58] sm:$0xff] }
 0x63f   :  { %v2100_v50 = vmul.f32 %v2082_v11, %v6054_v30  ;;  %v5433_v4 = vpop.permute.xlu1 %2063  ;;  %2180 = vmatpush1.bf16.msra.mxu0 %v2007_v61  ;;  %v1793_v11 = vld [vmem:[%s5772_s1 + $0x50] sm:$0xff]  ;;  %v1798_v30 = vld [vmem:[%s5772_s1 + $0x78] sm:$0xff] }
 0x640   :  { %v2083_v17 = vsel %vm433_vm8, %v5433_v4, %v2068_v13  ;;  %2181 = vmatprep.subr.bf16.mxu0 %v2056_v19 }
 0x641   :  { %v5438_v57 = vpop.permute.xlu0 %2065  ;;  %v2104_v26 = vpack.c.bf16 %v2100_v50, %v2096_v25  ;;  %v2095_v40 = vmul.f32 %v2083_v17, %v6055_v48  ;;  %v1797_v25 = vld [vmem:[%s5772_s1 + $0x70] sm:$0xff] }
 0x642   :  { %v2084_v18 = vsel %vm433_vm8, %v5438_v57, %v2070_v41 }
 0x643   :  { %v2099_v38 = vmul.f32 %v2084_v18, %v6056_v52  ;;  %v1728_v16 = vpop.permute.xlu1 %1727  ;;  %2182 = vmatpush1.bf16.msra.mxu0 %v2055_v0  ;;  %v6059_v18 = vld [vmem:[#allocation52_spill] sm:$0xff] }
 0x644   :  { %v1735_v6 = vsel %vm82_vm0, %v1728_v16, %v5281_v7  ;;  %v1737_v58 = vsel %vm82_vm0, %v6057_v28, %v1728_v16  ;;  %2183 = vmatprep.subr.bf16.mxu0 %v2104_v26  ;;  %v6058_v7 = vld [vmem:[#allocation20_spill] sm:$0xff]  ;;  %v6060_v16 = vmov 0   ;;  %v1846_v28 = vld [vmem:[%s5772_s1 + $0xb8] sm:$0xff] }
 0x645   :  { %v2103_v35 = vpack.c.bf16 %v2099_v38, %v2095_v40  ;;  %v1730_v13 = vpop.permute.xlu0 %1729  ;;  %v1753_v61 = vmul.f32 %v1745_v53, %v1737_v58  ;;  %v1754_v44 = vmul.f32 %v1746_v8, %v1735_v6  ;;  %v1841_v38 = vld [vmem:[%s5772_s1 + $0x90] sm:$0xff] }
 0x646   :  { %v1736_v32 = vsel %vm82_vm0, %v1730_v13, %v5286_v31  ;;  %v1738_v49 = vsel %vm82_vm0, %v6058_v7, %v1730_v13  ;;  %v1845_v6 = vld [vmem:[%s5772_s1 + $0xb0] sm:$0xff] }
 0x647   :  { %v1757_v41 = vmul.f32 %v1749_v62, %v1738_v49  ;;  %v1758_v19 = vmul.f32 %v1750_v24, %v1736_v32  ;;  %v1776_v43 = vpop.permute.xlu1 %1775  ;;  %2184 = vmatpush1.bf16.msra.mxu0 %v2103_v35  ;;  %v1889_v49 = vld [vmem:[%s5772_s1 + $0xd0] sm:$0xff] }
 0x648   :  { %v1783_v31 = vsel %vm131_vm2, %v1776_v43, %v5305_v33  ;;  %v1785_v39 = vsel %vm131_vm2, %v5293_v2, %v1776_v43 }
 0x649   :  { %v1761_v50 = vpack.c.bf16 %v1757_v41, %v1753_v61  ;;  %v1778_v17 = vpop.permute.xlu0 %1777  ;;  %v1762_v0 = vpack.c.bf16 %v1758_v19, %v1754_v44  ;;  %v1801_v26 = vmul.f32 %v1793_v11, %v1785_v39  ;;  %v1802_v48 = vmul.f32 %v1794_v63, %v1783_v31  ;;  %v1890_v44 = vld [vmem:[%s5772_s1 + $0xd8] sm:$0xff]  ;;  %v1893_v41 = vld [vmem:[%s5772_s1 + $0xf0] sm:$0xff] }
 0x64a   :  { %v1784_v33 = vsel %vm131_vm2, %v1778_v17, %v5310_v56  ;;  %v1786_v2 = vsel %vm131_vm2, %v5298_v27, %v1778_v17  ;;  %2200 = vmatmul.mubr.bf16.vlgmr.msra.gmra.mrb[12].mxu0 %v6059_v18  ;;  %v1842_v56 = vld [vmem:[%s5772_s1 + $0x98] sm:$0xff] }
 0x64b   :  { %v1805_v40 = vmul.f32 %v1797_v25, %v1786_v2  ;;  %v1806_v52 = vmul.f32 %v1798_v30, %v1784_v33  ;;  %2208 = vmatprep.subr.bf16.mxu1 %v1762_v0  ;;  %v1824_v53 = vpop.permute.xlu1 %1823  ;;  %2574 = vmatprep.mubr.bf16.mxu0 %v6060_v16  ;;  %v1894_v19 = vld [vmem:[%s5772_s1 + $0xf8] sm:$0xff] }
 0x64c   :  { %v1831_v27 = vsel %vm180_vm3, %v1824_v53, %v5331_v1  ;;  %v1833_v8 = vsel %vm180_vm3, %v5317_v47, %v1824_v53  ;;  %2209 = vmatpush1.bf16.msra.mxu1 %v1761_v50  ;;  %v6061_v2 = vld [vmem:[#allocation6_spill] sm:$0xff] }
 0x64d   :  { %v1809_v58 = vpack.c.bf16 %v1805_v40, %v1801_v26  ;;  %v1826_v62 = vpop.permute.xlu0 %1825  ;;  %v1810_v24 = vpack.c.bf16 %v1806_v52, %v1802_v48  ;;  %v1849_v35 = vmul.f32 %v1841_v38, %v1833_v8  ;;  %v1850_v13 = vmul.f32 %v1842_v56, %v1831_v27  ;;  %v6062_v52 = vld [vmem:[#allocation51_spill] sm:$0xff]  ;;  %v6063_v38 = vld [vmem:[#allocation53_spill] sm:$0xff] }
 0x64e   :  { %v1832_v1 = vsel %vm180_vm3, %v1826_v62, %v5337_v51  ;;  %v1834_v47 = vsel %vm180_vm3, %v5323_v60, %v1826_v62  ;;  %v1914_v53 = vpack.c.bf16 %v6063_v38, %v6062_v52  ;;  %v6064_v56 = vld [vmem:[#allocation5_spill] sm:$0xff]  ;;  %v6078_v38 = vld [vmem:[#allocation12_spill] sm:$0xff] }
 0x64f   :  { %v1853_v32 = vmul.f32 %v1845_v6, %v1834_v47  ;;  %v1854_v7 = vmul.f32 %v1846_v28, %v1832_v1  ;;  %2210 = vmatprep.subr.bf16.mxu1 %v1810_v24  ;;  %v1872_v61 = vpop.permute.xlu1 %1871  ;;  %v6067_v62 = vld [vmem:[#allocation17_spill] sm:$0xff]  ;;  %v6068_v1 = vld [vmem:[#allocation10_spill] sm:$0xff] }
 0x650   :  { %v1879_v51 = vsel %vm229_vm4, %v1872_v61, %v5359_v23  ;;  %v1881_v60 = vsel %vm229_vm4, %v5345_v12, %v1872_v61  ;;  %2211 = vmatpush1.bf16.msra.mxu1 %v1809_v58  ;;  %v6066_v58 = vld [vmem:[#allocation16_spill] sm:$0xff]  ;;  %v6071_v61 = vld [vmem:[#allocation39_spill] sm:$0xff] }
 0x651   :  { %v1857_v11 = vpack.c.bf16 %v1853_v32, %v1849_v35  ;;  %v1874_v43 = vpop.permute.xlu0 %1873  ;;  %v1858_v63 = vpack.c.bf16 %v1854_v7, %v1850_v13  ;;  %v1897_v31 = vmul.f32 %v1889_v49, %v1881_v60  ;;  %v1898_v39 = vmul.f32 %v1890_v44, %v1879_v51  ;;  %v6069_v13 = vld [vmem:[#allocation45_spill] sm:$0xff]  ;;  %v6070_v7 = vld [vmem:[#allocation7_spill] sm:$0xff] }
 0x652   :  { %v1880_v23 = vsel %vm229_vm4, %v1874_v43, %v5365_v36  ;;  %v1882_v12 = vsel %vm229_vm4, %v5351_v22, %v1874_v43  ;;  %v1913_v24 = vpack.c.bf16 %v6067_v62, %v6066_v58  ;;  %v6072_v60 = vld [vmem:[#allocation37_spill] sm:$0xff] }
 0x653   :  { %v1901_v25 = vmul.f32 %v1893_v41, %v1882_v12  ;;  %v1902_v30 = vmul.f32 %v1894_v19, %v1880_v23  ;;  %2212 = vmatprep.subr.bf16.mxu1 %v1858_v63  ;;  %v1932_v50 = vpop.permute.xlu1 %1931 }
 0x654   :  { %2213 = vmatpush1.bf16.msra.mxu1 %v1857_v11  ;;  %v1941_v33 = vsel %vm286_vm5, %v1932_v50, %v5233_v14  ;;  %v1935_v14 = vsel %vm286_vm5, %v5229_v21, %v1932_v50 }
 0x655   :  { %v1905_v17 = vpack.c.bf16 %v1901_v25, %v1897_v31  ;;  %v1934_v0 = vpop.permute.xlu0 %1933  ;;  %v1906_v26 = vpack.c.bf16 %v1902_v30, %v1898_v39  ;;  %v1954_v27 = vmul.f32 %v1941_v33, %v6064_v56  ;;  %v1953_v32 = vmul.f32 %v1935_v14, %v6069_v13  ;;  %v6073_v39 = vld [vmem:[#allocation8_spill] sm:$0xff]  ;;  %v6074_v30 = vld [vmem:[#allocation9_spill] sm:$0xff]  ;;  %v6080_v56 = vld [vmem:[#allocation19_spill] sm:$0xff] }
 0x656   :  { %v1942_v36 = vsel %vm286_vm5, %v1934_v0, %v5235_v42  ;;  %v1936_v22 = vsel %vm286_vm5, %v5231_v5, %v1934_v0  ;;  %v6065_v42 = vld [vmem:[#allocation4_spill] sm:$0xff]  ;;  %v6076_v0 = vld [vmem:[#allocation49_spill] sm:$0xff]  ;;  %vm2413_vm5 = vcmask 1040384  }
 0x657   :  { %v1958_v48 = vmul.f32 %v1942_v36, %v6061_v2  ;;  %2214 = vmatprep.subr.bf16.mxu1 %v1906_v26  ;;  %v1980_v40 = vpop.permute.xlu1 %1979  ;;  %v1957_v6 = vmul.f32 %v1936_v22, %v6065_v42 }
 0x658   :  { %2215 = vmatpush1.bf16.msra.mxu1 %v1905_v17  ;;  %v1989_v5 = vsel %vm335_vm6, %v1980_v40, %v5241_v59  ;;  %v1983_v59 = vsel %vm335_vm6, %v5237_v46, %v1980_v40  ;;  %v6075_v17 = vld [vmem:[#allocation47_spill] sm:$0xff] }
 0x659   :  { %v1982_v8 = vpop.permute.xlu0 %1981  ;;  %2216 = vmatprep.subr.bf16.mxu1 %v1914_v53  ;;  %v1962_v35 = vpack.c.bf16 %v1958_v48, %v1954_v27  ;;  %v2002_v49 = vmul.f32 %v1989_v5, %v6070_v7  ;;  %v2001_v41 = vmul.f32 %v1983_v59, %v6072_v60  ;;  %v6077_v48 = vld [vmem:[#allocation14_spill] sm:$0xff] }
 0x65a   :  { %v1990_v28 = vsel %vm335_vm6, %v1982_v8, %v5243_v20  ;;  %v1984_v21 = vsel %vm335_vm6, %v5239_v45, %v1982_v8  ;;  %v1961_v20 = vpack.c.bf16 %v1957_v6, %v1953_v32  ;;  %v6082_v6 = vld [vmem:[#allocation23_spill] sm:$0xff] }
 0x65b   :  { %v2006_v47 = vmul.f32 %v1990_v28, %v6068_v1  ;;  %v2005_v44 = vmul.f32 %v1984_v21, %v6071_v61 }
 0x65c   :  { %2217 = vmatpush1.bf16.msra.mxu1 %v1913_v24 }
 0x65d   :  { %2218 = vmatprep.subr.bf16.mxu1 %v1962_v35  ;;  %v2010_v51 = vpack.c.bf16 %v2006_v47, %v2002_v49  ;;  %v2009_v45 = vpack.c.bf16 %v2005_v44, %v2001_v41  ;;  %v2028_v19 = vpop.permute.xlu0 %2027  ;;  %v6084_v44 = vld [vmem:[#allocation44_spill] sm:$0xff] }
 0x65e   :  { %v2031_v43 = vsel %vm384_vm7, %v5245_v34, %v2028_v19  ;;  %v2037_v46 = vsel %vm384_vm7, %v2028_v19, %v5251_v37  ;;  %v6085_v19 = vld [vmem:[#allocation38_spill] sm:$0xff] }
 0x65f   :  { %v2049_v25 = vmul.f32 %v2031_v43, %v6073_v39  ;;  %v2050_v50 = vmul.f32 %v2037_v46, %v6074_v30  ;;  %v6086_v46 = vld [vmem:[#allocation42_spill] sm:$0xff] }
 0x660   :  { %2219 = vmatpush1.bf16.msra.mxu1 %v1961_v20  ;;  %v6083_v20 = vld [vmem:[#allocation41_spill] sm:$0xff] }
 0x661   :  { %2220 = vmatprep.subr.bf16.mxu1 %v2010_v51  ;;  %v2076_v63 = vpop.permute.xlu0 %2075  ;;  %v2259_v61 = vrot.slane %v6083_v20, 4  ;;  %v2260_v51 = vrot.slane %v6084_v44, 4 }
 0x662   :  { %v2079_v37 = vsel %vm433_vm8, %v5263_v3, %v2076_v63  ;;  %v6079_v3 = vld [vmem:[#allocation18_spill] sm:$0xff] }
 0x663   :  { %v2097_v40 = vmul.f32 %v2079_v37, %v6077_v48  ;;  %v5632_v43 = vsel %vm2277_vm9, %v6085_v19, %v2259_v61  ;;  %v2326_v19 = vld [vmem:[%s5780_s12] sm:$0x1] }
 0x664   :  { %2221 = vmatpush1.bf16.msra.mxu1 %v2009_v45 }
 0x668   :  { %v2152_v11 = vpop.permute.xlu1 %2151 }
 0x66c   :  { %v2030_v23 = vpop.permute.xlu1 %2029 }
 0x66d   :  { %v2032_v12 = vsel %vm384_vm7, %v5247_v10, %v2030_v23  ;;  %v2038_v31 = vsel %vm384_vm7, %v2030_v23, %v5253_v54  ;;  %v2085_v10 = vsel %vm433_vm8, %v2076_v63, %v5433_v4  ;;  %v5636_v63 = vsel %vm2277_vm9, %v6086_v46, %v2260_v51 }
 0x66e   :  { %v2053_v34 = vmul.f32 %v2032_v12, %v6075_v17  ;;  %v2054_v26 = vmul.f32 %v2038_v31, %v6076_v0  ;;  %v2098_v53 = vmul.f32 %v2085_v10, %v6078_v38  ;;  %v21_v46 = vstv %s5781_s13 }
 0x66f   :  { %22 = vst [vmem:[#allocation3] sm:$0x1] %v21_v46 }
 0x670   :  { %v2057_v33 = vpack.c.bf16 %v2053_v34, %v2049_v25  ;;  %v2078_v36 = vpop.permute.xlu1 %2077  ;;  %v2058_v22 = vpack.c.bf16 %v2054_v26, %v2050_v50 }
 0x671   :  { %v2080_v54 = vsel %vm433_vm8, %v6051_v15, %v2078_v36  ;;  %v2086_v2 = vsel %vm433_vm8, %v2078_v36, %v5438_v57 }
 0x672   :  { %v2101_v14 = vmul.f32 %v2080_v54, %v6079_v3  ;;  %v2102_v27 = vmul.f32 %v2086_v2, %v6080_v56  ;;  %2222 = vmatprep.subr.bf16.mxu1 %v2058_v22 }
 0x673   :  { %2223 = vmatpush1.bf16.msra.mxu1 %v2057_v33 }
 0x674   :  { %v2105_v4 = vpack.c.bf16 %v2101_v14, %v2097_v40  ;;  %v2106_v8 = vpack.c.bf16 %v2102_v27, %v2098_v53  ;;  %v3041_v27 = vmov 0.0|0.0  }
 0x676   :  { %2224 = vmatprep.subr.bf16.mxu1 %v2106_v8 }
 0x677   :  { %2225 = vmatpush1.bf16.msra.mxu1 %v2105_v4  ;;  %v3043_v4 = vmov 0.0  }
 0x678   :  { %2977 = vmatprep.subr.bf16.mxu1 %v3041_v27 }
 0x67a   :  { %2241 = vmatmul.mubr.bf16.vlgmr.msra.gmra.mrb[12].mxu1 %v6059_v18 }
 0x67b   :  { %2957 = vmatprep.mubr.msk.f32.mxu1 %vm3042_vm10, %v3043_v4 }
 0x69b   :  { %v2288_v15 = vpop.xlane.xlu0 %2287 }
 0x69c   :  { %v5612_v42 = vmul.f32 0.00390625, %v2288_v15 }
 0x69e   :  { %v2294_v57 = vsub.f32 %v6081_v9, %v5612_v42  ;;  %v2295_v5 = vsub.f32 %v6082_v6, %v5612_v42 }
 0x6a0   :  { %v2298_v28 = vmul.f32 %v2294_v57, %v2294_v57  ;;  %v2299_v62 = vmul.f32 %v2295_v5, %v2295_v5 }
 0x6a2   :  { %v2302_v24 = vadd.f32 %v2299_v62, %v2298_v28 }
 0x6a4   :  { %2303 = vadd.xlane.f32.xlu0 %v2302_v24 }
 0x71d   :  { %v2201_v21 = vpop.f32.mrb[12].mxu0 }
 0x71e   :  { %v2202_v1 = vadd.f32 %v2201_v21, %v2152_v11  ;;  %v2203_v47 = vpop.f32.mrb[13].mxu0 }
 0x71f   :  { %v2204_v35 = vadd.f32 %v2203_v47, %v2152_v11  ;;  %v2205_v13 = vpop.f32.mrb[14].mxu0 }
 0x720   :  { %v2249_v32 = vmax.f32 %v2202_v1, 0.0  ;;  %v2206_v18 = vpop.f32.mrb[15].mxu0 }
 0x721   :  { %v2250_v59 = vmax.f32 %v2204_v35, 0.0 }
 0x722   :  { %v2269_v7 = vrot.slane %v2249_v32, 4 }
 0x723   :  { %v2270_v49 = vrot.slane %v2250_v59, 4 }
 0x724   :  { %v5622_v60 = vsel %vm2277_vm9, %v5065_v29, %v2269_v7  ;;  %v2597_v29 = vadd.f32 %v5636_v63, %v5632_v43 }
 0x725   :  { %v5626_v41 = vsel %vm2277_vm9, %v5115_v55, %v2270_v49 }
 0x726   :  { %v2289_v45 = vadd.f32 %v5626_v41, %v5622_v60 }
 0x728   :  { %2290 = vadd.xlane.f32.xlu1 %v2289_v45 }
 0x72c   :  { %2598 = vadd.xlane.f32.xlu1 %v2597_v29  ;;  %v2402_v29 = vld [vmem:[%s5782_s14] sm:$0xff] }
 0x74d   :  { %v2242_v23 = vpop.f32.mrb[12].mxu1 }
 0x74e   :  { %v2244_v12 = vpop.f32.mrb[13].mxu1  ;;  %v2243_v39 = vadd.f32 %v2242_v23, %v2152_v11 }
 0x74f   :  { %v2246_v55 = vpop.f32.mrb[14].mxu1  ;;  %v2245_v25 = vadd.f32 %v2244_v12, %v2152_v11 }
 0x750   :  { %v2247_v31 = vpop.f32.mrb[15].mxu1  ;;  %v2251_v30 = vmax.f32 %v2243_v39, 0.0 }
 0x751   :  { %v2252_v50 = vmax.f32 %v2245_v25, 0.0 }
 0x752   :  { %v2271_v37 = vrot.slane %v2251_v30, 4 }
 0x753   :  { %v2272_v10 = vrot.slane %v2252_v50, 4 }
 0x754   :  { %v5650_v40 = vsel %vm2277_vm9, %v6066_v58, %v2271_v37  ;;  %v2304_v58 = vpop.xlane.xlu0 %2303 }
 0x755   :  { %v5654_v38 = vsel %vm2277_vm9, %v6062_v52, %v2272_v10  ;;  %v2308_v52 = vmul.f32 0.00390625, %v2304_v58 }
 0x756   :  { %v2600_v14 = vadd.f32 %v5654_v38, %v5650_v40 }
 0x757   :  { %3008 = vrsqrt.f32 %v2308_v52  ;;  %vm2312_vm11 = vcmp.eq.f32.partialorder %v2308_v52, inf  ;;  %v2315_v18 = vand.u32 2147483648, %v2308_v52  ;;  %vm2314_vm12 = vcmp.eq.f32.partialorder %v2308_v52, 0.0 }
 0x761   :  { %v3009_v5 = vpop.eup %3008 }
 0x762   :  { %v2311_v21 = vmul.f32 %v3009_v5, %v2308_v52 }
 0x764   :  { %v2313_v13 = vsel %vm2312_vm11, %v2308_v52, %v2311_v21 }
 0x765   :  { %v2316_v7 = vsel %vm2314_vm12, %v2315_v18, %v2313_v13  ;;  %v2522_v18 = vld [vmem:[%s5784_s11] sm:$0xff] }
 0x766   :  { %v2324_v44 = vadd.f32 %v2316_v7, %v5612_v42 }
 0x7b5   :  { %v2291_v17 = vpop.xlane.xlu1 %2290 }
 0x7b6   :  { %v2293_v34 = vmul.f32 0.00390625, %v2291_v17 }
 0x7b8   :  { %v2296_v0 = vsub.f32 %v5622_v60, %v2293_v34  ;;  %v2297_v26 = vsub.f32 %v5626_v41, %v2293_v34 }
 0x7b9   :  { %v2599_v33 = vpop.xlane.xlu1 %2598 }
 0x7ba   :  { %v2300_v36 = vmul.f32 %v2296_v0, %v2296_v0  ;;  %v2301_v22 = vmul.f32 %v2297_v26, %v2297_v26  ;;  %v5642_v54 = vmul.f32 0.00390625, %v2599_v33 }
 0x7bc   :  { %v2605_v2 = vsub.f32 %v5632_v43, %v5642_v54  ;;  %v2606_v11 = vsub.f32 %v5636_v63, %v5642_v54  ;;  %v2305_v48 = vadd.f32 %v2301_v22, %v2300_v36 }
 0x7be   :  { %v2609_v53 = vmul.f32 %v2605_v2, %v2605_v2  ;;  %v2610_v3 = vmul.f32 %v2606_v11, %v2606_v11  ;;  %2306 = vadd.xlane.f32.xlu0 %v2305_v48  ;;  %v2403_v48 = vld [vmem:[%s5782_s14 + $0x8] sm:$0xff] }
 0x7c0   :  { %v2613_v56 = vadd.f32 %v2610_v3, %v2609_v53 }
 0x7c2   :  { %2601 = vadd.xlane.f32.xlu0 %v2600_v14  ;;  %2614 = vadd.xlane.f32.xlu1 %v2613_v56  ;;  %v2637_v14 = vld [vmem:[%s5780_s12] sm:$0x1] }
 0x7c3   :  { %v2404_v56 = vld [vmem:[%s5783_s15] sm:$0xff] }
 0x84b   :  { %v2307_v8 = vpop.xlane.xlu0 %2306 }
 0x84c   :  { %v2309_v15 = vmul.f32 0.00390625, %v2307_v8  ;;  %v2638_v8 = vld [vmem:[#allocation3] sm:$0x1] }
 0x84e   :  { %3010 = vrsqrt.f32 %v2309_v15  ;;  %vm2319_vm13 = vcmp.eq.f32.partialorder %v2309_v15, inf  ;;  %v2322_v49 = vand.u32 2147483648, %v2309_v15  ;;  %vm2321_vm14 = vcmp.eq.f32.partialorder %v2309_v15, 0.0 }
 0x84f   :  { %v2602_v57 = vpop.xlane.xlu0 %2601  ;;  %v2615_v23 = vpop.xlane.xlu1 %2614 }
 0x850   :  { %v2604_v28 = vmul.f32 0.00390625, %v2602_v57  ;;  %v2619_v55 = vmul.f32 0.00390625, %v2615_v23 }
 0x852   :  { %v2607_v62 = vsub.f32 %v5650_v40, %v2604_v28  ;;  %v2608_v24 = vsub.f32 %v5654_v38, %v2604_v28  ;;  %vm2623_vm2 = vcmp.eq.f32.partialorder %v2619_v55, inf  ;;  %v2626_v26 = vand.u32 2147483648, %v2619_v55 }
 0x853   :  { %vm2625_vm4 = vcmp.eq.f32.partialorder %v2619_v55, 0.0 }
 0x854   :  { %v2611_v1 = vmul.f32 %v2607_v62, %v2607_v62  ;;  %v2612_v47 = vmul.f32 %v2608_v24, %v2608_v24 }
 0x856   :  { %v2616_v35 = vadd.f32 %v2612_v47, %v2611_v1 }
 0x858   :  { %v3011_v32 = vpop.eup %3010  ;;  %2617 = vadd.xlane.f32.xlu0 %v2616_v35 }
 0x859   :  { %v2318_v59 = vmul.f32 %v3011_v32, %v2309_v15 }
 0x85b   :  { %v2320_v20 = vsel %vm2319_vm13, %v2309_v15, %v2318_v59 }
 0x85c   :  { %v2323_v61 = vsel %vm2321_vm14, %v2322_v49, %v2320_v20 }
 0x85d   :  { %v2325_v51 = vadd.f32 %v2323_v61, %v2293_v34  ;;  %v2327_v34 = vld [vmem:[#allocation3] sm:$0x1] }
 0x85f   :  { %v2978_v45 = vpack.c.bf16 %v2325_v51, %v2324_v44 }
 0x861   :  { %2979 = vmatpush3.bf16.msra.mxu1 %v2978_v45 }
 0x864   :  { %2958 = vmatmul.mubr.msk.f32.vlgmr.msra.gmra.mrb[16].mxu1 %vm525_vm1, %v2326_v19  ;;  %v3006_v19 = vld [vmem:[%s5785_s10] sm:$0xff]  }
 0x865   :  { %2962 = vmatprep.mubr.msk.f32.mxu1 %vm2406_vm15, %v2402_v29 }
 0x8e5   :  { %v2618_v42 = vpop.xlane.xlu0 %2617 }
 0x8e6   :  { %v2620_v12 = vmul.f32 0.00390625, %v2618_v42 }
 0x8e8   :  { %3012 = vrsqrt.f32 %v2620_v12  ;;  %vm2630_vm0 = vcmp.eq.f32.partialorder %v2620_v12, inf  ;;  %v2633_v17 = vand.u32 2147483648, %v2620_v12  ;;  %vm2632_vm3 = vcmp.eq.f32.partialorder %v2620_v12, 0.0 }
 0x8e9   :  { %3014 = vrsqrt.f32 %v2619_v55 }
 0x8f2   :  { %v3013_v31 = vpop.eup %3012 }
 0x8f3   :  { %v3015_v39 = vpop.eup %3014  ;;  %v2629_v25 = vmul.f32 %v3013_v31, %v2620_v12 }
 0x8f4   :  { %v2622_v30 = vmul.f32 %v3015_v39, %v2619_v55 }
 0x8f5   :  { %v2631_v50 = vsel %vm2630_vm0, %v2620_v12, %v2629_v25 }
 0x8f6   :  { %v2624_v0 = vsel %vm2623_vm2, %v2619_v55, %v2622_v30  ;;  %v2634_v37 = vsel %vm2632_vm3, %v2633_v17, %v2631_v50  ;;  %v2585_v50 = vld [vmem:[%s5896_s23] sm:$0xff] }
 0x8f7   :  { %v2627_v22 = vsel %vm2625_vm4, %v2626_v26, %v2624_v0  ;;  %v2636_v2 = vadd.f32 %v2634_v37, %v2604_v28  ;;  %v2586_v0 = vld [vmem:[%s5896_s23 + $0x8] sm:$0xff] }
 0x8f8   :  { %v2635_v53 = vadd.f32 %v2627_v22, %v5642_v54  ;;  %v2405_v54 = vld [vmem:[%s5783_s15 + $0x8] sm:$0xff] }
 0x8fa   :  { %v2981_v3 = vpack.c.bf16 %v2636_v2, %v2635_v53 }
 0x937   :  { %v2397_v10 = vpop.f32.mrb[16].mxu1 }
 0x938   :  { %v2398_v33 = vadd.f32 %v2397_v10, %v2327_v34  ;;  %v2959_v36 = vpop.f32.mrb[17].mxu1 }
 0x93a   :  { %v2401_v11 = vmax.f32 %v2398_v33, 0.0 }
 0x93c   :  { %2960 = vmatprep.subr.msk.mxu1 %vm2413_vm5, %v2401_v11 }
 0x93d   :  { %2961 = vmatpush3.msk.msra.mxu1 %vm2413_vm5, %v2401_v11 }
 0x93e   :  { %2963 = vmatmul.mubr.msk.f32.vlgmr.msra.gmra.mrb[18].mxu1 %vm2406_vm15, %v2403_v48  ;;  %2980 = vmatprep.subr.bf16.mxu1 %v3041_v27 }
 0x93f   :  { %2982 = vmatpush3.bf16.msra.mxu1 %v2981_v3  ;;  %2969 = vmatprep.mubr.msk.f32.mxu1 %vm3042_vm10, %v3043_v4 }
 0x942   :  { %2970 = vmatmul.mubr.msk.f32.vlgmr.msra.gmra.mrb[20].mxu1 %vm525_vm1, %v2637_v14 }
 0x943   :  { %2974 = vmatprep.mubr.msk.f32.mxu1 %vm2406_vm15, %v2402_v29 }
 0xa11   :  { %v2964_v27 = vpop.f32.mrb[18].mxu1 }
 0xa12   :  { %v2489_v58 = vadd.f32 %v2964_v27, %v2405_v54  ;;  %v2483_v52 = vpop.f32.mrb[19].mxu1 }
 0xa13   :  { %v2484_v4 = vadd.f32 %v2483_v52, %v2404_v56 }
 0xa14   :  { %v2930_v15 = vmul.f32 -1.442695, %v2489_v58 }
 0xa15   :  { %v2929_v57 = vmul.f32 -1.442695, %v2484_v4  ;;  %v2708_v5 = vpop.f32.mrb[20].mxu1 }
 0xa16   :  { %3016 = vpow2.f32 %v2930_v15  ;;  %v2709_v28 = vadd.f32 %v2708_v5, %v2638_v8  ;;  %v2971_v62 = vpop.f32.mrb[21].mxu1 }
 0xa17   :  { %3018 = vpow2.f32 %v2929_v57 }
 0xa18   :  { %v2712_v24 = vmax.f32 %v2709_v28, 0.0 }
 0xa1a   :  { %2972 = vmatprep.subr.msk.mxu1 %vm2413_vm5, %v2712_v24 }
 0xa1b   :  { %2973 = vmatpush3.msk.msra.mxu1 %vm2413_vm5, %v2712_v24 }
 0xa1c   :  { %2975 = vmatmul.mubr.msk.f32.vlgmr.msra.gmra.mrb[22].mxu1 %vm2406_vm15, %v2403_v48 }
 0xa20   :  { %v3017_v21 = vpop.eup %3016 }
 0xa21   :  { %v3019_v1 = vpop.eup %3018  ;;  %v2499_v47 = vadd.f32 1.0, %v3017_v21 }
 0xa22   :  { %v2498_v35 = vadd.f32 1.0, %v3019_v1 }
 0xa23   :  { %3020 = vrcp.f32 %v2499_v47 }
 0xa24   :  { %3022 = vrcp.f32 %v2498_v35 }
 0xa2d   :  { %v3021_v13 = vpop.eup %3020 }
 0xa2e   :  { %v3023_v32 = vpop.eup %3022  ;;  %2511 = vperm.xlu0 %2995, %v3021_v13  }
 0xa2f   :  { %2506 = vperm.xlu1 %2996, %v3023_v32  }
 0xa32   :  { %2526 = vperm.xlu0 %2995, %v2522_v18  }
 0xa36   :  { %2835 = vperm.xlu0 %2995, %v2522_v18  }
 0xaad   :  { %v2512_v59 = vpop.permute.xlu0 %2511 }
 0xaae   :  { %v2516_v7 = vmul.f32 %v2512_v59, %v5622_v60  ;;  %v2517_v49 = vmul.f32 %v2512_v59, %v5626_v41  ;;  %v2507_v20 = vpop.permute.xlu1 %2506 }
 0xaaf   :  { %v2514_v61 = vmul.f32 %v2507_v20, %v6081_v9  ;;  %v2515_v44 = vmul.f32 %v2507_v20, %v6082_v6 }
 0xab1   :  { %v2518_v51 = vpack.c.bf16 %v2516_v7, %v2514_v61  ;;  %v2519_v45 = vpack.c.bf16 %v2517_v49, %v2515_v44  ;;  %v2527_v25 = vpop.permute.xlu0 %2526 }
 0xab3   :  { %2542 = vmatprep.subr.bf16.mxu0 %v2519_v45 }
 0xab4   :  { %2543 = vmatpush1.bf16.msra.mxu0 %v2518_v51 }
 0xab7   :  { %2932 = vmatmul.mubr.msk.bf16.vlgmr.msra.gmra.mrb[16].mxu0 %vm525_vm1, %v3006_v19 }
 0xab8   :  { %2883 = vmatprep.mubr.bf16.mxu0 %v6060_v16  ;;  %v2523_v16 = vld [vmem:[%s5784_s11 + $0x8] sm:$0xff] }
 0xaef   :  { %v2976_v60 = vpop.f32.mrb[22].mxu1 }
 0xaf0   :  { %v2798_v46 = vadd.f32 %v2976_v60, %v2405_v54  ;;  %v2792_v41 = vpop.f32.mrb[23].mxu1 }
 0xaf1   :  { %v2793_v29 = vadd.f32 %v2792_v41, %v2404_v56 }
 0xaf2   :  { %v2938_v42 = vmul.f32 -1.442695, %v2798_v46 }
 0xaf3   :  { %v2937_v9 = vmul.f32 -1.442695, %v2793_v29 }
 0xaf4   :  { %3024 = vpow2.f32 %v2938_v42 }
 0xaf5   :  { %3026 = vpow2.f32 %v2937_v9 }
 0xafe   :  { %v3025_v6 = vpop.eup %3024 }
 0xaff   :  { %v3027_v23 = vpop.eup %3026  ;;  %v2808_v55 = vadd.f32 1.0, %v3025_v6 }
 0xb00   :  { %v2807_v12 = vadd.f32 1.0, %v3027_v23 }
 0xb02   :  { %3028 = vrcp.f32 %v2807_v12 }
 0xb03   :  { %3030 = vrcp.f32 %v2808_v55 }
 0xb0c   :  { %v3029_v31 = vpop.eup %3028 }
 0xb0d   :  { %2815 = vperm.xlu1 %2996, %v3029_v31   ;;  %v3031_v39 = vpop.eup %3030 }
 0xb11   :  { %2820 = vperm.xlu1 %2996, %v3031_v39  }
 0xb15   :  { %2531 = vperm.xlu1 %2996, %v2523_v16  }
 0xb19   :  { %2840 = vperm.xlu1 %2996, %v2523_v16  }
 0xb8a   :  { %v2576_v30 = vpop.f32.mrb[16].mxu0 }
 0xb8b   :  { %v2577_v17 = vadd.f32 %v2576_v30, %v2527_v25  ;;  %v2578_v34 = vpop.f32.mrb[17].mxu0 }
 0xb8c   :  { %v2579_v26 = vadd.f32 %v2578_v34, %v2527_v25  ;;  %v2816_v37 = vpop.permute.xlu1 %2815  ;;  %v2580_v10 = vpop.f32.mrb[18].mxu0 }
 0xb8d   :  { %v2589_v33 = vadd.f32 %v2585_v50, %v2577_v17  ;;  %v2582_v36 = vpop.f32.mrb[19].mxu0  ;;  %v2823_v11 = vmul.f32 %v2816_v37, %v5632_v43  ;;  %v2824_v48 = vmul.f32 %v2816_v37, %v5636_v63  ;;  %v3007_v43 = vld [vmem:[%s5785_s10] sm:$0xff]  }
 0xb8e   :  { %v2590_v22 = vadd.f32 %v2586_v0, %v2579_v26 }
 0xb8f   :  { %2593 = vst [vmem:[%s5786_s16] sm:$0xff] %v2589_v33 }
 0xb90   :  { %2594 = vst [vmem:[%s5786_s16 + $0x8] sm:$0xff] %v2590_v22  ;;  %v2821_v2 = vpop.permute.xlu1 %2820 }
 0xb91   :  { %v2825_v53 = vmul.f32 %v2821_v2, %v5650_v40  ;;  %v2826_v3 = vmul.f32 %v2821_v2, %v5654_v38  ;;  %v2836_v38 = vpop.permute.xlu0 %2835 }
 0xb93   :  { %v2827_v14 = vpack.c.bf16 %v2825_v53, %v2823_v11  ;;  %v2828_v54 = vpack.c.bf16 %v2826_v3, %v2824_v48 }
 0xb94   :  { %v2532_v58 = vpop.permute.xlu1 %2531 }
 0xb95   :  { %v2581_v52 = vadd.f32 %v2580_v10, %v2532_v58  ;;  %v2583_v4 = vadd.f32 %v2582_v36, %v2532_v58  ;;  %2851 = vmatprep.subr.bf16.mxu0 %v2828_v54 }
 0xb96   :  { %2852 = vmatpush1.bf16.msra.mxu0 %v2827_v14 }
 0xb97   :  { %v2587_v56 = vld [vmem:[%s5896_s23 + $0x20] sm:$0xff]  ;;  %v2588_v27 = vld [vmem:[%s5896_s23 + $0x28] sm:$0xff] }
 0xb98   :  { %v2591_v63 = vadd.f32 %v2587_v56, %v2581_v52  ;;  %v2592_v40 = vadd.f32 %v2588_v27, %v2583_v4  ;;  %v2841_v62 = vpop.permute.xlu1 %2840 }
 0xb99   :  { %2940 = vmatmul.mubr.msk.bf16.vlgmr.msra.gmra.mrb[20].mxu0 %vm525_vm1, %v3007_v43 }
 0xb9a   :  { %2595 = vst [vmem:[%s5786_s16 + $0x20] sm:$0xff] %v2591_v63  ;;  %2596 = vst [vmem:[%s5786_s16 + $0x28] sm:$0xff] %v2592_v40 }
 0xba1   :  { %v2894_v15 = vld [vmem:[%s5896_s23 + $0x10] sm:$0xff]  ;;  %v2895_v28 = vld [vmem:[%s5896_s23 + $0x18] sm:$0xff] }
 0xba2   :  { %v2896_v1 = vld [vmem:[%s5896_s23 + $0x30] sm:$0xff]  ;;  %v2897_v32 = vld [vmem:[%s5896_s23 + $0x38] sm:$0xff] }
 0xc6c   :  { %v2885_v8 = vpop.f32.mrb[20].mxu0 }
 0xc6d   :  { %v2886_v57 = vadd.f32 %v2885_v8, %v2836_v38  ;;  %v2887_v5 = vpop.f32.mrb[21].mxu0 }
 0xc6e   :  { %v2888_v24 = vadd.f32 %v2887_v5, %v2836_v38  ;;  %v2889_v21 = vpop.f32.mrb[22].mxu0 }
 0xc6f   :  { %v2898_v47 = vadd.f32 %v2894_v15, %v2886_v57  ;;  %v2890_v35 = vadd.f32 %v2889_v21, %v2841_v62  ;;  %v2891_v13 = vpop.f32.mrb[23].mxu0 }
 0xc70   :  { %v2899_v18 = vadd.f32 %v2895_v28, %v2888_v24  ;;  %v2892_v59 = vadd.f32 %v2891_v13, %v2841_v62 }
 0xc71   :  { %2902 = vst [vmem:[%s5786_s16 + $0x10] sm:$0xff] %v2898_v47  ;;  %v2900_v7 = vadd.f32 %v2896_v1, %v2890_v35 }
 0xc72   :  { %2903 = vst [vmem:[%s5786_s16 + $0x18] sm:$0xff] %v2899_v18  ;;  %v2901_v49 = vadd.f32 %v2897_v32, %v2892_v59 }
 0xc73   :  { %2904 = vst [vmem:[%s5786_s16 + $0x30] sm:$0xff] %v2900_v7 }
 0xc74   :  { %2905 = vst [vmem:[%s5786_s16 + $0x38] sm:$0xff] %v2901_v49 }

</bundles_post_ra>
